<compile_context>
chip_gen: v6e
topology: v6e:2x2x1
jax: 0.10.0
libtpu: 0.0.40
codegen_flags: <defaults>
</compile_context>

<pallas_src>
import functools

import jax
import jax.numpy as jnp
from jax.experimental import pallas as pl
from jax.experimental.pallas import tpu as pltpu


def _fused_lstm2_kernel(gx1_ref, h0_ref, c0_ref, whh1_ref, whh2_ref, wih2_ref,
                        b2_ref, y_ref, hT_ref, cT_ref, *,
                        hidden_size, t_chunk, unroll):
    """Fused 2-layer LSTM recurrence over one (batch-tile, time-chunk) block.

    Grid = (batch_tiles [parallel], time_chunks [arbitrary]).

    gx1_ref : (Bt, Tc, 4H)  precomputed x_t @ W_ih1^T + b1 for this chunk
    h0_ref  : (2, Bt, H)    initial hidden (layer 0, layer 1)
    c0_ref  : (2, Bt, H)    initial cell
    whh1_ref: (H, 4H)       layer-1 recurrent weights (pre-transposed)
    whh2_ref: (H, 4H)       layer-2 recurrent weights (pre-transposed)
    wih2_ref: (H, 4H)       layer-2 input weights (pre-transposed)
    b2_ref  : (1, 4H)       layer-2 combined bias (b_ih2 + b_hh2)
    y_ref   : (Bt, Tc, H)   layer-2 hidden output for this chunk (batch-first)
    hT_ref  : (2, Bt, H)    running / final hidden (VMEM-resident across time)
    cT_ref  : (2, Bt, H)    running / final cell
    """
    H = hidden_size
    tc = pl.program_id(1)

    @pl.when(tc == 0)
    def _():
        hT_ref[...] = h0_ref[...]
        cT_ref[...] = c0_ref[...]

    # ---- loop-invariants hoisted out of the (possibly fully unrolled) loop ----
    whh1 = whh1_ref[...]
    whh2 = whh2_ref[...]
    wih2 = wih2_ref[...]
    b_tile = y_ref.shape[0]
    b2b = jnp.broadcast_to(b2_ref[...], (b_tile, 4 * H))   # hoisted: no per-step bcast
    mm_dtype = whh1.dtype                                   # f32 (default) or bf16

    def gate_update(gates, c_prev):
        # sigmoid over the full 4H tile; tanh restricted to the g quarter.
        sig = jax.nn.sigmoid(gates)
        i_g = sig[:, 0 * H:1 * H]
        f_g = sig[:, 1 * H:2 * H]
        o_g = sig[:, 3 * H:4 * H]
        g_g = jnp.tanh(gates[:, 2 * H:3 * H])
        c_new = f_g * c_prev + i_g * g_g
        h_new = o_g * jnp.tanh(c_new)
        return h_new, c_new

    def step(t, carry):
        h1, c1, h2, c2 = carry
        # Both recurrent matmuls only need previous-step state, so the layer-2
        # h-projection is issued up front and overlaps the layer-1 work.
        gates2_hh = jnp.dot(h2.astype(mm_dtype), whh2,
                            preferred_element_type=jnp.float32)
        gates1 = gx1_ref[:, t, :].astype(jnp.float32) + jnp.dot(
            h1.astype(mm_dtype), whh1, preferred_element_type=jnp.float32)
        h1n, c1n = gate_update(gates1, c1)
        # Only this K=H matmul sits on the h1n critical path (no lane concat).
        gates2 = gates2_hh + jnp.dot(h1n.astype(mm_dtype), wih2,
                                     preferred_element_type=jnp.float32) + b2b
        h2n, c2n = gate_update(gates2, c2)
        y_ref[:, t, :] = h2n.astype(y_ref.dtype)
        return (h1n, c1n, h2n, c2n)

    init = (hT_ref[0], cT_ref[0], hT_ref[1], cT_ref[1])
    h1, c1, h2, c2 = jax.lax.fori_loop(0, t_chunk, step, init, unroll=unroll)

    # Carry state for the next chunk / final writeback (last write wins).
    hT_ref[0] = h1
    cT_ref[0] = c1
    hT_ref[1] = h2
    cT_ref[1] = c2


def _num_tensorcores():
    """2 on v7x-style megacore chips, 1 on v5e/v6e (conservative fallback: 1)."""
    try:
        kind = jax.devices()[0].device_kind.lower()
    except Exception:
        return 1
    return 2 if "v7" in kind else 1


def _pick_t_chunk(T, b_tile, H, mm_bytes, budget_bytes, cap=64):
    """Largest chunk that divides T, respects the sublane tiling rule, and fits budget."""
    # Time is the second-to-last dim of the gx1/y blocks: must be a multiple of
    # 8 or equal to the full extent T.
    cands = [d for d in range(1, T + 1)
             if T % d == 0 and (d == T or d % 8 == 0)]

    def footprint(t_c):
        return (2 * t_c * b_tile * 4 * H * mm_bytes        # gx1 chunk (double-buffered)
                + 2 * t_c * b_tile * H * 4                 # y chunk (double-buffered)
                + 3 * H * 4 * H * mm_bytes + 4 * H * 4     # weights + bias
                + 4 * 2 * b_tile * H * 4)                  # h0/c0 + hT/cT state

    fitting = [d for d in cands if d <= cap and footprint(d) <= budget_bytes]
    if fitting:
        best = max(fitting)
    else:
        best = min(cands)   # smallest legal chunk; raise vmem_limit if needed
    return best, footprint(best)


def att_encoder_forward(params, inp, hidden, cell, *, t_chunk=None,
                        use_bf16=False):
    """AttEncoder forward (2-layer LSTM, batch_first, eval-mode).

    inp:    (B, T, input_size)
    hidden: (2, B, H)
    cell:   (2, B, H)
    returns (output (B, T, H), hidden (2, B, H), cell (2, B, H))
    """
    assert len(params) == 2, "fused kernel is specialized to n_layers=2"
    (w_ih1, w_hh1, b_ih1, b_hh1), (w_ih2, w_hh2, b_ih2, b_hh2) = params

    B, T, _ = inp.shape
    H = w_hh1.shape[1]

    f32 = jnp.float32
    mm_dtype = jnp.bfloat16 if use_bf16 else f32
    mm_bytes = 2 if use_bf16 else 4

    # Batch tiling: only split when the chip really has 2 TensorCores (v7x)
    # and each shard keeps >= 8 sublanes (B % 16 == 0). On v5e/v6e the
    # "parallel" axis is a serial loop, so splitting would double wall time.
    if _num_tensorcores() >= 2 and B % 16 == 0:
        b_tile = B // 2
    else:
        b_tile = B
    n_btiles = B // b_tile

    # Chunk sizing against a conservative cross-generation VMEM budget.
    vmem_budget = 16 * 1024 * 1024
    if t_chunk is None:
        t_chunk, footprint = _pick_t_chunk(T, b_tile, H, mm_bytes, vmem_budget)
    else:
        assert T % t_chunk == 0 and (t_chunk == T or t_chunk % 8 == 0)
        _, footprint = _pick_t_chunk(t_chunk, b_tile, H, mm_bytes, vmem_budget)
    n_chunks = T // t_chunk

    vmem_limit = None
    if footprint > 12 * 1024 * 1024:
        vmem_limit = int(min(96 * 1024 * 1024, 2 * footprint))

    # Cap unrolling once the (B, 4H) gate tile spans multiple vregs.
    unroll = t_chunk if H <= 32 else min(8, t_chunk)

    x = inp.astype(f32)

    # Hoisted layer-1 input projection: one big matmul for all timesteps,
    # produced batch-major (B, T, 4H) so neither side needs a transpose.
    wih1_t = jnp.transpose(w_ih1).astype(f32)                         # (F, 4H)
    b1 = (b_ih1 + b_hh1).astype(f32)                                  # (4H,)
    gx1 = (jnp.einsum("btf,fg->btg", x, wih1_t)
           + b1[None, None, :]).astype(mm_dtype)                      # (B, T, 4H)

    whh1_t = jnp.transpose(w_hh1).astype(mm_dtype)                    # (H, 4H)
    whh2_t = jnp.transpose(w_hh2).astype(mm_dtype)                    # (H, 4H)
    wih2_t = jnp.transpose(w_ih2).astype(mm_dtype)                    # (H, 4H)
    b2 = (b_ih2 + b_hh2).reshape(1, 4 * H).astype(f32)                # (1, 4H)

    kernel = functools.partial(_fused_lstm2_kernel,
                               hidden_size=H, t_chunk=t_chunk, unroll=unroll)

    y, hT, cT = pl.pallas_call(
        kernel,
        out_shape=(
            jax.ShapeDtypeStruct((B, T, H), f32),
            jax.ShapeDtypeStruct((2, B, H), f32),
            jax.ShapeDtypeStruct((2, B, H), f32),
        ),
        grid_spec=pltpu.PrefetchScalarGridSpec(
            num_scalar_prefetch=0,
            grid=(n_btiles, n_chunks),
            in_specs=[
                pl.BlockSpec((b_tile, t_chunk, 4 * H), lambda b, c: (b, c, 0)),
                pl.BlockSpec((2, b_tile, H), lambda b, c: (0, b, 0)),
                pl.BlockSpec((2, b_tile, H), lambda b, c: (0, b, 0)),
                pl.BlockSpec((H, 4 * H), lambda b, c: (0, 0)),
                pl.BlockSpec((H, 4 * H), lambda b, c: (0, 0)),
                pl.BlockSpec((H, 4 * H), lambda b, c: (0, 0)),
                pl.BlockSpec((1, 4 * H), lambda b, c: (0, 0)),
            ],
            out_specs=[
                pl.BlockSpec((b_tile, t_chunk, H), lambda b, c: (b, c, 0)),
                pl.BlockSpec((2, b_tile, H), lambda b, c: (0, b, 0)),
                pl.BlockSpec((2, b_tile, H), lambda b, c: (0, b, 0)),
            ],
        ),
        compiler_params=pltpu.CompilerParams(
            dimension_semantics=("parallel", "arbitrary"),
            vmem_limit_bytes=vmem_limit,
        ),
    )(gx1, hidden.astype(f32), cell.astype(f32), whh1_t, whh2_t, wih2_t, b2)

    return y, hT, cT


# ----------------------------- reference (pure JAX) -----------------------------

def _lstm_layer_ref(x_tbf, h0, c0, w_ih, w_hh, b_ih, b_hh):
    H = h0.shape[-1]

    def step(carry, x_t):
        h, c = carry
        gates = x_t @ w_ih.T + h @ w_hh.T + b_ih + b_hh
        i = jax.nn.sigmoid(gates[:, 0 * H:1 * H])
        f = jax.nn.sigmoid(gates[:, 1 * H:2 * H])
        g = jnp.tanh(gates[:, 2 * H:3 * H])
        o = jax.nn.sigmoid(gates[:, 3 * H:4 * H])
        c_new = f * c + i * g
        h_new = o * jnp.tanh(c_new)
        return (h_new, c_new), h_new

    (hT, cT), y = jax.lax.scan(step, (h0, c0), x_tbf)
    return y, hT, cT


def att_encoder_forward_ref(params, inp, hidden, cell):
    x = jnp.transpose(inp, (1, 0, 2))
    new_h, new_c = [], []
    for layer in range(len(params)):
        w_ih, w_hh, b_ih, b_hh = params[layer]
        y, hT, cT = _lstm_layer_ref(x, hidden[layer], cell[layer],
                                    w_ih, w_hh, b_ih, b_hh)
        new_h.append(hT)
        new_c.append(cT)
        x = y
    return jnp.transpose(x, (1, 0, 2)), jnp.stack(new_h), jnp.stack(new_c)


# ----------------------------------- main ---------------------------------------

if __name__ == "__main__":
    # Small shapes consistent with the module's forward signature.
    batch = 8
    seq = 8
    input_size = 16
    hidden_size = 32
    n_layers = 2

    key = jax.random.PRNGKey(0)

    # Deterministic parameter init (PyTorch nn.LSTM style: U(-1/sqrt(H), 1/sqrt(H))).
    bound = 1.0 / jnp.sqrt(jnp.float32(hidden_size))
    params = []
    for layer in range(n_layers):
        in_f = input_size if layer == 0 else hidden_size
        key, k1, k2, k3, k4 = jax.random.split(key, 5)
        w_ih = jax.random.uniform(k1, (4 * hidden_size, in_f), jnp.float32, -bound, bound)
        w_hh = jax.random.uniform(k2, (4 * hidden_size, hidden_size), jnp.float32, -bound, bound)
        b_ih = jax.random.uniform(k3, (4 * hidden_size,), jnp.float32, -bound, bound)
        b_hh = jax.random.uniform(k4, (4 * hidden_size,), jnp.float32, -bound, bound)
        params.append((w_ih, w_hh, b_ih, b_hh))

    key, kx = jax.random.split(key)
    x = jax.random.normal(kx, (batch, seq, input_size), jnp.float32)
    # initHidden(batch): zeros
    h0 = jnp.zeros((n_layers, batch, hidden_size), jnp.float32)
    c0 = jnp.zeros((n_layers, batch, hidden_size), jnp.float32)

    out, hT, cT = att_encoder_forward(params, x, h0, c0)
    out = jax.block_until_ready(out)
    hT = jax.block_until_ready(hT)
    cT = jax.block_until_ready(cT)

    out_ref, hT_ref, cT_ref = att_encoder_forward_ref(params, x, h0, c0)

    assert out.shape == (batch, seq, hidden_size)
    assert hT.shape == (n_layers, batch, hidden_size)
    assert cT.shape == (n_layers, batch, hidden_size)
    assert jnp.allclose(out, out_ref, atol=2e-5, rtol=2e-5)
    assert jnp.allclose(hT, hT_ref, atol=2e-5, rtol=2e-5)
    assert jnp.allclose(cT, cT_ref, atol=2e-5, rtol=2e-5)

    print("KERNEL_OK")
</pallas_src>

<mosaic_0001>
module attributes {stable_mosaic.version = 11 : i64} {
  func.func @_fused_lstm2_kernel(%arg0: i32, %arg1: i32, %arg2: memref<8x8x128xf32, #tpu.memory_space<vmem>>, %arg3: memref<2x8x32xf32, #tpu.memory_space<vmem>>, %arg4: memref<2x8x32xf32, #tpu.memory_space<vmem>>, %arg5: memref<32x128xf32, #tpu.memory_space<vmem>>, %arg6: memref<32x128xf32, #tpu.memory_space<vmem>>, %arg7: memref<32x128xf32, #tpu.memory_space<vmem>>, %arg8: memref<1x128xf32, #tpu.memory_space<vmem>>, %arg9: memref<8x8x32xf32, #tpu.memory_space<vmem>>, %arg10: memref<2x8x32xf32, #tpu.memory_space<vmem>>, %arg11: memref<2x8x32xf32, #tpu.memory_space<vmem>>) attributes {dimension_semantics = [#tpu.dimension_semantics<parallel>, #tpu.dimension_semantics<arbitrary>], iteration_bounds = array<i64: 1, 1>, scalar_prefetch = 0 : i64, scratch_operands = 0 : i64, tpu.core_type = #tpu.core_type<tc>, window_params = [{transform_indices = @transform_0, window_bounds = array<i64: 8, 8, 128>}, {transform_indices = @transform_1, window_bounds = array<i64: 2, 8, 32>}, {transform_indices = @transform_2, window_bounds = array<i64: 2, 8, 32>}, {pipeline_mode = #tpu.pipeline_mode<synchronous>, transform_indices = @transform_3, window_bounds = array<i64: 32, 128>}, {pipeline_mode = #tpu.pipeline_mode<synchronous>, transform_indices = @transform_4, window_bounds = array<i64: 32, 128>}, {pipeline_mode = #tpu.pipeline_mode<synchronous>, transform_indices = @transform_5, window_bounds = array<i64: 32, 128>}, {pipeline_mode = #tpu.pipeline_mode<synchronous>, transform_indices = @transform_6, window_bounds = array<i64: 1, 128>}, {transform_indices = @transform_7, window_bounds = array<i64: 8, 8, 32>}, {transform_indices = @transform_8, window_bounds = array<i64: 2, 8, 32>}, {transform_indices = @transform_9, window_bounds = array<i64: 2, 8, 32>}]} {
    %c0_i32 = arith.constant 0 : i32
    %0 = arith.cmpi eq, %arg1, %c0_i32 : i32
    %1 = arith.extui %0 : i1 to i32
    %c0_i32_0 = arith.constant 0 : i32
    %2 = arith.cmpi ne, %1, %c0_i32_0 : i32
    scf.if %2 {
      %c0_103 = arith.constant 0 : index
      %c0_104 = arith.constant 0 : index
      %c0_105 = arith.constant 0 : index
      %373 = vector.load %arg3[%c0_103, %c0_104, %c0_105] : memref<2x8x32xf32, #tpu.memory_space<vmem>>, vector<2x8x32xf32>
      %c0_106 = arith.constant 0 : index
      %c0_107 = arith.constant 0 : index
      %c0_108 = arith.constant 0 : index
      %374 = vector.load %arg10[%c0_106, %c0_107, %c0_108] : memref<2x8x32xf32, #tpu.memory_space<vmem>>, vector<2x8x32xf32>
      tpu.vector_store %arg10[%c0_106, %c0_107, %c0_108], %373 {strides = array<i32>} : memref<2x8x32xf32, #tpu.memory_space<vmem>>, vector<2x8x32xf32>,
      %c0_109 = arith.constant 0 : index
      %c0_110 = arith.constant 0 : index
      %c0_111 = arith.constant 0 : index
      %375 = vector.load %arg4[%c0_109, %c0_110, %c0_111] : memref<2x8x32xf32, #tpu.memory_space<vmem>>, vector<2x8x32xf32>
      %c0_112 = arith.constant 0 : index
      %c0_113 = arith.constant 0 : index
      %c0_114 = arith.constant 0 : index
      %376 = vector.load %arg11[%c0_112, %c0_113, %c0_114] : memref<2x8x32xf32, #tpu.memory_space<vmem>>, vector<2x8x32xf32>
      tpu.vector_store %arg11[%c0_112, %c0_113, %c0_114], %375 {strides = array<i32>} : memref<2x8x32xf32, #tpu.memory_space<vmem>>, vector<2x8x32xf32>,
    } else {
    }
    %c0 = arith.constant 0 : index
    %c0_1 = arith.constant 0 : index
    %3 = vector.load %arg5[%c0, %c0_1] : memref<32x128xf32, #tpu.memory_space<vmem>>, vector<32x128xf32>
    %c0_2 = arith.constant 0 : index
    %c0_3 = arith.constant 0 : index
    %4 = vector.load %arg6[%c0_2, %c0_3] : memref<32x128xf32, #tpu.memory_space<vmem>>, vector<32x128xf32>
    %c0_4 = arith.constant 0 : index
    %c0_5 = arith.constant 0 : index
    %5 = vector.load %arg7[%c0_4, %c0_5] : memref<32x128xf32, #tpu.memory_space<vmem>>, vector<32x128xf32>
    %c0_6 = arith.constant 0 : index
    %c0_7 = arith.constant 0 : index
    %6 = vector.load %arg8[%c0_6, %c0_7] : memref<1x128xf32, #tpu.memory_space<vmem>>, vector<1x128xf32>
    %7 = vector.shape_cast %6 : vector<1x128xf32> to vector<1x128xf32>
    %8 = vector.broadcast %7 : vector<1x128xf32> to vector<8x128xf32>
    %c0_8 = arith.constant 0 : index
    %c0_9 = arith.constant 0 : index
    %c0_10 = arith.constant 0 : index
    %9 = vector.load %arg10[%c0_8, %c0_9, %c0_10] : memref<2x8x32xf32, #tpu.memory_space<vmem>>, vector<1x8x32xf32>
    %10 = vector.shape_cast %9 : vector<1x8x32xf32> to vector<8x32xf32>
    %c0_11 = arith.constant 0 : index
    %c0_12 = arith.constant 0 : index
    %c0_13 = arith.constant 0 : index
    %11 = vector.load %arg11[%c0_11, %c0_12, %c0_13] : memref<2x8x32xf32, #tpu.memory_space<vmem>>, vector<1x8x32xf32>
    %12 = vector.shape_cast %11 : vector<1x8x32xf32> to vector<8x32xf32>
    %c1 = arith.constant 1 : index
    %c0_14 = arith.constant 0 : index
    %c0_15 = arith.constant 0 : index
    %13 = vector.load %arg10[%c1, %c0_14, %c0_15] : memref<2x8x32xf32, #tpu.memory_space<vmem>>, vector<1x8x32xf32>
    %14 = vector.shape_cast %13 : vector<1x8x32xf32> to vector<8x32xf32>
    %c1_16 = arith.constant 1 : index
    %c0_17 = arith.constant 0 : index
    %c0_18 = arith.constant 0 : index
    %15 = vector.load %arg11[%c1_16, %c0_17, %c0_18] : memref<2x8x32xf32, #tpu.memory_space<vmem>>, vector<1x8x32xf32>
    %16 = vector.shape_cast %15 : vector<1x8x32xf32> to vector<8x32xf32>
    %c0_i32_19 = arith.constant 0 : i32
    %cst = arith.constant dense<0.000000e+00> : vector<8x128xf32>
    %17 = tpu.matmul %14, %4, %cst {dimension_numbers = #tpu.dot_dimension_numbers<[1], [0], [0], [1], [0, 0, 1, 1], [], []>} : vector<8x32xf32>, vector<32x128xf32>, vector<8x128xf32> -> vector<8x128xf32>
    %c0_20 = arith.constant 0 : index
    %18 = arith.index_cast %c0_i32_19 : i32 to index
    %c0_21 = arith.constant 0 : index
    %19 = vector.load %arg2[%c0_20, %18, %c0_21] : memref<8x8x128xf32, #tpu.memory_space<vmem>>, vector<8x1x128xf32>
    %20 = vector.shape_cast %19 : vector<8x1x128xf32> to vector<8x128xf32>
    %cst_22 = arith.constant dense<0.000000e+00> : vector<8x128xf32>
    %21 = tpu.matmul %10, %3, %cst_22 {dimension_numbers = #tpu.dot_dimension_numbers<[1], [0], [0], [1], [0, 0, 1, 1], [], []>} : vector<8x32xf32>, vector<32x128xf32>, vector<8x128xf32> -> vector<8x128xf32>
    %22 = arith.addf %20, %21 : vector<8x128xf32>
    %23 = arith.negf %22 : vector<8x128xf32>
    %24 = math.exp %23 : vector<8x128xf32>
    %cst_23 = arith.constant 1.000000e+00 : f32
    %25 = vector.broadcast %cst_23 : f32 to vector<8x128xf32>
    %26 = arith.addf %25, %24 : vector<8x128xf32>
    %27 = arith.divf %25, %26 : vector<8x128xf32>
    %28 = vector.extract_strided_slice %27 {offsets = [0, 0], sizes = [8, 32], strides = [1, 1]} : vector<8x128xf32> to vector<8x32xf32>
    %29 = vector.extract_strided_slice %27 {offsets = [0, 32], sizes = [8, 32], strides = [1, 1]} : vector<8x128xf32> to vector<8x32xf32>
    %30 = vector.extract_strided_slice %27 {offsets = [0, 96], sizes = [8, 32], strides = [1, 1]} : vector<8x128xf32> to vector<8x32xf32>
    %31 = vector.extract_strided_slice %22 {offsets = [0, 64], sizes = [8, 32], strides = [1, 1]} : vector<8x128xf32> to vector<8x32xf32>
    %32 = math.tanh %31 : vector<8x32xf32>
    %33 = arith.mulf %29, %12 : vector<8x32xf32>
    %34 = arith.mulf %28, %32 : vector<8x32xf32>
    %35 = arith.addf %33, %34 : vector<8x32xf32>
    %36 = math.tanh %35 : vector<8x32xf32>
    %37 = arith.mulf %30, %36 : vector<8x32xf32>
    %cst_24 = arith.constant dense<0.000000e+00> : vector<8x128xf32>
    %38 = tpu.matmul %37, %5, %cst_24 {dimension_numbers = #tpu.dot_dimension_numbers<[1], [0], [0], [1], [0, 0, 1, 1], [], []>} : vector<8x32xf32>, vector<32x128xf32>, vector<8x128xf32> -> vector<8x128xf32>
    %39 = arith.addf %17, %38 : vector<8x128xf32>
    %40 = arith.addf %39, %8 : vector<8x128xf32>
    %41 = arith.negf %40 : vector<8x128xf32>
    %42 = math.exp %41 : vector<8x128xf32>
    %cst_25 = arith.constant 1.000000e+00 : f32
    %43 = vector.broadcast %cst_25 : f32 to vector<8x128xf32>
    %44 = arith.addf %43, %42 : vector<8x128xf32>
    %45 = arith.divf %43, %44 : vector<8x128xf32>
    %46 = vector.extract_strided_slice %45 {offsets = [0, 0], sizes = [8, 32], strides = [1, 1]} : vector<8x128xf32> to vector<8x32xf32>
    %47 = vector.extract_strided_slice %45 {offsets = [0, 32], sizes = [8, 32], strides = [1, 1]} : vector<8x128xf32> to vector<8x32xf32>
    %48 = vector.extract_strided_slice %45 {offsets = [0, 96], sizes = [8, 32], strides = [1, 1]} : vector<8x128xf32> to vector<8x32xf32>
    %49 = vector.extract_strided_slice %40 {offsets = [0, 64], sizes = [8, 32], strides = [1, 1]} : vector<8x128xf32> to vector<8x32xf32>
    %50 = math.tanh %49 : vector<8x32xf32>
    %51 = arith.mulf %47, %16 : vector<8x32xf32>
    %52 = arith.mulf %46, %50 : vector<8x32xf32>
    %53 = arith.addf %51, %52 : vector<8x32xf32>
    %54 = math.tanh %53 : vector<8x32xf32>
    %55 = arith.mulf %48, %54 : vector<8x32xf32>
    %c0_26 = arith.constant 0 : index
    %56 = arith.index_cast %c0_i32_19 : i32 to index
    %c0_27 = arith.constant 0 : index
    %57 = vector.load %arg9[%c0_26, %56, %c0_27] : memref<8x8x32xf32, #tpu.memory_space<vmem>>, vector<8x1x32xf32>
    %58 = vector.shape_cast %57 : vector<8x1x32xf32> to vector<8x32xf32>
    %59 = vector.shape_cast %55 : vector<8x32xf32> to vector<8x1x32xf32>
    tpu.vector_store %arg9[%c0_26, %56, %c0_27], %59 {strides = array<i32>} : memref<8x8x32xf32, #tpu.memory_space<vmem>>, vector<8x1x32xf32>,
    %c1_i32 = arith.constant 1 : i32
    %cst_28 = arith.constant dense<0.000000e+00> : vector<8x128xf32>
    %60 = tpu.matmul %55, %4, %cst_28 {dimension_numbers = #tpu.dot_dimension_numbers<[1], [0], [0], [1], [0, 0, 1, 1], [], []>} : vector<8x32xf32>, vector<32x128xf32>, vector<8x128xf32> -> vector<8x128xf32>
    %c0_29 = arith.constant 0 : index
    %61 = arith.index_cast %c1_i32 : i32 to index
    %c0_30 = arith.constant 0 : index
    %62 = vector.load %arg2[%c0_29, %61, %c0_30] : memref<8x8x128xf32, #tpu.memory_space<vmem>>, vector<8x1x128xf32>
    %63 = vector.shape_cast %62 : vector<8x1x128xf32> to vector<8x128xf32>
    %cst_31 = arith.constant dense<0.000000e+00> : vector<8x128xf32>
    %64 = tpu.matmul %37, %3, %cst_31 {dimension_numbers = #tpu.dot_dimension_numbers<[1], [0], [0], [1], [0, 0, 1, 1], [], []>} : vector<8x32xf32>, vector<32x128xf32>, vector<8x128xf32> -> vector<8x128xf32>
    %65 = arith.addf %63, %64 : vector<8x128xf32>
    %66 = arith.negf %65 : vector<8x128xf32>
    %67 = math.exp %66 : vector<8x128xf32>
    %cst_32 = arith.constant 1.000000e+00 : f32
    %68 = vector.broadcast %cst_32 : f32 to vector<8x128xf32>
    %69 = arith.addf %68, %67 : vector<8x128xf32>
    %70 = arith.divf %68, %69 : vector<8x128xf32>
    %71 = vector.extract_strided_slice %70 {offsets = [0, 0], sizes = [8, 32], strides = [1, 1]} : vector<8x128xf32> to vector<8x32xf32>
    %72 = vector.extract_strided_slice %70 {offsets = [0, 32], sizes = [8, 32], strides = [1, 1]} : vector<8x128xf32> to vector<8x32xf32>
    %73 = vector.extract_strided_slice %70 {offsets = [0, 96], sizes = [8, 32], strides = [1, 1]} : vector<8x128xf32> to vector<8x32xf32>
    %74 = vector.extract_strided_slice %65 {offsets = [0, 64], sizes = [8, 32], strides = [1, 1]} : vector<8x128xf32> to vector<8x32xf32>
    %75 = math.tanh %74 : vector<8x32xf32>
    %76 = arith.mulf %72, %35 : vector<8x32xf32>
    %77 = arith.mulf %71, %75 : vector<8x32xf32>
    %78 = arith.addf %76, %77 : vector<8x32xf32>
    %79 = math.tanh %78 : vector<8x32xf32>
    %80 = arith.mulf %73, %79 : vector<8x32xf32>
    %cst_33 = arith.constant dense<0.000000e+00> : vector<8x128xf32>
    %81 = tpu.matmul %80, %5, %cst_33 {dimension_numbers = #tpu.dot_dimension_numbers<[1], [0], [0], [1], [0, 0, 1, 1], [], []>} : vector<8x32xf32>, vector<32x128xf32>, vector<8x128xf32> -> vector<8x128xf32>
    %82 = arith.addf %60, %81 : vector<8x128xf32>
    %83 = arith.addf %82, %8 : vector<8x128xf32>
    %84 = arith.negf %83 : vector<8x128xf32>
    %85 = math.exp %84 : vector<8x128xf32>
    %cst_34 = arith.constant 1.000000e+00 : f32
    %86 = vector.broadcast %cst_34 : f32 to vector<8x128xf32>
    %87 = arith.addf %86, %85 : vector<8x128xf32>
    %88 = arith.divf %86, %87 : vector<8x128xf32>
    %89 = vector.extract_strided_slice %88 {offsets = [0, 0], sizes = [8, 32], strides = [1, 1]} : vector<8x128xf32> to vector<8x32xf32>
    %90 = vector.extract_strided_slice %88 {offsets = [0, 32], sizes = [8, 32], strides = [1, 1]} : vector<8x128xf32> to vector<8x32xf32>
    %91 = vector.extract_strided_slice %88 {offsets = [0, 96], sizes = [8, 32], strides = [1, 1]} : vector<8x128xf32> to vector<8x32xf32>
    %92 = vector.extract_strided_slice %83 {offsets = [0, 64], sizes = [8, 32], strides = [1, 1]} : vector<8x128xf32> to vector<8x32xf32>
    %93 = math.tanh %92 : vector<8x32xf32>
    %94 = arith.mulf %90, %53 : vector<8x32xf32>
    %95 = arith.mulf %89, %93 : vector<8x32xf32>
    %96 = arith.addf %94, %95 : vector<8x32xf32>
    %97 = math.tanh %96 : vector<8x32xf32>
    %98 = arith.mulf %91, %97 : vector<8x32xf32>
    %c0_35 = arith.constant 0 : index
    %99 = arith.index_cast %c1_i32 : i32 to index
    %c0_36 = arith.constant 0 : index
    %100 = vector.load %arg9[%c0_35, %99, %c0_36] : memref<8x8x32xf32, #tpu.memory_space<vmem>>, vector<8x1x32xf32>
    %101 = vector.shape_cast %100 : vector<8x1x32xf32> to vector<8x32xf32>
    %102 = vector.shape_cast %98 : vector<8x32xf32> to vector<8x1x32xf32>
    tpu.vector_store %arg9[%c0_35, %99, %c0_36], %102 {strides = array<i32>} : memref<8x8x32xf32, #tpu.memory_space<vmem>>, vector<8x1x32xf32>,
    %c2_i32 = arith.constant 2 : i32
    %cst_37 = arith.constant dense<0.000000e+00> : vector<8x128xf32>
    %103 = tpu.matmul %98, %4, %cst_37 {dimension_numbers = #tpu.dot_dimension_numbers<[1], [0], [0], [1], [0, 0, 1, 1], [], []>} : vector<8x32xf32>, vector<32x128xf32>, vector<8x128xf32> -> vector<8x128xf32>
    %c0_38 = arith.constant 0 : index
    %104 = arith.index_cast %c2_i32 : i32 to index
    %c0_39 = arith.constant 0 : index
    %105 = vector.load %arg2[%c0_38, %104, %c0_39] : memref<8x8x128xf32, #tpu.memory_space<vmem>>, vector<8x1x128xf32>
    %106 = vector.shape_cast %105 : vector<8x1x128xf32> to vector<8x128xf32>
    %cst_40 = arith.constant dense<0.000000e+00> : vector<8x128xf32>
    %107 = tpu.matmul %80, %3, %cst_40 {dimension_numbers = #tpu.dot_dimension_numbers<[1], [0], [0], [1], [0, 0, 1, 1], [], []>} : vector<8x32xf32>, vector<32x128xf32>, vector<8x128xf32> -> vector<8x128xf32>
    %108 = arith.addf %106, %107 : vector<8x128xf32>
    %109 = arith.negf %108 : vector<8x128xf32>
    %110 = math.exp %109 : vector<8x128xf32>
    %cst_41 = arith.constant 1.000000e+00 : f32
    %111 = vector.broadcast %cst_41 : f32 to vector<8x128xf32>
    %112 = arith.addf %111, %110 : vector<8x128xf32>
    %113 = arith.divf %111, %112 : vector<8x128xf32>
    %114 = vector.extract_strided_slice %113 {offsets = [0, 0], sizes = [8, 32], strides = [1, 1]} : vector<8x128xf32> to vector<8x32xf32>
    %115 = vector.extract_strided_slice %113 {offsets = [0, 32], sizes = [8, 32], strides = [1, 1]} : vector<8x128xf32> to vector<8x32xf32>
    %116 = vector.extract_strided_slice %113 {offsets = [0, 96], sizes = [8, 32], strides = [1, 1]} : vector<8x128xf32> to vector<8x32xf32>
    %117 = vector.extract_strided_slice %108 {offsets = [0, 64], sizes = [8, 32], strides = [1, 1]} : vector<8x128xf32> to vector<8x32xf32>
    %118 = math.tanh %117 : vector<8x32xf32>
    %119 = arith.mulf %115, %78 : vector<8x32xf32>
    %120 = arith.mulf %114, %118 : vector<8x32xf32>
    %121 = arith.addf %119, %120 : vector<8x32xf32>
    %122 = math.tanh %121 : vector<8x32xf32>
    %123 = arith.mulf %116, %122 : vector<8x32xf32>
    %cst_42 = arith.constant dense<0.000000e+00> : vector<8x128xf32>
    %124 = tpu.matmul %123, %5, %cst_42 {dimension_numbers = #tpu.dot_dimension_numbers<[1], [0], [0], [1], [0, 0, 1, 1], [], []>} : vector<8x32xf32>, vector<32x128xf32>, vector<8x128xf32> -> vector<8x128xf32>
    %125 = arith.addf %103, %124 : vector<8x128xf32>
    %126 = arith.addf %125, %8 : vector<8x128xf32>
    %127 = arith.negf %126 : vector<8x128xf32>
    %128 = math.exp %127 : vector<8x128xf32>
    %cst_43 = arith.constant 1.000000e+00 : f32
    %129 = vector.broadcast %cst_43 : f32 to vector<8x128xf32>
    %130 = arith.addf %129, %128 : vector<8x128xf32>
    %131 = arith.divf %129, %130 : vector<8x128xf32>
    %132 = vector.extract_strided_slice %131 {offsets = [0, 0], sizes = [8, 32], strides = [1, 1]} : vector<8x128xf32> to vector<8x32xf32>
    %133 = vector.extract_strided_slice %131 {offsets = [0, 32], sizes = [8, 32], strides = [1, 1]} : vector<8x128xf32> to vector<8x32xf32>
    %134 = vector.extract_strided_slice %131 {offsets = [0, 96], sizes = [8, 32], strides = [1, 1]} : vector<8x128xf32> to vector<8x32xf32>
    %135 = vector.extract_strided_slice %126 {offsets = [0, 64], sizes = [8, 32], strides = [1, 1]} : vector<8x128xf32> to vector<8x32xf32>
    %136 = math.tanh %135 : vector<8x32xf32>
    %137 = arith.mulf %133, %96 : vector<8x32xf32>
    %138 = arith.mulf %132, %136 : vector<8x32xf32>
    %139 = arith.addf %137, %138 : vector<8x32xf32>
    %140 = math.tanh %139 : vector<8x32xf32>
    %141 = arith.mulf %134, %140 : vector<8x32xf32>
    %c0_44 = arith.constant 0 : index
    %142 = arith.index_cast %c2_i32 : i32 to index
    %c0_45 = arith.constant 0 : index
    %143 = vector.load %arg9[%c0_44, %142, %c0_45] : memref<8x8x32xf32, #tpu.memory_space<vmem>>, vector<8x1x32xf32>
    %144 = vector.shape_cast %143 : vector<8x1x32xf32> to vector<8x32xf32>
    %145 = vector.shape_cast %141 : vector<8x32xf32> to vector<8x1x32xf32>
    tpu.vector_store %arg9[%c0_44, %142, %c0_45], %145 {strides = array<i32>} : memref<8x8x32xf32, #tpu.memory_space<vmem>>, vector<8x1x32xf32>,
    %c3_i32 = arith.constant 3 : i32
    %cst_46 = arith.constant dense<0.000000e+00> : vector<8x128xf32>
    %146 = tpu.matmul %141, %4, %cst_46 {dimension_numbers = #tpu.dot_dimension_numbers<[1], [0], [0], [1], [0, 0, 1, 1], [], []>} : vector<8x32xf32>, vector<32x128xf32>, vector<8x128xf32> -> vector<8x128xf32>
    %c0_47 = arith.constant 0 : index
    %147 = arith.index_cast %c3_i32 : i32 to index
    %c0_48 = arith.constant 0 : index
    %148 = vector.load %arg2[%c0_47, %147, %c0_48] : memref<8x8x128xf32, #tpu.memory_space<vmem>>, vector<8x1x128xf32>
    %149 = vector.shape_cast %148 : vector<8x1x128xf32> to vector<8x128xf32>
    %cst_49 = arith.constant dense<0.000000e+00> : vector<8x128xf32>
    %150 = tpu.matmul %123, %3, %cst_49 {dimension_numbers = #tpu.dot_dimension_numbers<[1], [0], [0], [1], [0, 0, 1, 1], [], []>} : vector<8x32xf32>, vector<32x128xf32>, vector<8x128xf32> -> vector<8x128xf32>
    %151 = arith.addf %149, %150 : vector<8x128xf32>
    %152 = arith.negf %151 : vector<8x128xf32>
    %153 = math.exp %152 : vector<8x128xf32>
    %cst_50 = arith.constant 1.000000e+00 : f32
    %154 = vector.broadcast %cst_50 : f32 to vector<8x128xf32>
    %155 = arith.addf %154, %153 : vector<8x128xf32>
    %156 = arith.divf %154, %155 : vector<8x128xf32>
    %157 = vector.extract_strided_slice %156 {offsets = [0, 0], sizes = [8, 32], strides = [1, 1]} : vector<8x128xf32> to vector<8x32xf32>
    %158 = vector.extract_strided_slice %156 {offsets = [0, 32], sizes = [8, 32], strides = [1, 1]} : vector<8x128xf32> to vector<8x32xf32>
    %159 = vector.extract_strided_slice %156 {offsets = [0, 96], sizes = [8, 32], strides = [1, 1]} : vector<8x128xf32> to vector<8x32xf32>
    %160 = vector.extract_strided_slice %151 {offsets = [0, 64], sizes = [8, 32], strides = [1, 1]} : vector<8x128xf32> to vector<8x32xf32>
    %161 = math.tanh %160 : vector<8x32xf32>
    %162 = arith.mulf %158, %121 : vector<8x32xf32>
    %163 = arith.mulf %157, %161 : vector<8x32xf32>
    %164 = arith.addf %162, %163 : vector<8x32xf32>
    %165 = math.tanh %164 : vector<8x32xf32>
    %166 = arith.mulf %159, %165 : vector<8x32xf32>
    %cst_51 = arith.constant dense<0.000000e+00> : vector<8x128xf32>
    %167 = tpu.matmul %166, %5, %cst_51 {dimension_numbers = #tpu.dot_dimension_numbers<[1], [0], [0], [1], [0, 0, 1, 1], [], []>} : vector<8x32xf32>, vector<32x128xf32>, vector<8x128xf32> -> vector<8x128xf32>
    %168 = arith.addf %146, %167 : vector<8x128xf32>
    %169 = arith.addf %168, %8 : vector<8x128xf32>
    %170 = arith.negf %169 : vector<8x128xf32>
    %171 = math.exp %170 : vector<8x128xf32>
    %cst_52 = arith.constant 1.000000e+00 : f32
    %172 = vector.broadcast %cst_52 : f32 to vector<8x128xf32>
    %173 = arith.addf %172, %171 : vector<8x128xf32>
    %174 = arith.divf %172, %173 : vector<8x128xf32>
    %175 = vector.extract_strided_slice %174 {offsets = [0, 0], sizes = [8, 32], strides = [1, 1]} : vector<8x128xf32> to vector<8x32xf32>
    %176 = vector.extract_strided_slice %174 {offsets = [0, 32], sizes = [8, 32], strides = [1, 1]} : vector<8x128xf32> to vector<8x32xf32>
    %177 = vector.extract_strided_slice %174 {offsets = [0, 96], sizes = [8, 32], strides = [1, 1]} : vector<8x128xf32> to vector<8x32xf32>
    %178 = vector.extract_strided_slice %169 {offsets = [0, 64], sizes = [8, 32], strides = [1, 1]} : vector<8x128xf32> to vector<8x32xf32>
    %179 = math.tanh %178 : vector<8x32xf32>
    %180 = arith.mulf %176, %139 : vector<8x32xf32>
    %181 = arith.mulf %175, %179 : vector<8x32xf32>
    %182 = arith.addf %180, %181 : vector<8x32xf32>
    %183 = math.tanh %182 : vector<8x32xf32>
    %184 = arith.mulf %177, %183 : vector<8x32xf32>
    %c0_53 = arith.constant 0 : index
    %185 = arith.index_cast %c3_i32 : i32 to index
    %c0_54 = arith.constant 0 : index
    %186 = vector.load %arg9[%c0_53, %185, %c0_54] : memref<8x8x32xf32, #tpu.memory_space<vmem>>, vector<8x1x32xf32>
    %187 = vector.shape_cast %186 : vector<8x1x32xf32> to vector<8x32xf32>
    %188 = vector.shape_cast %184 : vector<8x32xf32> to vector<8x1x32xf32>
    tpu.vector_store %arg9[%c0_53, %185, %c0_54], %188 {strides = array<i32>} : memref<8x8x32xf32, #tpu.memory_space<vmem>>, vector<8x1x32xf32>,
    %c4_i32 = arith.constant 4 : i32
    %cst_55 = arith.constant dense<0.000000e+00> : vector<8x128xf32>
    %189 = tpu.matmul %184, %4, %cst_55 {dimension_numbers = #tpu.dot_dimension_numbers<[1], [0], [0], [1], [0, 0, 1, 1], [], []>} : vector<8x32xf32>, vector<32x128xf32>, vector<8x128xf32> -> vector<8x128xf32>
    %c0_56 = arith.constant 0 : index
    %190 = arith.index_cast %c4_i32 : i32 to index
    %c0_57 = arith.constant 0 : index
    %191 = vector.load %arg2[%c0_56, %190, %c0_57] : memref<8x8x128xf32, #tpu.memory_space<vmem>>, vector<8x1x128xf32>
    %192 = vector.shape_cast %191 : vector<8x1x128xf32> to vector<8x128xf32>
    %cst_58 = arith.constant dense<0.000000e+00> : vector<8x128xf32>
    %193 = tpu.matmul %166, %3, %cst_58 {dimension_numbers = #tpu.dot_dimension_numbers<[1], [0], [0], [1], [0, 0, 1, 1], [], []>} : vector<8x32xf32>, vector<32x128xf32>, vector<8x128xf32> -> vector<8x128xf32>
    %194 = arith.addf %192, %193 : vector<8x128xf32>
    %195 = arith.negf %194 : vector<8x128xf32>
    %196 = math.exp %195 : vector<8x128xf32>
    %cst_59 = arith.constant 1.000000e+00 : f32
    %197 = vector.broadcast %cst_59 : f32 to vector<8x128xf32>
    %198 = arith.addf %197, %196 : vector<8x128xf32>
    %199 = arith.divf %197, %198 : vector<8x128xf32>
    %200 = vector.extract_strided_slice %199 {offsets = [0, 0], sizes = [8, 32], strides = [1, 1]} : vector<8x128xf32> to vector<8x32xf32>
    %201 = vector.extract_strided_slice %199 {offsets = [0, 32], sizes = [8, 32], strides = [1, 1]} : vector<8x128xf32> to vector<8x32xf32>
    %202 = vector.extract_strided_slice %199 {offsets = [0, 96], sizes = [8, 32], strides = [1, 1]} : vector<8x128xf32> to vector<8x32xf32>
    %203 = vector.extract_strided_slice %194 {offsets = [0, 64], sizes = [8, 32], strides = [1, 1]} : vector<8x128xf32> to vector<8x32xf32>
    %204 = math.tanh %203 : vector<8x32xf32>
    %205 = arith.mulf %201, %164 : vector<8x32xf32>
    %206 = arith.mulf %200, %204 : vector<8x32xf32>
    %207 = arith.addf %205, %206 : vector<8x32xf32>
    %208 = math.tanh %207 : vector<8x32xf32>
    %209 = arith.mulf %202, %208 : vector<8x32xf32>
    %cst_60 = arith.constant dense<0.000000e+00> : vector<8x128xf32>
    %210 = tpu.matmul %209, %5, %cst_60 {dimension_numbers = #tpu.dot_dimension_numbers<[1], [0], [0], [1], [0, 0, 1, 1], [], []>} : vector<8x32xf32>, vector<32x128xf32>, vector<8x128xf32> -> vector<8x128xf32>
    %211 = arith.addf %189, %210 : vector<8x128xf32>
    %212 = arith.addf %211, %8 : vector<8x128xf32>
    %213 = arith.negf %212 : vector<8x128xf32>
    %214 = math.exp %213 : vector<8x128xf32>
    %cst_61 = arith.constant 1.000000e+00 : f32
    %215 = vector.broadcast %cst_61 : f32 to vector<8x128xf32>
    %216 = arith.addf %215, %214 : vector<8x128xf32>
    %217 = arith.divf %215, %216 : vector<8x128xf32>
    %218 = vector.extract_strided_slice %217 {offsets = [0, 0], sizes = [8, 32], strides = [1, 1]} : vector<8x128xf32> to vector<8x32xf32>
    %219 = vector.extract_strided_slice %217 {offsets = [0, 32], sizes = [8, 32], strides = [1, 1]} : vector<8x128xf32> to vector<8x32xf32>
    %220 = vector.extract_strided_slice %217 {offsets = [0, 96], sizes = [8, 32], strides = [1, 1]} : vector<8x128xf32> to vector<8x32xf32>
    %221 = vector.extract_strided_slice %212 {offsets = [0, 64], sizes = [8, 32], strides = [1, 1]} : vector<8x128xf32> to vector<8x32xf32>
    %222 = math.tanh %221 : vector<8x32xf32>
    %223 = arith.mulf %219, %182 : vector<8x32xf32>
    %224 = arith.mulf %218, %222 : vector<8x32xf32>
    %225 = arith.addf %223, %224 : vector<8x32xf32>
    %226 = math.tanh %225 : vector<8x32xf32>
    %227 = arith.mulf %220, %226 : vector<8x32xf32>
    %c0_62 = arith.constant 0 : index
    %228 = arith.index_cast %c4_i32 : i32 to index
    %c0_63 = arith.constant 0 : index
    %229 = vector.load %arg9[%c0_62, %228, %c0_63] : memref<8x8x32xf32, #tpu.memory_space<vmem>>, vector<8x1x32xf32>
    %230 = vector.shape_cast %229 : vector<8x1x32xf32> to vector<8x32xf32>
    %231 = vector.shape_cast %227 : vector<8x32xf32> to vector<8x1x32xf32>
    tpu.vector_store %arg9[%c0_62, %228, %c0_63], %231 {strides = array<i32>} : memref<8x8x32xf32, #tpu.memory_space<vmem>>, vector<8x1x32xf32>,
    %c5_i32 = arith.constant 5 : i32
    %cst_64 = arith.constant dense<0.000000e+00> : vector<8x128xf32>
    %232 = tpu.matmul %227, %4, %cst_64 {dimension_numbers = #tpu.dot_dimension_numbers<[1], [0], [0], [1], [0, 0, 1, 1], [], []>} : vector<8x32xf32>, vector<32x128xf32>, vector<8x128xf32> -> vector<8x128xf32>
    %c0_65 = arith.constant 0 : index
    %233 = arith.index_cast %c5_i32 : i32 to index
    %c0_66 = arith.constant 0 : index
    %234 = vector.load %arg2[%c0_65, %233, %c0_66] : memref<8x8x128xf32, #tpu.memory_space<vmem>>, vector<8x1x128xf32>
    %235 = vector.shape_cast %234 : vector<8x1x128xf32> to vector<8x128xf32>
    %cst_67 = arith.constant dense<0.000000e+00> : vector<8x128xf32>
    %236 = tpu.matmul %209, %3, %cst_67 {dimension_numbers = #tpu.dot_dimension_numbers<[1], [0], [0], [1], [0, 0, 1, 1], [], []>} : vector<8x32xf32>, vector<32x128xf32>, vector<8x128xf32> -> vector<8x128xf32>
    %237 = arith.addf %235, %236 : vector<8x128xf32>
    %238 = arith.negf %237 : vector<8x128xf32>
    %239 = math.exp %238 : vector<8x128xf32>
    %cst_68 = arith.constant 1.000000e+00 : f32
    %240 = vector.broadcast %cst_68 : f32 to vector<8x128xf32>
    %241 = arith.addf %240, %239 : vector<8x128xf32>
    %242 = arith.divf %240, %241 : vector<8x128xf32>
    %243 = vector.extract_strided_slice %242 {offsets = [0, 0], sizes = [8, 32], strides = [1, 1]} : vector<8x128xf32> to vector<8x32xf32>
    %244 = vector.extract_strided_slice %242 {offsets = [0, 32], sizes = [8, 32], strides = [1, 1]} : vector<8x128xf32> to vector<8x32xf32>
    %245 = vector.extract_strided_slice %242 {offsets = [0, 96], sizes = [8, 32], strides = [1, 1]} : vector<8x128xf32> to vector<8x32xf32>
    %246 = vector.extract_strided_slice %237 {offsets = [0, 64], sizes = [8, 32], strides = [1, 1]} : vector<8x128xf32> to vector<8x32xf32>
    %247 = math.tanh %246 : vector<8x32xf32>
    %248 = arith.mulf %244, %207 : vector<8x32xf32>
    %249 = arith.mulf %243, %247 : vector<8x32xf32>
    %250 = arith.addf %248, %249 : vector<8x32xf32>
    %251 = math.tanh %250 : vector<8x32xf32>
    %252 = arith.mulf %245, %251 : vector<8x32xf32>
    %cst_69 = arith.constant dense<0.000000e+00> : vector<8x128xf32>
    %253 = tpu.matmul %252, %5, %cst_69 {dimension_numbers = #tpu.dot_dimension_numbers<[1], [0], [0], [1], [0, 0, 1, 1], [], []>} : vector<8x32xf32>, vector<32x128xf32>, vector<8x128xf32> -> vector<8x128xf32>
    %254 = arith.addf %232, %253 : vector<8x128xf32>
    %255 = arith.addf %254, %8 : vector<8x128xf32>
    %256 = arith.negf %255 : vector<8x128xf32>
    %257 = math.exp %256 : vector<8x128xf32>
    %cst_70 = arith.constant 1.000000e+00 : f32
    %258 = vector.broadcast %cst_70 : f32 to vector<8x128xf32>
    %259 = arith.addf %258, %257 : vector<8x128xf32>
    %260 = arith.divf %258, %259 : vector<8x128xf32>
    %261 = vector.extract_strided_slice %260 {offsets = [0, 0], sizes = [8, 32], strides = [1, 1]} : vector<8x128xf32> to vector<8x32xf32>
    %262 = vector.extract_strided_slice %260 {offsets = [0, 32], sizes = [8, 32], strides = [1, 1]} : vector<8x128xf32> to vector<8x32xf32>
    %263 = vector.extract_strided_slice %260 {offsets = [0, 96], sizes = [8, 32], strides = [1, 1]} : vector<8x128xf32> to vector<8x32xf32>
    %264 = vector.extract_strided_slice %255 {offsets = [0, 64], sizes = [8, 32], strides = [1, 1]} : vector<8x128xf32> to vector<8x32xf32>
    %265 = math.tanh %264 : vector<8x32xf32>
    %266 = arith.mulf %262, %225 : vector<8x32xf32>
    %267 = arith.mulf %261, %265 : vector<8x32xf32>
    %268 = arith.addf %266, %267 : vector<8x32xf32>
    %269 = math.tanh %268 : vector<8x32xf32>
    %270 = arith.mulf %263, %269 : vector<8x32xf32>
    %c0_71 = arith.constant 0 : index
    %271 = arith.index_cast %c5_i32 : i32 to index
    %c0_72 = arith.constant 0 : index
    %272 = vector.load %arg9[%c0_71, %271, %c0_72] : memref<8x8x32xf32, #tpu.memory_space<vmem>>, vector<8x1x32xf32>
    %273 = vector.shape_cast %272 : vector<8x1x32xf32> to vector<8x32xf32>
    %274 = vector.shape_cast %270 : vector<8x32xf32> to vector<8x1x32xf32>
    tpu.vector_store %arg9[%c0_71, %271, %c0_72], %274 {strides = array<i32>} : memref<8x8x32xf32, #tpu.memory_space<vmem>>, vector<8x1x32xf32>,
    %c6_i32 = arith.constant 6 : i32
    %cst_73 = arith.constant dense<0.000000e+00> : vector<8x128xf32>
    %275 = tpu.matmul %270, %4, %cst_73 {dimension_numbers = #tpu.dot_dimension_numbers<[1], [0], [0], [1], [0, 0, 1, 1], [], []>} : vector<8x32xf32>, vector<32x128xf32>, vector<8x128xf32> -> vector<8x128xf32>
    %c0_74 = arith.constant 0 : index
    %276 = arith.index_cast %c6_i32 : i32 to index
    %c0_75 = arith.constant 0 : index
    %277 = vector.load %arg2[%c0_74, %276, %c0_75] : memref<8x8x128xf32, #tpu.memory_space<vmem>>, vector<8x1x128xf32>
    %278 = vector.shape_cast %277 : vector<8x1x128xf32> to vector<8x128xf32>
    %cst_76 = arith.constant dense<0.000000e+00> : vector<8x128xf32>
    %279 = tpu.matmul %252, %3, %cst_76 {dimension_numbers = #tpu.dot_dimension_numbers<[1], [0], [0], [1], [0, 0, 1, 1], [], []>} : vector<8x32xf32>, vector<32x128xf32>, vector<8x128xf32> -> vector<8x128xf32>
    %280 = arith.addf %278, %279 : vector<8x128xf32>
    %281 = arith.negf %280 : vector<8x128xf32>
    %282 = math.exp %281 : vector<8x128xf32>
    %cst_77 = arith.constant 1.000000e+00 : f32
    %283 = vector.broadcast %cst_77 : f32 to vector<8x128xf32>
    %284 = arith.addf %283, %282 : vector<8x128xf32>
    %285 = arith.divf %283, %284 : vector<8x128xf32>
    %286 = vector.extract_strided_slice %285 {offsets = [0, 0], sizes = [8, 32], strides = [1, 1]} : vector<8x128xf32> to vector<8x32xf32>
    %287 = vector.extract_strided_slice %285 {offsets = [0, 32], sizes = [8, 32], strides = [1, 1]} : vector<8x128xf32> to vector<8x32xf32>
    %288 = vector.extract_strided_slice %285 {offsets = [0, 96], sizes = [8, 32], strides = [1, 1]} : vector<8x128xf32> to vector<8x32xf32>
    %289 = vector.extract_strided_slice %280 {offsets = [0, 64], sizes = [8, 32], strides = [1, 1]} : vector<8x128xf32> to vector<8x32xf32>
    %290 = math.tanh %289 : vector<8x32xf32>
    %291 = arith.mulf %287, %250 : vector<8x32xf32>
    %292 = arith.mulf %286, %290 : vector<8x32xf32>
    %293 = arith.addf %291, %292 : vector<8x32xf32>
    %294 = math.tanh %293 : vector<8x32xf32>
    %295 = arith.mulf %288, %294 : vector<8x32xf32>
    %cst_78 = arith.constant dense<0.000000e+00> : vector<8x128xf32>
    %296 = tpu.matmul %295, %5, %cst_78 {dimension_numbers = #tpu.dot_dimension_numbers<[1], [0], [0], [1], [0, 0, 1, 1], [], []>} : vector<8x32xf32>, vector<32x128xf32>, vector<8x128xf32> -> vector<8x128xf32>
    %297 = arith.addf %275, %296 : vector<8x128xf32>
    %298 = arith.addf %297, %8 : vector<8x128xf32>
    %299 = arith.negf %298 : vector<8x128xf32>
    %300 = math.exp %299 : vector<8x128xf32>
    %cst_79 = arith.constant 1.000000e+00 : f32
    %301 = vector.broadcast %cst_79 : f32 to vector<8x128xf32>
    %302 = arith.addf %301, %300 : vector<8x128xf32>
    %303 = arith.divf %301, %302 : vector<8x128xf32>
    %304 = vector.extract_strided_slice %303 {offsets = [0, 0], sizes = [8, 32], strides = [1, 1]} : vector<8x128xf32> to vector<8x32xf32>
    %305 = vector.extract_strided_slice %303 {offsets = [0, 32], sizes = [8, 32], strides = [1, 1]} : vector<8x128xf32> to vector<8x32xf32>
    %306 = vector.extract_strided_slice %303 {offsets = [0, 96], sizes = [8, 32], strides = [1, 1]} : vector<8x128xf32> to vector<8x32xf32>
    %307 = vector.extract_strided_slice %298 {offsets = [0, 64], sizes = [8, 32], strides = [1, 1]} : vector<8x128xf32> to vector<8x32xf32>
    %308 = math.tanh %307 : vector<8x32xf32>
    %309 = arith.mulf %305, %268 : vector<8x32xf32>
    %310 = arith.mulf %304, %308 : vector<8x32xf32>
    %311 = arith.addf %309, %310 : vector<8x32xf32>
    %312 = math.tanh %311 : vector<8x32xf32>
    %313 = arith.mulf %306, %312 : vector<8x32xf32>
    %c0_80 = arith.constant 0 : index
    %314 = arith.index_cast %c6_i32 : i32 to index
    %c0_81 = arith.constant 0 : index
    %315 = vector.load %arg9[%c0_80, %314, %c0_81] : memref<8x8x32xf32, #tpu.memory_space<vmem>>, vector<8x1x32xf32>
    %316 = vector.shape_cast %315 : vector<8x1x32xf32> to vector<8x32xf32>
    %317 = vector.shape_cast %313 : vector<8x32xf32> to vector<8x1x32xf32>
    tpu.vector_store %arg9[%c0_80, %314, %c0_81], %317 {strides = array<i32>} : memref<8x8x32xf32, #tpu.memory_space<vmem>>, vector<8x1x32xf32>,
    %c7_i32 = arith.constant 7 : i32
    %cst_82 = arith.constant dense<0.000000e+00> : vector<8x128xf32>
    %318 = tpu.matmul %313, %4, %cst_82 {dimension_numbers = #tpu.dot_dimension_numbers<[1], [0], [0], [1], [0, 0, 1, 1], [], []>} : vector<8x32xf32>, vector<32x128xf32>, vector<8x128xf32> -> vector<8x128xf32>
    %c0_83 = arith.constant 0 : index
    %319 = arith.index_cast %c7_i32 : i32 to index
    %c0_84 = arith.constant 0 : index
    %320 = vector.load %arg2[%c0_83, %319, %c0_84] : memref<8x8x128xf32, #tpu.memory_space<vmem>>, vector<8x1x128xf32>
    %321 = vector.shape_cast %320 : vector<8x1x128xf32> to vector<8x128xf32>
    %cst_85 = arith.constant dense<0.000000e+00> : vector<8x128xf32>
    %322 = tpu.matmul %295, %3, %cst_85 {dimension_numbers = #tpu.dot_dimension_numbers<[1], [0], [0], [1], [0, 0, 1, 1], [], []>} : vector<8x32xf32>, vector<32x128xf32>, vector<8x128xf32> -> vector<8x128xf32>
    %323 = arith.addf %321, %322 : vector<8x128xf32>
    %324 = arith.negf %323 : vector<8x128xf32>
    %325 = math.exp %324 : vector<8x128xf32>
    %cst_86 = arith.constant 1.000000e+00 : f32
    %326 = vector.broadcast %cst_86 : f32 to vector<8x128xf32>
    %327 = arith.addf %326, %325 : vector<8x128xf32>
    %328 = arith.divf %326, %327 : vector<8x128xf32>
    %329 = vector.extract_strided_slice %328 {offsets = [0, 0], sizes = [8, 32], strides = [1, 1]} : vector<8x128xf32> to vector<8x32xf32>
    %330 = vector.extract_strided_slice %328 {offsets = [0, 32], sizes = [8, 32], strides = [1, 1]} : vector<8x128xf32> to vector<8x32xf32>
    %331 = vector.extract_strided_slice %328 {offsets = [0, 96], sizes = [8, 32], strides = [1, 1]} : vector<8x128xf32> to vector<8x32xf32>
    %332 = vector.extract_strided_slice %323 {offsets = [0, 64], sizes = [8, 32], strides = [1, 1]} : vector<8x128xf32> to vector<8x32xf32>
    %333 = math.tanh %332 : vector<8x32xf32>
    %334 = arith.mulf %330, %293 : vector<8x32xf32>
    %335 = arith.mulf %329, %333 : vector<8x32xf32>
    %336 = arith.addf %334, %335 : vector<8x32xf32>
    %337 = math.tanh %336 : vector<8x32xf32>
    %338 = arith.mulf %331, %337 : vector<8x32xf32>
    %cst_87 = arith.constant dense<0.000000e+00> : vector<8x128xf32>
    %339 = tpu.matmul %338, %5, %cst_87 {dimension_numbers = #tpu.dot_dimension_numbers<[1], [0], [0], [1], [0, 0, 1, 1], [], []>} : vector<8x32xf32>, vector<32x128xf32>, vector<8x128xf32> -> vector<8x128xf32>
    %340 = arith.addf %318, %339 : vector<8x128xf32>
    %341 = arith.addf %340, %8 : vector<8x128xf32>
    %342 = arith.negf %341 : vector<8x128xf32>
    %343 = math.exp %342 : vector<8x128xf32>
    %cst_88 = arith.constant 1.000000e+00 : f32
    %344 = vector.broadcast %cst_88 : f32 to vector<8x128xf32>
    %345 = arith.addf %344, %343 : vector<8x128xf32>
    %346 = arith.divf %344, %345 : vector<8x128xf32>
    %347 = vector.extract_strided_slice %346 {offsets = [0, 0], sizes = [8, 32], strides = [1, 1]} : vector<8x128xf32> to vector<8x32xf32>
    %348 = vector.extract_strided_slice %346 {offsets = [0, 32], sizes = [8, 32], strides = [1, 1]} : vector<8x128xf32> to vector<8x32xf32>
    %349 = vector.extract_strided_slice %346 {offsets = [0, 96], sizes = [8, 32], strides = [1, 1]} : vector<8x128xf32> to vector<8x32xf32>
    %350 = vector.extract_strided_slice %341 {offsets = [0, 64], sizes = [8, 32], strides = [1, 1]} : vector<8x128xf32> to vector<8x32xf32>
    %351 = math.tanh %350 : vector<8x32xf32>
    %352 = arith.mulf %348, %311 : vector<8x32xf32>
    %353 = arith.mulf %347, %351 : vector<8x32xf32>
    %354 = arith.addf %352, %353 : vector<8x32xf32>
    %355 = math.tanh %354 : vector<8x32xf32>
    %356 = arith.mulf %349, %355 : vector<8x32xf32>
    %c0_89 = arith.constant 0 : index
    %357 = arith.index_cast %c7_i32 : i32 to index
    %c0_90 = arith.constant 0 : index
    %358 = vector.load %arg9[%c0_89, %357, %c0_90] : memref<8x8x32xf32, #tpu.memory_space<vmem>>, vector<8x1x32xf32>
    %359 = vector.shape_cast %358 : vector<8x1x32xf32> to vector<8x32xf32>
    %360 = vector.shape_cast %356 : vector<8x32xf32> to vector<8x1x32xf32>
    tpu.vector_store %arg9[%c0_89, %357, %c0_90], %360 {strides = array<i32>} : memref<8x8x32xf32, #tpu.memory_space<vmem>>, vector<8x1x32xf32>,
    %c8_i32 = arith.constant 8 : i32
    %c0_91 = arith.constant 0 : index
    %c0_92 = arith.constant 0 : index
    %c0_93 = arith.constant 0 : index
    %361 = vector.load %arg10[%c0_91, %c0_92, %c0_93] : memref<2x8x32xf32, #tpu.memory_space<vmem>>, vector<1x8x32xf32>
    %362 = vector.shape_cast %361 : vector<1x8x32xf32> to vector<8x32xf32>
    %363 = vector.shape_cast %338 : vector<8x32xf32> to vector<1x8x32xf32>
    tpu.vector_store %arg10[%c0_91, %c0_92, %c0_93], %363 {strides = array<i32>} : memref<2x8x32xf32, #tpu.memory_space<vmem>>, vector<1x8x32xf32>,
    %c0_94 = arith.constant 0 : index
    %c0_95 = arith.constant 0 : index
    %c0_96 = arith.constant 0 : index
    %364 = vector.load %arg11[%c0_94, %c0_95, %c0_96] : memref<2x8x32xf32, #tpu.memory_space<vmem>>, vector<1x8x32xf32>
    %365 = vector.shape_cast %364 : vector<1x8x32xf32> to vector<8x32xf32>
    %366 = vector.shape_cast %336 : vector<8x32xf32> to vector<1x8x32xf32>
    tpu.vector_store %arg11[%c0_94, %c0_95, %c0_96], %366 {strides = array<i32>} : memref<2x8x32xf32, #tpu.memory_space<vmem>>, vector<1x8x32xf32>,
    %c1_97 = arith.constant 1 : index
    %c0_98 = arith.constant 0 : index
    %c0_99 = arith.constant 0 : index
    %367 = vector.load %arg10[%c1_97, %c0_98, %c0_99] : memref<2x8x32xf32, #tpu.memory_space<vmem>>, vector<1x8x32xf32>
    %368 = vector.shape_cast %367 : vector<1x8x32xf32> to vector<8x32xf32>
    %369 = vector.shape_cast %356 : vector<8x32xf32> to vector<1x8x32xf32>
    tpu.vector_store %arg10[%c1_97, %c0_98, %c0_99], %369 {strides = array<i32>} : memref<2x8x32xf32, #tpu.memory_space<vmem>>, vector<1x8x32xf32>,
    %c1_100 = arith.constant 1 : index
    %c0_101 = arith.constant 0 : index
    %c0_102 = arith.constant 0 : index
    %370 = vector.load %arg11[%c1_100, %c0_101, %c0_102] : memref<2x8x32xf32, #tpu.memory_space<vmem>>, vector<1x8x32xf32>
    %371 = vector.shape_cast %370 : vector<1x8x32xf32> to vector<8x32xf32>
    %372 = vector.shape_cast %354 : vector<8x32xf32> to vector<1x8x32xf32>
    tpu.vector_store %arg11[%c1_100, %c0_101, %c0_102], %372 {strides = array<i32>} : memref<2x8x32xf32, #tpu.memory_space<vmem>>, vector<1x8x32xf32>,
    return
  }
  func.func @transform_0(%arg0: i32, %arg1: i32) -> (i32, i32, i32) {
    %c0_i32 = arith.constant 0 : i32
    %c0_i32_0 = arith.constant 0 : i32
    return %arg0, %arg1, %c0_i32 : i32, i32, i32
  }
  func.func @transform_1(%arg0: i32, %arg1: i32) -> (i32, i32, i32) {
    %c0_i32 = arith.constant 0 : i32
    %c0_i32_0 = arith.constant 0 : i32
    %c0_i32_1 = arith.constant 0 : i32
    return %c0_i32, %arg0, %c0_i32_0 : i32, i32, i32
  }
  func.func @transform_2(%arg0: i32, %arg1: i32) -> (i32, i32, i32) {
    %c0_i32 = arith.constant 0 : i32
    %c0_i32_0 = arith.constant 0 : i32
    %c0_i32_1 = arith.constant 0 : i32
    return %c0_i32, %arg0, %c0_i32_0 : i32, i32, i32
  }
  func.func @transform_3(%arg0: i32, %arg1: i32) -> (i32, i32) {
    %c0_i32 = arith.constant 0 : i32
    %c0_i32_0 = arith.constant 0 : i32
    %c0_i32_1 = arith.constant 0 : i32
    return %c0_i32, %c0_i32_0 : i32, i32
  }
  func.func @transform_4(%arg0: i32, %arg1: i32) -> (i32, i32) {
    %c0_i32 = arith.constant 0 : i32
    %c0_i32_0 = arith.constant 0 : i32
    %c0_i32_1 = arith.constant 0 : i32
    return %c0_i32, %c0_i32_0 : i32, i32
  }
  func.func @transform_5(%arg0: i32, %arg1: i32) -> (i32, i32) {
    %c0_i32 = arith.constant 0 : i32
    %c0_i32_0 = arith.constant 0 : i32
    %c0_i32_1 = arith.constant 0 : i32
    return %c0_i32, %c0_i32_0 : i32, i32
  }
  func.func @transform_6(%arg0: i32, %arg1: i32) -> (i32, i32) {
    %c0_i32 = arith.constant 0 : i32
    %c0_i32_0 = arith.constant 0 : i32
    %c0_i32_1 = arith.constant 0 : i32
    return %c0_i32, %c0_i32_0 : i32, i32
  }
  func.func @transform_7(%arg0: i32, %arg1: i32) -> (i32, i32, i32) {
    %c0_i32 = arith.constant 0 : i32
    %c0_i32_0 = arith.constant 0 : i32
    return %arg0, %arg1, %c0_i32 : i32, i32, i32
  }
  func.func @transform_8(%arg0: i32, %arg1: i32) -> (i32, i32, i32) {
    %c0_i32 = arith.constant 0 : i32
    %c0_i32_0 = arith.constant 0 : i32
    %c0_i32_1 = arith.constant 0 : i32
    return %c0_i32, %arg0, %c0_i32_0 : i32, i32, i32
  }
  func.func @transform_9(%arg0: i32, %arg1: i32) -> (i32, i32, i32) {
    %c0_i32 = arith.constant 0 : i32
    %c0_i32_0 = arith.constant 0 : i32
    %c0_i32_1 = arith.constant 0 : i32
    return %c0_i32, %arg0, %c0_i32_0 : i32, i32, i32
  }
}

</mosaic_0001>

<bundles_post_ra>
// kernel: tpu_custom_call.1
= control target key start
LH: loop header
LB: loop body
LE: loop exit
PB: predicated region body
PF: predicated region fallthrough
CT: control target
= control target key end

     0   :  { %15 = vsyncpa [#allocation3], 0  ;;  %s8208_s0 = inlined_call_operand.hbm [shape: f32[8,8,128], index: 0, kind: input, shape index: {}]   ;;  %s8209_s1 = inlined_call_operand.hbm [shape: f32[2,8,32], index: 1, kind: input, shape index: {}]   ;;  %s8210_s2 = inlined_call_operand.hbm [shape: f32[2,8,32], index: 2, kind: input, shape index: {}]   ;;  %s8211_s3 = inlined_call_operand.hbm [shape: f32[32,128], index: 3, kind: input, shape index: {}]   ;;  %s8212_s4 = inlined_call_operand.hbm [shape: f32[32,128], index: 4, kind: input, shape index: {}]   ;;  %s8213_s5 = inlined_call_operand.hbm [shape: f32[32,128], index: 5, kind: input, shape index: {}]   ;;  %s8214_s6 = inlined_call_operand.vmem [shape: f32[1,128], index: 6, kind: input, shape index: {}]   ;;  %s8215_s7 = inlined_call_operand.hbm [shape: f32[8,8,32], index: 7, kind: output, shape index: {0}]   ;;  %s8216_s8 = inlined_call_operand.hbm [shape: f32[2,8,32], index: 8, kind: output, shape index: {1}]   ;;  %s8217_s9 = inlined_call_operand.hbm [shape: f32[2,8,32], index: 9, kind: output, shape index: {2}]  }
   0x1   :  { %16 = vsyncpa [#allocation6], 0 }
   0x2   :  { %17 = vsyncpa [#allocation9], 0 }
   0x3   :  { %18 = vsyncpa [#allocation12], 0 }
   0x4   :  { %19 = vsyncpa [#allocation4], 0 }
   0x5   :  { %20 = vsyncpa [#allocation15], 0  ;;  %s6414_s30 = smov [#allocation5]   ;;  %s6415_s11 = smov [#allocation8]  }
   0x6   :  { %s38_s10 = sshll.u32 %s6414_s30, 4  ;;  %s62_s12 = sshll.u32 %s6415_s11, 4  ;;  %s39_s10 = int_to_ptr.vmem [resolvable:$true] %s38_s10  ;;  %s63_s12 = int_to_ptr.vmem [resolvable:$true] %s62_s12 }
   0x7   :  { %s6230_s13 = scalar_lea.vmem %s39_s10, 256  ;;  %p6235_p1 = scmp.lt.s32.totalorder %s39_s10, %s39_s10 }
   0x8   :  { %p6231_p0 = scmp.ne.s32.totalorder %s39_s10, %s6230_s13  ;;  %p6236_p2 = scmp.lt.s32.totalorder %s6230_s13, %s6230_s13 }
   0xa   :  { %p6237_p3 = por %p6236_p2, %p6235_p1 }
   0xc   :  { %p6238_p4 = pnand %p6237_p3, %p6231_p0 }
   0xe   :  { %6241 = shalt.err (!%p6238_p4)
}
   0xf   :  { %s6416_s14 = smov 128   ;;  %s6417_s15 = smov 8  }
  0x10   :  { %44 = dma.hbm_to_vmem [thread:$0]  %s8209_s1, 256, %s39_s10, [#allocation6], %s6416_s14, %s6416_s14, %s6417_s15  }
  0x11   :  { %s6250_s18 = scalar_lea.vmem %s63_s12, 512  ;;  %p6255_p6 = scmp.lt.s32.totalorder %s63_s12, %s63_s12 }
  0x12   :  { %p6251_p5 = scmp.ne.s32.totalorder %s63_s12, %s6250_s18  ;;  %p6256_p7 = scmp.lt.s32.totalorder %s6250_s18, %s6250_s18 }
  0x14   :  { %p6257_p8 = por %p6256_p7, %p6255_p6 }
  0x16   :  { %p6258_p9 = pnand %p6257_p8, %p6251_p5 }
  0x18   :  { %6261 = shalt.err (!%p6258_p9)
}
  0x19   :  { %68 = dma.hbm_to_vmem [thread:$0]  %s8211_s3, 512, %s63_s12, [#allocation9], %s6416_s14, %s6416_s14, %s6417_s15  }
  0x1a   :  { %s6418_s21 = smov [#allocation2]   ;;  %s6419_s23 = smov [#allocation7]  }
  0x1b   :  { %s26_s22 = sshll.u32 %s6418_s21, 4  ;;  %s50_s24 = sshll.u32 %s6419_s23, 4  ;;  %s27_s22 = int_to_ptr.vmem [resolvable:$true] %s26_s22  ;;  %s51_s24 = int_to_ptr.vmem [resolvable:$true] %s50_s24 }
  0x1c   :  { %s6270_s1 = scalar_lea.vmem %s27_s22, 1024  ;;  %p6275_p11 = scmp.lt.s32.totalorder %s27_s22, %s27_s22 }
  0x1d   :  { %p6271_p10 = scmp.ne.s32.totalorder %s27_s22, %s6270_s1  ;;  %p6276_p12 = scmp.lt.s32.totalorder %s6270_s1, %s6270_s1 }
  0x1f   :  { %p6277_p13 = por %p6276_p12, %p6275_p11 }
  0x21   :  { %p6278_p0 = pnand %p6277_p13, %p6271_p10 }
  0x23   :  { %6281 = shalt.err (!%p6278_p0)
}
  0x24   :  { %32 = dma.hbm_to_vmem [thread:$0]  %s8208_s0, 1024, %s27_s22, [#allocation3], %s6416_s14, %s6416_s14, %s6417_s15  }
  0x25   :  { %s6290_s3 = scalar_lea.vmem %s51_s24, 256  ;;  %p6295_p2 = scmp.lt.s32.totalorder %s51_s24, %s51_s24 }
  0x26   :  { %p6291_p1 = scmp.ne.s32.totalorder %s51_s24, %s6290_s3  ;;  %p6296_p3 = scmp.lt.s32.totalorder %s6290_s3, %s6290_s3 }
  0x28   :  { %p6297_p4 = por %p6296_p3, %p6295_p2 }
  0x2a   :  { %p6298_p5 = pnand %p6297_p4, %p6291_p1 }
  0x2c   :  { %6301 = shalt.err (!%p6298_p5)
}
  0x2d   :  { %56 = dma.hbm_to_vmem [thread:$0]  %s8210_s2, 256, %s51_s24, [#allocation6], %s6416_s14, %s6416_s14, %s6417_s15  }
  0x2e   :  { %s6420_s29 = smov [#allocation10]   ;;  %s6421_s10 = smov [#allocation11]  }
  0x2f   :  { %s74_s30 = sshll.u32 %s6420_s29, 4  ;;  %s86_s11 = sshll.u32 %s6421_s10, 4  ;;  %s75_s30 = int_to_ptr.vmem [resolvable:$true] %s74_s30  ;;  %s87_s11 = int_to_ptr.vmem [resolvable:$true] %s86_s11 }
  0x30   :  { %s6310_s0 = scalar_lea.vmem %s75_s30, 512  ;;  %p6315_p7 = scmp.lt.s32.totalorder %s75_s30, %s75_s30 }
  0x31   :  { %p6311_p6 = scmp.ne.s32.totalorder %s75_s30, %s6310_s0  ;;  %p6316_p8 = scmp.lt.s32.totalorder %s6310_s0, %s6310_s0 }
  0x33   :  { %p6317_p9 = por %p6316_p8, %p6315_p7 }
  0x35   :  { %p6318_p10 = pnand %p6317_p9, %p6311_p6 }
  0x37   :  { %6321 = shalt.err (!%p6318_p10)
}
  0x38   :  { %80 = dma.hbm_to_vmem [thread:$0]  %s8212_s4, 512, %s75_s30, [#allocation9], %s6416_s14, %s6416_s14, %s6417_s15  }
  0x39   :  { %s6330_s2 = scalar_lea.vmem %s87_s11, 512  ;;  %p6335_p12 = scmp.lt.s32.totalorder %s87_s11, %s87_s11 }
  0x3a   :  { %p6331_p11 = scmp.ne.s32.totalorder %s87_s11, %s6330_s2  ;;  %p6336_p13 = scmp.lt.s32.totalorder %s6330_s2, %s6330_s2 }
  0x3c   :  { %p6337_p0 = por %p6336_p13, %p6335_p12 }
  0x3e   :  { %p6338_p1 = pnand %p6337_p0, %p6331_p11 }
  0x40   :  { %6341 = shalt.err (!%p6338_p1)
}
  0x41   :  { %92 = dma.hbm_to_vmem [thread:$0]  %s8213_s5, 512, %s87_s11, [#allocation12], %s6416_s14, %s6416_s14, %s6417_s15  }
  0x42   :  { %6402 = dma.done.wait [#allocation3], 1024  }
  0x43   :  { %6403 = vsyncadd [#allocation3], 4294966272 }
  0x44   :  { %6404 = dma.done.wait [#allocation6], 512  }
  0x45   :  { %6405 = vsyncadd [#allocation6], 4294966784 }
  0x46   :  { %6406 = dma.done.wait [#allocation9], 1024  }
  0x47   :  { %6407 = vsyncadd [#allocation9], 4294966272 }
  0x48   :  { %6408 = dma.done.wait [#allocation12], 512  }
  0x49   :  { %6409 = vsyncadd [#allocation12], 4294966784  ;;  %v6422_v0 = vmov 0.0   ;;  %vm6423_vm0 = vmmov 0   ;;  %vm119_vm1 = vcmask 261120   ;;  %v6523_v1 = vld [vmem:[#allocation8 + $0x18] sm:$0xff] }
  0x4a   :  { %5327 = vmatprep.subr.mxu0 %v6422_v0  ;;  %5335 = vmatprep.mubr.msk.f32.mxu0 %vm6423_vm0, %v6422_v0  ;;  %v6525_v2 = vld [vmem:[#allocation8 + $0x10] sm:$0xff]  ;;  %v117_v3 = vld [vmem:[#allocation5] sm:$0xff]  ;;  %v6529_v4 = vld [vmem:[#allocation8 + $0x8] sm:$0xff]  ;;  %s6424_s4 = smov 64   ;;  %s6425_s5 = smov 32   ;;  %vm490_vm2 = vcmask 1041409  }
  0x4b   :  { %5338 = vmatprep.subr.mxu1 %v6422_v0  ;;  %5346 = vmatprep.mubr.msk.f32.mxu1 %vm6423_vm0, %v6422_v0  ;;  %120 = vst.msk [vmem:[#allocation14] sm:$0xff] %vm119_vm1, %v117_v3  ;;  %v6534_v5 = vld [vmem:[#allocation8] sm:$0xff]  ;;  %v122_v7 = vld [vmem:[#allocation7] sm:$0xff]  ;;  %v154_v10 = vld [vmem:[#allocation2 + $0x18] sm:$0x1]  ;;  %vm493_vm3 = vcmask 1042434  }
  0x4c   :  { %5328 = vmatpush3.msra.mxu0 %v6523_v1  ;;  %124 = vst.msk [vmem:[#allocation16] sm:$0xff] %vm119_vm1, %v122_v7  ;;  %v151_v8 = vld [vmem:[#allocation2] sm:$0x1]  ;;  %v156_v16 = vld [vmem:[#allocation2 + $0x28] sm:$0x1]  ;;  %vm496_vm4 = vcmask 1043459  }
  0x4d   :  { %5329 = vmatprep.subr.mxu0 %v6422_v0  ;;  %v158_v18 = vld [vmem:[#allocation2 + $0x38] sm:$0x1]  ;;  %v152_v21 = vld [vmem:[#allocation2 + $0x8] sm:$0x1]  ;;  %v153_v25 = vld [vmem:[#allocation2 + $0x10] sm:$0x1] }
  0x4e   :  { %5330 = vmatpush3.msra.mxu0 %v6525_v2  ;;  %v155_v29 = vld [vmem:[#allocation2 + $0x20] sm:$0x1]  ;;  %v157_v33 = vld [vmem:[#allocation2 + $0x30] sm:$0x1]  ;;  %vm499_vm5 = vcmask 1044484   ;;  %vm502_vm6 = vcmask 1045509  }
  0x4f   :  { %5331 = vmatprep.subr.mxu0 %v6422_v0  ;;  %vm505_vm7 = vcmask 1046534   ;;  %vm508_vm8 = vcmask 1047559   ;;  %vm792_vm9 = vcmask 253952   ;;  %s6428_s24 = smov [#allocation14]  }
  0x50   :  { %5332 = vmatpush3.msra.mxu0 %v6529_v4  ;;  %s5076_s1 = sshll.u32 %s6428_s24, 4  ;;  %s5077_s1 = int_to_ptr.vmem [resolvable:$true] %s5076_s1 }
  0x51   :  { %5333 = vmatprep.subr.mxu0 %v6422_v0  ;;  %s6342_s25 = scalar_lea.vmem %s5077_s1, 256  ;;  %p6347_p3 = scmp.lt.s32.totalorder %s5077_s1, %s5077_s1 }
  0x52   :  { %5334 = vmatpush3.msra.mxu0 %v6534_v5  ;;  %v145_v6 = vld [vmem:[#allocation14] sm:$0xff]  ;;  %p6343_p2 = scmp.ne.s32.totalorder %s5077_s1, %s6342_s25  ;;  %p6348_p4 = scmp.lt.s32.totalorder %s6342_s25, %s6342_s25 }
  0x53   :  { %5349 = vmatprep.subr.mxu0 %v6422_v0  ;;  %5336 = vmatmul.mubr.msk.f32.vlgmr.msra.gmra.mxu0 %vm119_vm1, %v145_v6  ;;  %v146_v36 = vld [vmem:[#allocation16] sm:$0xff] }
  0x54   :  { %5357 = vmatprep.mubr.msk.f32.mxu0 %vm6423_vm0, %v6422_v0  ;;  %v315_v39 = vrot.slane %v146_v36, 2  ;;  %v316_v41 = vrot.slane %v146_v36, 3  ;;  %v317_v43 = vrot.slane %v146_v36, 4  ;;  %v314_v45 = vrot.slane %v146_v36, 1  ;;  %p6349_p5 = por %p6348_p4, %p6347_p3 }
  0x55   :  { %v318_v46 = vrot.slane %v146_v36, 5  ;;  %v319_v47 = vrot.slane %v146_v36, 6  ;;  %v320_v48 = vrot.slane %v146_v36, 7 }
  0x56   :  { %p6350_p6 = pnand %p6349_p5, %p6343_p2 }
 0x113   :  { %v229_v9 = vpop.f32.mrf.mxu0 }
 0x114   :  { %v236_v11 = vrot.slane %v229_v9, 3  ;;  %v249_v13 = vadd.f32 %v229_v9, %v151_v8  ;;  %v238_v15 = vrot.slane %v229_v9, 5  ;;  %v240_v17 = vrot.slane %v229_v9, 7 }
 0x115   :  { %v5337_v12 = vpop.f32.mrf.mxu0  ;;  %v234_v20 = vrot.slane %v229_v9, 1  ;;  %v235_v23 = vrot.slane %v229_v9, 2  ;;  %v237_v27 = vrot.slane %v229_v9, 4  ;;  %v239_v31 = vrot.slane %v229_v9, 6 }
 0x116   :  { %v252_v14 = vadd.f32 %v236_v11, %v154_v10  ;;  %5608 = vtanh.f32 %v249_v13  ;;  %v6544_v19 = vadd.f32 %v238_v15, %v156_v16  ;;  %v6546_v22 = vadd.f32 %v240_v17, %v158_v18 }
 0x117   :  { %v250_v24 = vadd.f32 %v234_v20, %v152_v21  ;;  %v251_v28 = vadd.f32 %v235_v23, %v153_v25  ;;  %v253_v32 = vadd.f32 %v237_v27, %v155_v29  ;;  %v255_v34 = vadd.f32 %v239_v31, %v157_v33 }
 0x118   :  { %5610 = vtanh.f32 %v252_v14  ;;  %v5112_v49 = vmul.f32 -1.442695, %v249_v13  ;;  %v5115_v50 = vmul.f32 -1.442695, %v252_v14  ;;  %v5117_v58 = vmul.f32 -1.442695, %v6544_v19 }
 0x119   :  { %5612 = vtanh.f32 %v6544_v19  ;;  %v5113_v51 = vmul.f32 -1.442695, %v250_v24  ;;  %v5114_v53 = vmul.f32 -1.442695, %v251_v28  ;;  %v5116_v56 = vmul.f32 -1.442695, %v253_v32 }
 0x11a   :  { %5614 = vtanh.f32 %v6546_v22  ;;  %v5118_v59 = vmul.f32 -1.442695, %v255_v34  ;;  %v5119_v60 = vmul.f32 -1.442695, %v6546_v22 }
 0x11b   :  { %5616 = vtanh.f32 %v250_v24 }
 0x11c   :  { %5618 = vtanh.f32 %v251_v28 }
 0x11d   :  { %5620 = vtanh.f32 %v253_v32 }
 0x11e   :  { %5622 = vtanh.f32 %v255_v34 }
 0x11f   :  { %5624 = vpow2.f32 %v5112_v49 }
 0x120   :  { %5626 = vpow2.f32 %v5115_v50 }
 0x121   :  { %5628 = vpow2.f32 %v5113_v51 }
 0x122   :  { %5630 = vpow2.f32 %v5114_v53 }
 0x123   :  { %v5609_v26 = vpop.eup %5608 }
 0x124   :  { %361 = vrot.lane.b32.xlu1 %v5609_v26, %s6424_s4 }
 0x125   :  { %v5611_v30 = vpop.eup %5610 }
 0x126   :  { %v5613_v35 = vpop.eup %5612 }
 0x127   :  { %v5615_v37 = vpop.eup %5614 }
 0x128   :  { %367 = vrot.lane.b32.xlu1 %v5611_v30, %s6424_s4  ;;  %v5617_v38 = vpop.eup %5616 }
 0x129   :  { %363 = vrot.lane.b32.xlu0 %v5617_v38, %s6424_s4  ;;  %v5619_v40 = vpop.eup %5618 }
 0x12a   :  { %v5621_v42 = vpop.eup %5620 }
 0x12b   :  { %v5623_v44 = vpop.eup %5622 }
 0x12c   :  { %371 = vrot.lane.b32.xlu1 %v5613_v35, %s6424_s4  ;;  %v5625_v52 = vpop.eup %5624 }
 0x12d   :  { %365 = vrot.lane.b32.xlu0 %v5619_v40, %s6424_s4  ;;  %v281_v54 = vadd.f32 1.0, %v5625_v52  ;;  %v5627_v55 = vpop.eup %5626 }
 0x12e   :  { %v284_v57 = vadd.f32 1.0, %v5627_v55  ;;  %v5629_v61 = vpop.eup %5628 }
 0x12f   :  { %5632 = vrcp.f32 %v281_v54  ;;  %v282_v62 = vadd.f32 1.0, %v5629_v61  ;;  %v5631_v63 = vpop.eup %5630 }
 0x130   :  { %375 = vrot.lane.b32.xlu1 %v5615_v37, %s6424_s4  ;;  %5634 = vpow2.f32 %v5116_v56  ;;  %v283_v7 = vadd.f32 1.0, %v5631_v63 }
 0x131   :  { %369 = vrot.lane.b32.xlu0 %v5621_v42, %s6424_s4  ;;  %5636 = vrcp.f32 %v284_v57 }
 0x132   :  { %5638 = vpow2.f32 %v5117_v58 }
 0x133   :  { %5640 = vpow2.f32 %v5118_v59 }
 0x134   :  { %325 = vrot.lane.b32.xlu1 %v315_v39, %s6425_s5  ;;  %5642 = vpow2.f32 %v5119_v60 }
 0x135   :  { %373 = vrot.lane.b32.xlu0 %v5623_v44, %s6424_s4  ;;  %5644 = vrcp.f32 %v282_v62 }
 0x136   :  { %5646 = vrcp.f32 %v283_v7 }
 0x138   :  { %327 = vrot.lane.b32.xlu1 %v316_v41, %s6425_s5 }
 0x139   :  { %323 = vrot.lane.b32.xlu0 %v314_v45, %s6425_s5 }
 0x13c   :  { %329 = vrot.lane.b32.xlu1 %v317_v43, %s6425_s5  ;;  %v6568_v3 = vpop.eup %5632 }
 0x13d   :  { %321 = vrot.lane.b32.xlu0 %v146_v36, %s6425_s5  ;;  %v5635_v9 = vpop.eup %5634 }
 0x13e   :  { %v6572_v10 = vpop.eup %5636  ;;  %v285_v13 = vadd.f32 1.0, %v5635_v9 }
 0x13f   :  { %v5639_v12 = vpop.eup %5638 }
 0x140   :  { %331 = vrot.lane.b32.xlu1 %v318_v46, %s6425_s5  ;;  %v5641_v15 = vpop.eup %5640  ;;  %v286_v16 = vadd.f32 1.0, %v5639_v12  ;;  %5648 = vrcp.f32 %v285_v13 }
 0x141   :  { %333 = vrot.lane.b32.xlu0 %v319_v47, %s6425_s5  ;;  %v287_v17 = vadd.f32 1.0, %v5641_v15  ;;  %v5643_v18 = vpop.eup %5642 }
 0x142   :  { %5650 = vrcp.f32 %v286_v16  ;;  %v288_v19 = vadd.f32 1.0, %v5643_v18  ;;  %v6576_v20 = vpop.eup %5644  ;;  %v6637_v18 = vld [vmem:[#allocation11 + $0x18] sm:$0xff] }
 0x143   :  { %5652 = vrcp.f32 %v287_v17  ;;  %v6580_v23 = vpop.eup %5646  ;;  %5339 = vmatpush3.msra.mxu1 %v6637_v18 }
 0x144   :  { %5654 = vrcp.f32 %v288_v19  ;;  %v6639_v19 = vld [vmem:[#allocation10 + $0x18] sm:$0xff]  ;;  %5340 = vmatprep.subr.mxu1 %v6422_v0 }
 0x145   :  { %335 = vrot.lane.b32.xlu0 %v320_v48, %s6425_s5  ;;  %5350 = vmatpush3.msra.mxu0 %v6639_v19 }
 0x146   :  { %5351 = vmatprep.subr.mxu0 %v6422_v0 }
 0x14d   :  { %v6584_v26 = vpop.eup %5648 }
 0x14f   :  { %v6587_v30 = vpop.eup %5650 }
 0x150   :  { %v6590_v31 = vpop.eup %5652 }
 0x151   :  { %v6596_v36 = vpop.eup %5654 }
 0x196   :  { %v362_v6 = vpop.permute.xlu1 %361 }
 0x197   :  { %v385_v8 = vmul.f32 %v6568_v3, %v362_v6 }
 0x199   :  { %401 = vrot.lane.b32.xlu0 %v385_v8, %s6425_s5 }
 0x19a   :  { %v368_v11 = vpop.permute.xlu1 %367 }
 0x19b   :  { %v388_v14 = vmul.f32 %v6572_v10, %v368_v11  ;;  %v364_v21 = vpop.permute.xlu0 %363 }
 0x19c   :  { %v386_v22 = vmul.f32 %v6576_v20, %v364_v21  ;;  %v6641_v21 = vld [vmem:[#allocation11 + $0x10] sm:$0xff] }
 0x19d   :  { %407 = vrot.lane.b32.xlu1 %v388_v14, %s6425_s5  ;;  %5341 = vmatpush3.msra.mxu1 %v6641_v21 }
 0x19e   :  { %403 = vrot.lane.b32.xlu0 %v386_v22, %s6425_s5  ;;  %v372_v27 = vpop.permute.xlu1 %371  ;;  %v6645_v22 = vld [vmem:[#allocation10 + $0x10] sm:$0xff]  ;;  %5342 = vmatprep.subr.mxu1 %v6422_v0 }
 0x19f   :  { %v366_v24 = vpop.permute.xlu0 %365  ;;  %v390_v33 = vmul.f32 %v6587_v30, %v372_v27  ;;  %5352 = vmatpush3.msra.mxu0 %v6645_v22 }
 0x1a0   :  { %v387_v25 = vmul.f32 %v6580_v23, %v366_v24  ;;  %v6649_v24 = vld [vmem:[#allocation11 + $0x8] sm:$0xff]  ;;  %5353 = vmatprep.subr.mxu0 %v6422_v0 }
 0x1a1   :  { %5343 = vmatpush3.msra.mxu1 %v6649_v24 }
 0x1a2   :  { %405 = vrot.lane.b32.xlu0 %v387_v25, %s6425_s5  ;;  %v376_v35 = vpop.permute.xlu1 %375  ;;  %5344 = vmatprep.subr.mxu1 %v6422_v0 }
 0x1a3   :  { %v370_v28 = vpop.permute.xlu0 %369  ;;  %v392_v37 = vmul.f32 %v6596_v36, %v376_v35 }
 0x1a4   :  { %v389_v29 = vmul.f32 %v6584_v26, %v370_v28  ;;  %v6655_v28 = vld [vmem:[#allocation10 + $0x8] sm:$0xff] }
 0x1a5   :  { %5354 = vmatpush3.msra.mxu0 %v6655_v28 }
 0x1a6   :  { %409 = vrot.lane.b32.xlu1 %v389_v29, %s6425_s5  ;;  %v326_v41 = vpop.permute.xlu1 %325  ;;  %v6657_v29 = vld [vmem:[#allocation11] sm:$0xff]  ;;  %5355 = vmatprep.subr.mxu0 %v6422_v0 }
 0x1a7   :  { %v374_v32 = vpop.permute.xlu0 %373  ;;  %v347_v53 = vmul.f32 %v6580_v23, %v326_v41  ;;  %5345 = vmatpush3.msra.mxu1 %v6657_v29 }
 0x1a8   :  { %v391_v34 = vmul.f32 %v6590_v31, %v374_v32  ;;  %v6663_v32 = vld [vmem:[#allocation10] sm:$0xff]  ;;  %5360 = vmatprep.subr.mxu1 %v6422_v0 }
 0x1a9   :  { %5356 = vmatpush3.msra.mxu0 %v6663_v32 }
 0x1aa   :  { %411 = vrot.lane.b32.xlu1 %v390_v33, %s6425_s5  ;;  %413 = vrot.lane.b32.xlu0 %v391_v34, %s6425_s5  ;;  %v328_v45 = vpop.permute.xlu1 %327 }
 0x1ab   :  { %v324_v38 = vpop.permute.xlu0 %323  ;;  %v348_v55 = vmul.f32 %v6572_v10, %v328_v45  ;;  %5371 = vmatprep.subr.mxu0 %v6422_v0 }
 0x1ac   :  { %v346_v48 = vmul.f32 %v6576_v20, %v324_v38  ;;  %v118_v38 = vld [vmem:[#allocation5 + $0x8] sm:$0xff] }
 0x1ad   :  { %121 = vst.msk [vmem:[#allocation14 + $0x8] sm:$0xff] %vm119_vm1, %v118_v38  ;;  %v804_v38 = vld [vmem:[#allocation2 + $0x19] sm:$0x1] }
 0x1ae   :  { %415 = vrot.lane.b32.xlu1 %v392_v37, %s6425_s5  ;;  %v330_v47 = vpop.permute.xlu1 %329 }
 0x1af   :  { %v322_v39 = vpop.permute.xlu0 %321  ;;  %v349_v59 = vmul.f32 %v6584_v26, %v330_v47 }
 0x1b0   :  { %v345_v43 = vmul.f32 %v6568_v3, %v322_v39 }
 0x1b2   :  { %v332_v49 = vpop.permute.xlu1 %331 }
 0x1b3   :  { %v334_v40 = vpop.permute.xlu0 %333  ;;  %v350_v63 = vmul.f32 %v6587_v30, %v332_v49 }
 0x1b4   :  { %v351_v62 = vmul.f32 %v6590_v31, %v334_v40 }
 0x1b7   :  { %v336_v42 = vpop.permute.xlu0 %335 }
 0x1b8   :  { %v352_v11 = vmul.f32 %v6596_v36, %v336_v42 }
 0x20b   :  { %v402_v44 = vpop.permute.xlu0 %401 }
 0x20c   :  { %v6601_v46 = vadd.f32 %v402_v44, %v345_v43 }
 0x20e   :  { %5656 = vtanh.f32 %v6601_v46 }
 0x20f   :  { %v408_v54 = vpop.permute.xlu1 %407 }
 0x210   :  { %v404_v50 = vpop.permute.xlu0 %403  ;;  %v6613_v58 = vadd.f32 %v408_v54, %v348_v55 }
 0x211   :  { %v6605_v51 = vadd.f32 %v404_v50, %v346_v48  ;;  %v148_v50 = vld [vmem:[#allocation14 + $0x8] sm:$0xff] }
 0x212   :  { %5358 = vmatmul.mubr.msk.f32.vlgmr.msra.gmra.mxu0 %vm119_vm1, %v148_v50 }
 0x213   :  { %5658 = vtanh.f32 %v6605_v51  ;;  %5372 = vmatpush3.msra.mxu0 %v6637_v18  ;;  %5379 = vmatprep.mubr.msk.f32.mxu0 %vm6423_vm0, %v6422_v0 }
 0x214   :  { %v406_v56 = vpop.permute.xlu0 %405  ;;  %5373 = vmatprep.subr.mxu0 %v6422_v0 }
 0x215   :  { %v6611_v57 = vadd.f32 %v406_v56, %v347_v53  ;;  %5374 = vmatpush3.msra.mxu0 %v6641_v21 }
 0x216   :  { %5375 = vmatprep.subr.mxu0 %v6422_v0 }
 0x217   :  { %5660 = vtanh.f32 %v6611_v57  ;;  %5376 = vmatpush3.msra.mxu0 %v6649_v24 }
 0x218   :  { %v410_v60 = vpop.permute.xlu1 %409  ;;  %5662 = vtanh.f32 %v6613_v58  ;;  %5377 = vmatprep.subr.mxu0 %v6422_v0 }
 0x219   :  { %v6617_v61 = vadd.f32 %v410_v60, %v349_v59  ;;  %5378 = vmatpush3.msra.mxu0 %v6657_v29 }
 0x21a   :  { %5393 = vmatprep.subr.mxu0 %v6422_v0 }
 0x21b   :  { %v5657_v52 = vpop.eup %5656  ;;  %5664 = vtanh.f32 %v6617_v61 }
 0x21c   :  { %449 = vrot.lane.b32.xlu0 %v5657_v52, %s6424_s4  ;;  %v412_v6 = vpop.permute.xlu1 %411  ;;  %v414_v7 = vpop.permute.xlu0 %413 }
 0x21d   :  { %v6623_v8 = vadd.f32 %v412_v6, %v350_v63  ;;  %v6625_v9 = vadd.f32 %v414_v7, %v351_v62  ;;  %v801_v7 = vld [vmem:[#allocation2 + $0x1] sm:$0x1] }
 0x21f   :  { %5666 = vtanh.f32 %v6623_v8 }
 0x220   :  { %v5659_v12 = vpop.eup %5658  ;;  %5668 = vtanh.f32 %v6625_v9  ;;  %v416_v13 = vpop.permute.xlu1 %415 }
 0x221   :  { %v6630_v14 = vadd.f32 %v416_v13, %v352_v11  ;;  %451 = vrot.lane.b32.xlu0 %v5659_v12, %s6424_s4 }
 0x223   :  { %5670 = vtanh.f32 %v6630_v14 }
 0x224   :  { %v5661_v15 = vpop.eup %5660 }
 0x225   :  { %453 = vrot.lane.b32.xlu1 %v5661_v15, %s6424_s4  ;;  %v5663_v16 = vpop.eup %5662 }
 0x228   :  { %v5665_v17 = vpop.eup %5664 }
 0x229   :  { %457 = vrot.lane.b32.xlu0 %v5665_v17, %s6424_s4  ;;  %455 = vrot.lane.b32.xlu1 %v5663_v16, %s6424_s4  ;;  %v802_v16 = vld [vmem:[#allocation2 + $0x9] sm:$0x1] }
 0x22c   :  { %v5667_v25 = vpop.eup %5666 }
 0x22d   :  { %v5669_v27 = vpop.eup %5668  ;;  %459 = vrot.lane.b32.xlu1 %v5667_v25, %s6424_s4  ;;  %v803_v25 = vld [vmem:[#allocation2 + $0x11] sm:$0x1] }
 0x22e   :  { %461 = vrot.lane.b32.xlu0 %v5669_v27, %s6424_s4 }
 0x230   :  { %v5671_v33 = vpop.eup %5670 }
 0x231   :  { %463 = vrot.lane.b32.xlu1 %v5671_v33, %s6424_s4 }
 0x28e   :  { %v450_v34 = vpop.permute.xlu0 %449 }
 0x28f   :  { %v473_v45 = vmul.f32 %v6568_v3, %v450_v34  ;;  %v805_v34 = vld [vmem:[#allocation2 + $0x21] sm:$0x1] }
 0x293   :  { %v452_v35 = vpop.permute.xlu0 %451 }
 0x294   :  { %v474_v37 = vmul.f32 %v6576_v20, %v452_v35 }
 0x296   :  { %v489_v41 = vrot.slane %v474_v37, 7 }
 0x297   :  { %v454_v39 = vpop.permute.xlu1 %453 }
 0x298   :  { %v475_v40 = vmul.f32 %v6580_v23, %v454_v39  ;;  %v491_v20 = vsel %vm490_vm2, %v489_v41, %v473_v45  ;;  %v807_v41 = vld [vmem:[#allocation2 + $0x31] sm:$0x1] }
 0x29a   :  { %v492_v42 = vrot.slane %v475_v40, 6 }
 0x29b   :  { %v458_v43 = vpop.permute.xlu0 %457  ;;  %v456_v44 = vpop.permute.xlu1 %455 }
 0x29c   :  { %v476_v47 = vmul.f32 %v6572_v10, %v456_v44  ;;  %v477_v48 = vmul.f32 %v6584_v26, %v458_v43  ;;  %v494_v52 = vsel %vm493_vm3, %v492_v42, %v491_v20  ;;  %v806_v44 = vld [vmem:[#allocation2 + $0x29] sm:$0x1] }
 0x29e   :  { %v495_v49 = vrot.slane %v476_v47, 5  ;;  %v498_v10 = vrot.slane %v477_v48, 4 }
 0x29f   :  { %v460_v23 = vpop.permute.xlu1 %459 }
 0x2a0   :  { %v497_v53 = vsel %vm496_vm4, %v495_v49, %v494_v52  ;;  %v462_v54 = vpop.permute.xlu0 %461  ;;  %v478_v3 = vmul.f32 %v6587_v30, %v460_v23  ;;  %v808_v49 = vld [vmem:[#allocation2 + $0x39] sm:$0x1] }
 0x2a1   :  { %v479_v26 = vmul.f32 %v6590_v31, %v462_v54  ;;  %v500_v59 = vsel %vm499_vm5, %v498_v10, %v497_v53 }
 0x2a2   :  { %v501_v55 = vrot.slane %v478_v3, 3 }
 0x2a3   :  { %v464_v56 = vpop.permute.xlu1 %463  ;;  %v504_v62 = vrot.slane %v479_v26, 2 }
 0x2a4   :  { %v480_v30 = vmul.f32 %v6596_v36, %v464_v56  ;;  %v503_v60 = vsel %vm502_vm6, %v501_v55, %v500_v59 }
 0x2a5   :  { %v506_v63 = vsel %vm505_vm7, %v504_v62, %v503_v60 }
 0x2a6   :  { %v507_v31 = vrot.slane %v480_v30, 1 }
 0x2a8   :  { %v509_v6 = vsel %vm508_vm8, %v507_v31, %v506_v63 }
 0x2a9   :  { %510 = vrot.lane.b32.xlu0 %v509_v6, %s6425_s5 }
 0x31b   :  { %v511_v36 = vpop.permute.xlu0 %510 }
 0x31c   :  { %5347 = vmatmul.mubr.msk.f32.vlgmr.msra.gmra.mxu1 %vm119_vm1, %v511_v36 }
 0x31d   :  { %5361 = vmatpush3.msra.mxu1 %v6523_v1  ;;  %5368 = vmatprep.mubr.msk.f32.mxu1 %vm6423_vm0, %v6422_v0  ;;  %v6722_v1 = vpop.f32.mrf.mxu0 }
 0x31e   :  { %5362 = vmatprep.subr.mxu1 %v6422_v0 }
 0x31f   :  { %5363 = vmatpush3.msra.mxu1 %v6525_v2  ;;  %v5359_v2 = vpop.f32.mrf.mxu0 }
 0x320   :  { %5364 = vmatprep.subr.mxu1 %v6422_v0 }
 0x321   :  { %5365 = vmatpush3.msra.mxu1 %v6529_v4 }
 0x322   :  { %5366 = vmatprep.subr.mxu1 %v6422_v0 }
 0x323   :  { %5367 = vmatpush3.msra.mxu1 %v6534_v5 }
 0x324   :  { %5369 = vmatmul.mubr.msk.f32.vlgmr.msra.gmra.mxu1 %vm119_vm1, %v511_v36  ;;  %5382 = vmatprep.subr.mxu1 %v6422_v0 }
 0x325   :  { %5383 = vmatpush3.msra.mxu1 %v6639_v19  ;;  %5390 = vmatprep.mubr.msk.f32.mxu1 %vm6423_vm0, %v6422_v0 }
 0x326   :  { %5384 = vmatprep.subr.mxu1 %v6422_v0 }
 0x327   :  { %5385 = vmatpush3.msra.mxu1 %v6645_v22 }
 0x328   :  { %5386 = vmatprep.subr.mxu1 %v6422_v0 }
 0x329   :  { %5387 = vmatpush3.msra.mxu1 %v6655_v28 }
 0x32a   :  { %5388 = vmatprep.subr.mxu1 %v6422_v0 }
 0x32b   :  { %5389 = vmatpush3.msra.mxu1 %v6663_v32 }
 0x32c   :  { %5404 = vmatprep.subr.mxu1 %v6422_v0 }
 0x3dc   :  { %v6724_v4 = vpop.f32.mrf.mxu1 }
 0x3de   :  { %v5348_v5 = vpop.f32.mrf.mxu1 }
 0x3e4   :  { %v875_v11 = vpop.f32.mrf.mxu1 }
 0x3e5   :  { %v895_v12 = vadd.f32 %v875_v11, %v801_v7  ;;  %v880_v15 = vrot.slane %v875_v11, 1  ;;  %v881_v17 = vrot.slane %v875_v11, 2  ;;  %v883_v27 = vrot.slane %v875_v11, 4 }
 0x3e6   :  { %v5370_v13 = vpop.f32.mrf.mxu1  ;;  %v882_v35 = vrot.slane %v875_v11, 3  ;;  %v885_v39 = vrot.slane %v875_v11, 6  ;;  %v884_v42 = vrot.slane %v875_v11, 5  ;;  %v886_v48 = vrot.slane %v875_v11, 7 }
 0x3e7   :  { %5672 = vtanh.f32 %v895_v12  ;;  %v896_v33 = vadd.f32 %v880_v15, %v802_v16  ;;  %v897_v37 = vadd.f32 %v881_v17, %v803_v25  ;;  %v899_v40 = vadd.f32 %v883_v27, %v805_v34 }
 0x3e8   :  { %v898_v43 = vadd.f32 %v882_v35, %v804_v38  ;;  %v901_v47 = vadd.f32 %v885_v39, %v807_v41  ;;  %v900_v20 = vadd.f32 %v884_v42, %v806_v44  ;;  %v902_v50 = vadd.f32 %v886_v48, %v808_v49  ;;  %v6742_v38 = vld [vmem:[%s8214_s6] ss:$0 sm:$0xff] }
 0x3e9   :  { %5674 = vtanh.f32 %v896_v33  ;;  %v5124_v55 = vmul.f32 -1.442695, %v895_v12  ;;  %v5125_v56 = vmul.f32 -1.442695, %v896_v33  ;;  %v5126_v59 = vmul.f32 -1.442695, %v897_v37 }
 0x3ea   :  { %5676 = vtanh.f32 %v897_v37  ;;  %v5128_v30 = vmul.f32 -1.442695, %v899_v40  ;;  %v5127_v60 = vmul.f32 -1.442695, %v898_v43  ;;  %v5130_v31 = vmul.f32 -1.442695, %v901_v47 }
 0x3eb   :  { %5678 = vtanh.f32 %v899_v40  ;;  %v5129_v63 = vmul.f32 -1.442695, %v900_v20  ;;  %v5131_v36 = vmul.f32 -1.442695, %v902_v50  ;;  %v654_v35 = vadd.f32 %v6722_v1, %v6724_v4 }
 0x3ec   :  { %5680 = vtanh.f32 %v898_v43 }
 0x3ed   :  { %5682 = vtanh.f32 %v901_v47  ;;  %v657_v41 = vadd.f32 %v6742_v38, %v654_v35 }
 0x3ee   :  { %5684 = vtanh.f32 %v900_v20 }
 0x3ef   :  { %5686 = vtanh.f32 %v902_v50 }
 0x3f0   :  { %5688 = vpow2.f32 %v5124_v55 }
 0x3f1   :  { %5690 = vpow2.f32 %v5125_v56 }
 0x3f2   :  { %5692 = vpow2.f32 %v5126_v59 }
 0x3f3   :  { %5694 = vpow2.f32 %v5128_v30 }
 0x3f4   :  { %v5673_v45 = vpop.eup %5672  ;;  %5696 = vpow2.f32 %v5127_v60 }
 0x3f5   :  { %975 = vrot.lane.b32.xlu1 %v5673_v45, %s6424_s4  ;;  %5698 = vpow2.f32 %v5130_v31 }
 0x3f6   :  { %v5675_v52 = vpop.eup %5674  ;;  %5700 = vpow2.f32 %v5129_v63 }
 0x3f7   :  { %v5677_v23 = vpop.eup %5676 }
 0x3f8   :  { %979 = vrot.lane.b32.xlu0 %v5677_v23, %s6424_s4  ;;  %v5679_v53 = vpop.eup %5678 }
 0x3f9   :  { %977 = vrot.lane.b32.xlu1 %v5675_v52, %s6424_s4  ;;  %v5681_v54 = vpop.eup %5680 }
 0x3fa   :  { %v5683_v3 = vpop.eup %5682 }
 0x3fb   :  { %v5685_v10 = vpop.eup %5684 }
 0x3fc   :  { %981 = vrot.lane.b32.xlu0 %v5681_v54, %s6424_s4  ;;  %v5687_v26 = vpop.eup %5686 }
 0x3fd   :  { %983 = vrot.lane.b32.xlu1 %v5679_v53, %s6424_s4  ;;  %v5689_v62 = vpop.eup %5688 }
 0x3fe   :  { %v927_v6 = vadd.f32 1.0, %v5689_v62  ;;  %v5691_v2 = vpop.eup %5690  ;;  %v123_v62 = vld [vmem:[#allocation7 + $0x8] sm:$0xff] }
 0x3ff   :  { %v5693_v5 = vpop.eup %5692  ;;  %v928_v7 = vadd.f32 1.0, %v5691_v2  ;;  %125 = vst.msk [vmem:[#allocation16 + $0x8] sm:$0xff] %vm119_vm1, %v123_v62 }
 0x400   :  { %985 = vrot.lane.b32.xlu0 %v5685_v10, %s6424_s4  ;;  %5702 = vrcp.f32 %v927_v6  ;;  %v5695_v11 = vpop.eup %5694  ;;  %v929_v12 = vadd.f32 1.0, %v5693_v5 }
 0x401   :  { %987 = vrot.lane.b32.xlu1 %v5683_v3, %s6424_s4  ;;  %5704 = vpow2.f32 %v5131_v36  ;;  %v5697_v13 = vpop.eup %5696  ;;  %v931_v15 = vadd.f32 1.0, %v5695_v11  ;;  %v5122_v36 = vmul.f32 -1.442695, %v657_v41 }
 0x402   :  { %5706 = vrcp.f32 %v928_v7  ;;  %v5699_v16 = vpop.eup %5698  ;;  %v930_v17 = vadd.f32 1.0, %v5697_v13 }
 0x403   :  { %5708 = vrcp.f32 %v929_v12  ;;  %v5701_v25 = vpop.eup %5700  ;;  %v933_v33 = vadd.f32 1.0, %v5699_v16 }
 0x404   :  { %989 = vrot.lane.b32.xlu0 %v5687_v26, %s6424_s4  ;;  %5710 = vrcp.f32 %v931_v15  ;;  %v932_v39 = vadd.f32 1.0, %v5701_v25 }
 0x405   :  { %5712 = vrcp.f32 %v930_v17 }
 0x406   :  { %5714 = vrcp.f32 %v933_v33 }
 0x407   :  { %5716 = vrcp.f32 %v932_v39 }
 0x408   :  { %5718 = vtanh.f32 %v657_v41 }
 0x40d   :  { %v6734_v27 = vpop.eup %5702 }
 0x40e   :  { %v5705_v40 = vpop.eup %5704  ;;  %v959_v31 = vmul.f32 %v6734_v27, %v6601_v46 }
 0x40f   :  { %v934_v42 = vadd.f32 1.0, %v5705_v40  ;;  %v6746_v43 = vpop.eup %5706 }
 0x410   :  { %v6749_v44 = vpop.eup %5708  ;;  %v960_v2 = vmul.f32 %v6746_v43, %v6605_v51 }
 0x411   :  { %5720 = vrcp.f32 %v934_v42  ;;  %v6753_v48 = vpop.eup %5710  ;;  %v961_v7 = vmul.f32 %v6749_v44, %v6611_v57 }
 0x412   :  { %v6757_v50 = vpop.eup %5712  ;;  %v963_v46 = vmul.f32 %v6753_v48, %v6617_v61 }
 0x413   :  { %v6761_v53 = vpop.eup %5714  ;;  %v962_v51 = vmul.f32 %v6757_v50, %v6613_v58 }
 0x414   :  { %v6765_v10 = vpop.eup %5716  ;;  %v965_v33 = vmul.f32 %v6761_v53, %v6625_v9 }
 0x415   :  { %v5719_v56 = vpop.eup %5718  ;;  %v964_v61 = vmul.f32 %v6765_v10, %v6623_v8 }
 0x41e   :  { %v6770_v59 = vpop.eup %5720 }
 0x41f   :  { %v966_v9 = vmul.f32 %v6770_v59, %v6630_v14 }
 0x467   :  { %v976_v34 = vpop.permute.xlu1 %975 }
 0x468   :  { %v999_v37 = vmul.f32 %v6734_v27, %v976_v34 }
 0x46a   :  { %1015 = vrot.lane.b32.xlu1 %v999_v37, %s6425_s5  ;;  %v980_v45 = vpop.permute.xlu0 %979 }
 0x46b   :  { %v978_v1 = vpop.permute.xlu1 %977  ;;  %v1001_v47 = vmul.f32 %v6749_v44, %v980_v45 }
 0x46c   :  { %v1000_v4 = vmul.f32 %v6746_v43, %v978_v1 }
 0x46d   :  { %1019 = vrot.lane.b32.xlu0 %v1001_v47, %s6425_s5 }
 0x46e   :  { %1017 = vrot.lane.b32.xlu1 %v1000_v4, %s6425_s5  ;;  %v982_v52 = vpop.permute.xlu0 %981 }
 0x46f   :  { %v984_v20 = vpop.permute.xlu1 %983  ;;  %v1002_v23 = vmul.f32 %v6757_v50, %v982_v52 }
 0x470   :  { %v1003_v49 = vmul.f32 %v6753_v48, %v984_v20  ;;  %v150_v20 = vld [vmem:[#allocation16 + $0x8] sm:$0xff] }
 0x471   :  { %1021 = vrot.lane.b32.xlu0 %v1002_v23, %s6425_s5 }
 0x472   :  { %1023 = vrot.lane.b32.xlu1 %v1003_v49, %s6425_s5  ;;  %v986_v26 = vpop.permute.xlu0 %985 }
 0x473   :  { %v988_v54 = vpop.permute.xlu1 %987  ;;  %v1004_v55 = vmul.f32 %v6765_v10, %v986_v26 }
 0x474   :  { %v1005_v3 = vmul.f32 %v6761_v53, %v988_v54 }
 0x475   :  { %1025 = vrot.lane.b32.xlu0 %v1004_v55, %s6425_s5 }
 0x476   :  { %1027 = vrot.lane.b32.xlu1 %v1005_v3, %s6425_s5  ;;  %v990_v30 = vpop.permute.xlu0 %989 }
 0x477   :  { %v1006_v60 = vmul.f32 %v6770_v59, %v990_v30 }
 0x479   :  { %1029 = vrot.lane.b32.xlu0 %v1006_v60, %s6425_s5 }
 0x47a   :  { %671 = vrot.lane.b32.xlu1 %v5719_v56, %s6424_s4 }
 0x4dc   :  { %v1016_v63 = vpop.permute.xlu1 %1015 }
 0x4dd   :  { %v6778_v6 = vadd.f32 %v1016_v63, %v959_v31 }
 0x4df   :  { %5722 = vtanh.f32 %v6778_v6  ;;  %v1020_v12 = vpop.permute.xlu0 %1019 }
 0x4e0   :  { %5724 = vpow2.f32 %v5122_v36  ;;  %v1018_v5 = vpop.permute.xlu1 %1017  ;;  %v6787_v13 = vadd.f32 %v1020_v12, %v961_v7 }
 0x4e1   :  { %v6785_v11 = vadd.f32 %v1018_v5, %v960_v2 }
 0x4e3   :  { %5726 = vtanh.f32 %v6785_v11  ;;  %v1022_v17 = vpop.permute.xlu0 %1021 }
 0x4e4   :  { %v1024_v15 = vpop.permute.xlu1 %1023  ;;  %5728 = vtanh.f32 %v6787_v13  ;;  %v6797_v25 = vadd.f32 %v1022_v17, %v962_v51 }
 0x4e5   :  { %v6795_v16 = vadd.f32 %v1024_v15, %v963_v46 }
 0x4e7   :  { %5730 = vtanh.f32 %v6795_v16  ;;  %v1026_v35 = vpop.permute.xlu0 %1025 }
 0x4e8   :  { %v1028_v34 = vpop.permute.xlu1 %1027  ;;  %5732 = vtanh.f32 %v6797_v25  ;;  %v6808_v37 = vadd.f32 %v1026_v35, %v964_v61 }
 0x4e9   :  { %v6806_v58 = vadd.f32 %v1028_v34, %v965_v33 }
 0x4eb   :  { %5734 = vtanh.f32 %v6806_v58  ;;  %v1030_v40 = vpop.permute.xlu0 %1029 }
 0x4ec   :  { %v5723_v57 = vpop.eup %5722  ;;  %5736 = vtanh.f32 %v6808_v37  ;;  %v6814_v42 = vadd.f32 %v1030_v40, %v966_v9  ;;  %v672_v52 = vpop.permute.xlu1 %671 }
 0x4ed   :  { %1063 = vrot.lane.b32.xlu0 %v5723_v57, %s6424_s4  ;;  %v5725_v39 = vpop.eup %5724 }
 0x4ee   :  { %v661_v41 = vadd.f32 1.0, %v5725_v39  ;;  %5738 = vtanh.f32 %v6814_v42 }
 0x4f0   :  { %v5727_v1 = vpop.eup %5726  ;;  %5740 = vrcp.f32 %v661_v41 }
 0x4f1   :  { %1065 = vrot.lane.b32.xlu0 %v5727_v1, %s6424_s4  ;;  %v5729_v8 = vpop.eup %5728 }
 0x4f2   :  { %1067 = vrot.lane.b32.xlu1 %v5729_v8, %s6424_s4  ;;  %v6851_v8 = vld [vmem:[#allocation8 + $0x18] sm:$0xff] }
 0x4f4   :  { %v5731_v4 = vpop.eup %5730 }
 0x4f5   :  { %1071 = vrot.lane.b32.xlu0 %v5731_v4, %s6424_s4  ;;  %v5733_v45 = vpop.eup %5732  ;;  %v6857_v4 = vld [vmem:[#allocation8 + $0x10] sm:$0xff] }
 0x4f6   :  { %1069 = vrot.lane.b32.xlu1 %v5733_v45, %s6424_s4  ;;  %v6861_v45 = vld [vmem:[#allocation8 + $0x8] sm:$0xff] }
 0x4f8   :  { %v5735_v14 = vpop.eup %5734 }
 0x4f9   :  { %1075 = vrot.lane.b32.xlu0 %v5735_v14, %s6424_s4  ;;  %v5737_v47 = vpop.eup %5736  ;;  %v6865_v14 = vld [vmem:[#allocation8] sm:$0xff] }
 0x4fa   :  { %1073 = vrot.lane.b32.xlu1 %v5737_v47, %s6424_s4 }
 0x4fb   :  { %v5739_v49 = vpop.eup %5738 }
 0x4fd   :  { %666 = vrot.lane.b32.xlu0 %v150_v20, %s6425_s5  ;;  %v6825_v23 = vpop.eup %5740 }
 0x4fe   :  { %1077 = vrot.lane.b32.xlu1 %v5739_v49, %s6424_s4  ;;  %v674_v54 = vmul.f32 %v6825_v23, %v672_v52 }
 0x502   :  { %676 = vrot.lane.b32.xlu1 %v674_v54, %s6425_s5 }
 0x55f   :  { %v1064_v3 = vpop.permute.xlu0 %1063 }
 0x560   :  { %v1087_v30 = vmul.f32 %v6734_v27, %v1064_v3  ;;  %v1406_v3 = vld [vmem:[#allocation2 + $0x12] sm:$0x1] }
 0x563   :  { %v1066_v26 = vpop.permute.xlu0 %1065 }
 0x564   :  { %v1088_v55 = vmul.f32 %v6746_v43, %v1066_v26  ;;  %v1068_v56 = vpop.permute.xlu1 %1067 }
 0x565   :  { %v1089_v60 = vmul.f32 %v6749_v44, %v1068_v56 }
 0x566   :  { %v1103_v62 = vrot.slane %v1088_v55, 7  ;;  %v1408_v55 = vld [vmem:[#allocation2 + $0x22] sm:$0x1] }
 0x567   :  { %v1072_v31 = vpop.permute.xlu0 %1071  ;;  %v1105_v2 = vrot.slane %v1089_v60, 6 }
 0x568   :  { %v1104_v63 = vsel %vm490_vm2, %v1103_v62, %v1087_v30  ;;  %v1091_v36 = vmul.f32 %v6753_v48, %v1072_v31  ;;  %v1070_v5 = vpop.permute.xlu1 %1069  ;;  %v1410_v31 = vld [vmem:[#allocation2 + $0x32] sm:$0x1] }
 0x569   :  { %v1090_v7 = vmul.f32 %v6757_v50, %v1070_v5  ;;  %v1106_v12 = vsel %vm493_vm3, %v1105_v2, %v1104_v63  ;;  %v1409_v2 = vld [vmem:[#allocation2 + $0x2a] sm:$0x1] }
 0x56a   :  { %v1109_v46 = vrot.slane %v1091_v36, 4 }
 0x56b   :  { %v1076_v15 = vpop.permute.xlu0 %1075  ;;  %v1107_v43 = vrot.slane %v1090_v7, 5 }
 0x56c   :  { %v1093_v51 = vmul.f32 %v6761_v53, %v1076_v15  ;;  %v1074_v27 = vpop.permute.xlu1 %1073  ;;  %v1411_v15 = vld [vmem:[#allocation2 + $0x3a] sm:$0x1] }
 0x56d   :  { %v1108_v44 = vsel %vm496_vm4, %v1107_v43, %v1106_v12  ;;  %v1092_v17 = vmul.f32 %v6765_v10, %v1074_v27 }
 0x56e   :  { %v1110_v57 = vsel %vm499_vm5, %v1109_v46, %v1108_v44  ;;  %v1113_v33 = vrot.slane %v1093_v51, 2 }
 0x56f   :  { %v667_v48 = vpop.permute.xlu0 %666  ;;  %v1111_v34 = vrot.slane %v1092_v17, 3 }
 0x570   :  { %v1078_v61 = vpop.permute.xlu1 %1077  ;;  %v669_v35 = vmul.f32 %v6825_v23, %v667_v48 }
 0x571   :  { %v1094_v50 = vmul.f32 %v6770_v59, %v1078_v61  ;;  %v1112_v39 = vsel %vm502_vm6, %v1111_v34, %v1110_v57 }
 0x572   :  { %v1114_v9 = vsel %vm505_vm7, %v1113_v33, %v1112_v39 }
 0x573   :  { %v1115_v53 = vrot.slane %v1094_v50, 1 }
 0x574   :  { %v677_v40 = vpop.permute.xlu1 %676 }
 0x575   :  { %v6844_v41 = vadd.f32 %v677_v40, %v669_v35  ;;  %v1116_v10 = vsel %vm508_vm8, %v1115_v53, %v1114_v9 }
 0x576   :  { %1117 = vrot.lane.b32.xlu0 %v1116_v10, %s6425_s5 }
 0x577   :  { %5742 = vtanh.f32 %v6844_v41 }
 0x584   :  { %v5743_v1 = vpop.eup %5742 }
 0x585   :  { %682 = vrot.lane.b32.xlu1 %v5743_v1, %s6424_s4 }
 0x5e8   :  { %v1118_v59 = vpop.permute.xlu0 %1117 }
 0x5e9   :  { %5380 = vmatmul.mubr.msk.f32.vlgmr.msra.gmra.mxu0 %vm119_vm1, %v1118_v59 }
 0x5ea   :  { %5394 = vmatpush3.msra.mxu0 %v6851_v8  ;;  %5401 = vmatprep.mubr.msk.f32.mxu0 %vm6423_vm0, %v6422_v0 }
 0x5eb   :  { %5395 = vmatprep.subr.mxu0 %v6422_v0 }
 0x5ec   :  { %5396 = vmatpush3.msra.mxu0 %v6857_v4 }
 0x5ed   :  { %5397 = vmatprep.subr.mxu0 %v6422_v0 }
 0x5ee   :  { %5398 = vmatpush3.msra.mxu0 %v6861_v45 }
 0x5ef   :  { %5399 = vmatprep.subr.mxu0 %v6422_v0 }
 0x5f0   :  { %5400 = vmatpush3.msra.mxu0 %v6865_v14 }
 0x5f1   :  { %5402 = vmatmul.mubr.msk.f32.vlgmr.msra.gmra.mxu0 %vm119_vm1, %v1118_v59  ;;  %5415 = vmatprep.subr.mxu0 %v6422_v0 }
 0x5f2   :  { %5416 = vmatpush3.msra.mxu0 %v6639_v19  ;;  %5423 = vmatprep.mubr.msk.f32.mxu0 %vm6423_vm0, %v6422_v0 }
 0x5f3   :  { %5417 = vmatprep.subr.mxu0 %v6422_v0 }
 0x5f4   :  { %5418 = vmatpush3.msra.mxu0 %v6645_v22 }
 0x5f5   :  { %5419 = vmatprep.subr.mxu0 %v6422_v0 }
 0x5f6   :  { %5420 = vmatpush3.msra.mxu0 %v6655_v28  ;;  %v1404_v28 = vld [vmem:[#allocation2 + $0x2] sm:$0x1] }
 0x5f7   :  { %v683_v47 = vpop.permute.xlu1 %682  ;;  %5421 = vmatprep.subr.mxu0 %v6422_v0 }
 0x5f8   :  { %v6879_v20 = vmul.f32 %v6825_v23, %v683_v47  ;;  %5422 = vmatpush3.msra.mxu0 %v6663_v32 }
 0x5f9   :  { %5437 = vmatprep.subr.mxu0 %v6422_v0 }
 0x5fa   :  { %1191 = vrot.lane.b32.xlu0 %v6879_v20, %s6425_s5 }
 0x66c   :  { %v1192_v19 = vpop.permute.xlu0 %1191 }
 0x66d   :  { %5391 = vmatmul.mubr.msk.f32.vlgmr.msra.gmra.mxu1 %vm119_vm1, %v1192_v19 }
 0x66e   :  { %5405 = vmatpush3.msra.mxu1 %v6637_v18  ;;  %5412 = vmatprep.mubr.msk.f32.mxu1 %vm6423_vm0, %v6422_v0 }
 0x66f   :  { %5406 = vmatprep.subr.mxu1 %v6422_v0 }
 0x670   :  { %5407 = vmatpush3.msra.mxu1 %v6641_v21  ;;  %v1405_v21 = vld [vmem:[#allocation2 + $0xa] sm:$0x1] }
 0x671   :  { %5408 = vmatprep.subr.mxu1 %v6422_v0 }
 0x672   :  { %5409 = vmatpush3.msra.mxu1 %v6649_v24 }
 0x673   :  { %5410 = vmatprep.subr.mxu1 %v6422_v0 }
 0x674   :  { %5411 = vmatpush3.msra.mxu1 %v6657_v29  ;;  %v1407_v29 = vld [vmem:[#allocation2 + $0x1a] sm:$0x1] }
 0x675   :  { %5426 = vmatprep.subr.mxu1 %v6422_v0 }
 0x6a9   :  { %v6896_v22 = vpop.f32.mrf.mxu0 }
 0x6ab   :  { %v5381_v18 = vpop.f32.mrf.mxu0 }
 0x6b1   :  { %v1478_v32 = vpop.f32.mrf.mxu0 }
 0x6b2   :  { %v1498_v49 = vadd.f32 %v1478_v32, %v1404_v28  ;;  %v1483_v23 = vrot.slane %v1478_v32, 1  ;;  %v1484_v54 = vrot.slane %v1478_v32, 2  ;;  %v1486_v26 = vrot.slane %v1478_v32, 4 }
 0x6b3   :  { %v5403_v52 = vpop.f32.mrf.mxu0  ;;  %v1485_v56 = vrot.slane %v1478_v32, 3  ;;  %v1488_v60 = vrot.slane %v1478_v32, 6  ;;  %v1487_v63 = vrot.slane %v1478_v32, 5  ;;  %v1489_v12 = vrot.slane %v1478_v32, 7 }
 0x6b4   :  { %5744 = vtanh.f32 %v1498_v49  ;;  %v1499_v24 = vadd.f32 %v1483_v23, %v1405_v21  ;;  %v1500_v30 = vadd.f32 %v1484_v54, %v1406_v3  ;;  %v1502_v62 = vadd.f32 %v1486_v26, %v1408_v55 }
 0x6b5   :  { %v1501_v36 = vadd.f32 %v1485_v56, %v1407_v29  ;;  %v1504_v7 = vadd.f32 %v1488_v60, %v1410_v31  ;;  %v1503_v46 = vadd.f32 %v1487_v63, %v1409_v2  ;;  %v1505_v43 = vadd.f32 %v1489_v12, %v1411_v15 }
 0x6b6   :  { %5746 = vtanh.f32 %v1499_v24  ;;  %v5136_v34 = vmul.f32 -1.442695, %v1498_v49  ;;  %v5137_v61 = vmul.f32 -1.442695, %v1499_v24  ;;  %v5138_v50 = vmul.f32 -1.442695, %v1500_v30 }
 0x6b7   :  { %5748 = vtanh.f32 %v1500_v30  ;;  %v5140_v35 = vmul.f32 -1.442695, %v1502_v62  ;;  %v5139_v39 = vmul.f32 -1.442695, %v1501_v36  ;;  %v5142_v53 = vmul.f32 -1.442695, %v1504_v7 }
 0x6b8   :  { %5750 = vtanh.f32 %v1502_v62  ;;  %v5141_v40 = vmul.f32 -1.442695, %v1503_v46  ;;  %v5143_v1 = vmul.f32 -1.442695, %v1505_v43 }
 0x6b9   :  { %5752 = vtanh.f32 %v1501_v36 }
 0x6ba   :  { %5754 = vtanh.f32 %v1504_v7 }
 0x6bb   :  { %5756 = vtanh.f32 %v1503_v46 }
 0x6bc   :  { %5758 = vtanh.f32 %v1505_v43 }
 0x6bd   :  { %5760 = vpow2.f32 %v5136_v34 }
 0x6be   :  { %5762 = vpow2.f32 %v5137_v61 }
 0x6bf   :  { %5764 = vpow2.f32 %v5138_v50 }
 0x6c0   :  { %5766 = vpow2.f32 %v5140_v35 }
 0x6c1   :  { %v5745_v5 = vpop.eup %5744  ;;  %5768 = vpow2.f32 %v5139_v39 }
 0x6c2   :  { %1578 = vrot.lane.b32.xlu1 %v5745_v5, %s6424_s4  ;;  %5770 = vpow2.f32 %v5142_v53 }
 0x6c3   :  { %v5747_v51 = vpop.eup %5746  ;;  %5772 = vpow2.f32 %v5141_v40 }
 0x6c4   :  { %v5749_v27 = vpop.eup %5748 }
 0x6c5   :  { %1582 = vrot.lane.b32.xlu0 %v5749_v27, %s6424_s4  ;;  %v5751_v44 = vpop.eup %5750 }
 0x6c6   :  { %1580 = vrot.lane.b32.xlu1 %v5747_v51, %s6424_s4  ;;  %v5753_v17 = vpop.eup %5752 }
 0x6c7   :  { %v5755_v57 = vpop.eup %5754 }
 0x6c8   :  { %v5757_v33 = vpop.eup %5756 }
 0x6c9   :  { %1584 = vrot.lane.b32.xlu0 %v5753_v17, %s6424_s4  ;;  %v5759_v48 = vpop.eup %5758 }
 0x6ca   :  { %1586 = vrot.lane.b32.xlu1 %v5751_v44, %s6424_s4  ;;  %v5761_v9 = vpop.eup %5760 }
 0x6cb   :  { %v1530_v10 = vadd.f32 1.0, %v5761_v9  ;;  %v5763_v59 = vpop.eup %5762 }
 0x6cc   :  { %v5765_v47 = vpop.eup %5764  ;;  %v1531_v18 = vadd.f32 1.0, %v5763_v59 }
 0x6cd   :  { %1588 = vrot.lane.b32.xlu0 %v5757_v33, %s6424_s4  ;;  %5774 = vrcp.f32 %v1530_v10  ;;  %v5767_v28 = vpop.eup %5766  ;;  %v1532_v32 = vadd.f32 1.0, %v5765_v47 }
 0x6ce   :  { %1590 = vrot.lane.b32.xlu1 %v5755_v57, %s6424_s4  ;;  %5776 = vpow2.f32 %v5143_v1  ;;  %v5769_v52 = vpop.eup %5768  ;;  %v1534_v23 = vadd.f32 1.0, %v5767_v28 }
 0x6cf   :  { %5778 = vrcp.f32 %v1531_v18  ;;  %v5771_v21 = vpop.eup %5770  ;;  %v1533_v54 = vadd.f32 1.0, %v5769_v52 }
 0x6d0   :  { %5780 = vrcp.f32 %v1532_v32  ;;  %v5773_v3 = vpop.eup %5772  ;;  %v1536_v24 = vadd.f32 1.0, %v5771_v21 }
 0x6d1   :  { %1592 = vrot.lane.b32.xlu0 %v5759_v48, %s6424_s4  ;;  %5782 = vrcp.f32 %v1534_v23  ;;  %v1535_v56 = vadd.f32 1.0, %v5773_v3 }
 0x6d2   :  { %5784 = vrcp.f32 %v1533_v54 }
 0x6d3   :  { %5786 = vrcp.f32 %v1536_v24 }
 0x6d4   :  { %5788 = vrcp.f32 %v1535_v56 }
 0x6da   :  { %v6906_v26 = vpop.eup %5774 }
 0x6db   :  { %v5777_v29 = vpop.eup %5776  ;;  %v1562_v9 = vmul.f32 %v6906_v26, %v6778_v6 }
 0x6dc   :  { %v1537_v62 = vadd.f32 1.0, %v5777_v29  ;;  %v6912_v63 = vpop.eup %5778 }
 0x6dd   :  { %v6914_v2 = vpop.eup %5780  ;;  %v1563_v10 = vmul.f32 %v6912_v63, %v6785_v11 }
 0x6de   :  { %5790 = vrcp.f32 %v1537_v62  ;;  %v1564_v1 = vmul.f32 %v6914_v2, %v6787_v13 }
 0x72d   :  { %v1261_v19 = vpop.f32.mrf.mxu1 }
 0x72e   :  { %v1262_v60 = vadd.f32 %v1261_v19, %v6896_v22  ;;  %v6919_v22 = vpop.eup %5782 }
 0x72f   :  { %v5392_v49 = vpop.f32.mrf.mxu1  ;;  %v1566_v6 = vmul.f32 %v6919_v22, %v6795_v16 }
 0x730   :  { %v1265_v31 = vadd.f32 %v6742_v38, %v1262_v60  ;;  %v6922_v38 = vpop.eup %5784 }
 0x731   :  { %v6927_v27 = vpop.eup %5786  ;;  %v1565_v28 = vmul.f32 %v6922_v38, %v6797_v25 }
 0x732   :  { %5792 = vtanh.f32 %v1265_v31  ;;  %v6930_v17 = vpop.eup %5788  ;;  %v5134_v39 = vmul.f32 -1.442695, %v1265_v31  ;;  %v1568_v21 = vmul.f32 %v6927_v27, %v6806_v58 }
 0x733   :  { %v6936_v34 = vpop.eup %5790  ;;  %v1567_v16 = vmul.f32 %v6930_v17, %v6808_v37 }
 0x734   :  { %v1579_v55 = vpop.permute.xlu1 %1578  ;;  %5794 = vpow2.f32 %v5134_v39  ;;  %v1569_v58 = vmul.f32 %v6936_v34, %v6814_v42 }
 0x735   :  { %v1602_v30 = vmul.f32 %v6906_v26, %v1579_v55 }
 0x737   :  { %1618 = vrot.lane.b32.xlu1 %v1602_v30, %s6425_s5  ;;  %v1583_v5 = vpop.permute.xlu0 %1582 }
 0x738   :  { %v1581_v36 = vpop.permute.xlu1 %1580  ;;  %v1604_v12 = vmul.f32 %v6914_v2, %v1583_v5 }
 0x739   :  { %v1603_v7 = vmul.f32 %v6912_v63, %v1581_v36 }
 0x73a   :  { %1622 = vrot.lane.b32.xlu0 %v1604_v12, %s6425_s5 }
 0x73b   :  { %1620 = vrot.lane.b32.xlu1 %v1603_v7, %s6425_s5  ;;  %v1585_v15 = vpop.permute.xlu0 %1584 }
 0x73c   :  { %v1587_v46 = vpop.permute.xlu1 %1586  ;;  %v1605_v51 = vmul.f32 %v6922_v38, %v1585_v15 }
 0x73d   :  { %v1606_v43 = vmul.f32 %v6919_v22, %v1587_v46 }
 0x73e   :  { %1624 = vrot.lane.b32.xlu0 %v1605_v51, %s6425_s5 }
 0x73f   :  { %1626 = vrot.lane.b32.xlu1 %v1606_v43, %s6425_s5  ;;  %v1589_v57 = vpop.permute.xlu0 %1588  ;;  %v5793_v50 = vpop.eup %5792 }
 0x740   :  { %v1591_v44 = vpop.permute.xlu1 %1590  ;;  %v1607_v48 = vmul.f32 %v6930_v17, %v1589_v57 }
 0x741   :  { %v1608_v33 = vmul.f32 %v6927_v27, %v1591_v44  ;;  %v5795_v13 = vpop.eup %5794 }
 0x742   :  { %1628 = vrot.lane.b32.xlu0 %v1607_v48, %s6425_s5  ;;  %v1269_v25 = vadd.f32 1.0, %v5795_v13 }
 0x743   :  { %1630 = vrot.lane.b32.xlu1 %v1608_v33, %s6425_s5  ;;  %v1593_v61 = vpop.permute.xlu0 %1592 }
 0x744   :  { %v1609_v35 = vmul.f32 %v6936_v34, %v1593_v61 }
 0x746   :  { %1632 = vrot.lane.b32.xlu0 %v1609_v35, %s6425_s5 }
 0x747   :  { %1275 = vrot.lane.b32.xlu1 %v5793_v50, %s6424_s4 }
 0x7a9   :  { %v1619_v53 = vpop.permute.xlu1 %1618 }
 0x7aa   :  { %v6943_v40 = vadd.f32 %v1619_v53, %v1562_v9 }
 0x7ac   :  { %5796 = vtanh.f32 %v6943_v40  ;;  %v1623_v47 = vpop.permute.xlu0 %1622 }
 0x7ad   :  { %v1621_v59 = vpop.permute.xlu1 %1620  ;;  %v6952_v18 = vadd.f32 %v1623_v47, %v1564_v1 }
 0x7ae   :  { %v6950_v19 = vadd.f32 %v1621_v59, %v1563_v10 }
 0x7b0   :  { %5798 = vtanh.f32 %v6950_v19  ;;  %v1625_v32 = vpop.permute.xlu0 %1624 }
 0x7b1   :  { %5800 = vtanh.f32 %v6952_v18  ;;  %v1627_v11 = vpop.permute.xlu1 %1626  ;;  %v6962_v52 = vadd.f32 %v1625_v32, %v1565_v28 }
 0x7b2   :  { %v6960_v49 = vadd.f32 %v1627_v11, %v1566_v6 }
 0x7b4   :  { %5802 = vtanh.f32 %v6960_v49  ;;  %v1629_v3 = vpop.permute.xlu0 %1628 }
 0x7b5   :  { %5804 = vtanh.f32 %v6962_v52  ;;  %v1631_v54 = vpop.permute.xlu1 %1630  ;;  %v6973_v55 = vadd.f32 %v1629_v3, %v1567_v16 }
 0x7b6   :  { %v6971_v24 = vadd.f32 %v1631_v54, %v1568_v21 }
 0x7b8   :  { %5806 = vtanh.f32 %v6971_v24  ;;  %v1633_v56 = vpop.permute.xlu0 %1632 }
 0x7b9   :  { %v5797_v23 = vpop.eup %5796  ;;  %5808 = vtanh.f32 %v6973_v55  ;;  %v6979_v30 = vadd.f32 %v1633_v56, %v1569_v58  ;;  %v1276_v42 = vpop.permute.xlu1 %1275  ;;  %v7046_v58 = vld [vmem:[#allocation11 + $0x18] sm:$0xff]  ;;  %v7052_v56 = vld [vmem:[#allocation11 + $0x10] sm:$0xff] }
 0x7ba   :  { %1666 = vrot.lane.b32.xlu0 %v5797_v23, %s6424_s4  ;;  %5810 = vrcp.f32 %v1269_v25  ;;  %v7041_v25 = vld [vmem:[#allocation10] sm:$0xff] }
 0x7bb   :  { %5812 = vtanh.f32 %v6979_v30 }
 0x7bd   :  { %v5799_v37 = vpop.eup %5798 }
 0x7be   :  { %v5801_v29 = vpop.eup %5800  ;;  %1668 = vrot.lane.b32.xlu0 %v5799_v37, %s6424_s4  ;;  %v7056_v37 = vld [vmem:[#allocation11 + $0x8] sm:$0xff] }
 0x7bf   :  { %1670 = vrot.lane.b32.xlu1 %v5801_v29, %s6424_s4  ;;  %v7060_v29 = vld [vmem:[#allocation11] sm:$0xff] }
 0x7c1   :  { %v5803_v60 = vpop.eup %5802 }
 0x7c2   :  { %v5805_v62 = vpop.eup %5804  ;;  %1674 = vrot.lane.b32.xlu0 %v5803_v60, %s6424_s4 }
 0x7c3   :  { %1672 = vrot.lane.b32.xlu1 %v5805_v62, %s6424_s4 }
 0x7c5   :  { %v5807_v31 = vpop.eup %5806 }
 0x7c6   :  { %v5809_v36 = vpop.eup %5808  ;;  %1678 = vrot.lane.b32.xlu0 %v5807_v31, %s6424_s4  ;;  %v2007_v31 = vld [vmem:[#allocation2 + $0x3] sm:$0x1] }
 0x7c7   :  { %v5811_v5 = vpop.eup %5810  ;;  %1676 = vrot.lane.b32.xlu1 %v5809_v36, %s6424_s4 }
 0x7c8   :  { %v1278_v7 = vmul.f32 %v5811_v5, %v1276_v42  ;;  %v5813_v12 = vpop.eup %5812  ;;  %v1273_v11 = vmul.f32 %v5811_v5, %v6844_v41 }
 0x7ca   :  { %1280 = vrot.lane.b32.xlu0 %v1278_v7, %s6425_s5 }
 0x7cb   :  { %1680 = vrot.lane.b32.xlu1 %v5813_v12, %s6424_s4  ;;  %v2008_v12 = vld [vmem:[#allocation2 + $0xb] sm:$0x1] }
 0x82c   :  { %v1667_v46 = vpop.permute.xlu0 %1666 }
 0x82d   :  { %v1690_v57 = vmul.f32 %v6906_v26, %v1667_v46 }
 0x830   :  { %v1669_v15 = vpop.permute.xlu0 %1668 }
 0x831   :  { %v1671_v43 = vpop.permute.xlu1 %1670  ;;  %v1691_v51 = vmul.f32 %v6912_v63, %v1669_v15  ;;  %v2009_v15 = vld [vmem:[#allocation2 + $0x13] sm:$0x1] }
 0x832   :  { %v1692_v44 = vmul.f32 %v6914_v2, %v1671_v43 }
 0x833   :  { %v1706_v33 = vrot.slane %v1691_v51, 7 }
 0x834   :  { %v1675_v48 = vpop.permute.xlu0 %1674  ;;  %v1708_v61 = vrot.slane %v1692_v44, 6  ;;  %v2011_v44 = vld [vmem:[#allocation2 + $0x23] sm:$0x1] }
 0x835   :  { %v1707_v50 = vsel %vm490_vm2, %v1706_v33, %v1690_v57  ;;  %v1673_v35 = vpop.permute.xlu1 %1672  ;;  %v1694_v39 = vmul.f32 %v6919_v22, %v1675_v48  ;;  %v2010_v48 = vld [vmem:[#allocation2 + $0x1b] sm:$0x1] }
 0x836   :  { %v1693_v9 = vmul.f32 %v6922_v38, %v1673_v35  ;;  %v1709_v53 = vsel %vm493_vm3, %v1708_v61, %v1707_v50  ;;  %v2013_v35 = vld [vmem:[#allocation2 + $0x33] sm:$0x1] }
 0x837   :  { %v1712_v10 = vrot.slane %v1694_v39, 4 }
 0x838   :  { %v1710_v1 = vrot.slane %v1693_v9, 5  ;;  %v1679_v59 = vpop.permute.xlu0 %1678 }
 0x839   :  { %v1677_v63 = vpop.permute.xlu1 %1676  ;;  %v1696_v2 = vmul.f32 %v6927_v27, %v1679_v59 }
 0x83a   :  { %v1711_v26 = vsel %vm496_vm4, %v1710_v1, %v1709_v53  ;;  %v1695_v47 = vmul.f32 %v6930_v17, %v1677_v63  ;;  %v2012_v53 = vld [vmem:[#allocation2 + $0x2b] sm:$0x1] }
 0x83b   :  { %v1713_v6 = vsel %vm499_vm5, %v1712_v10, %v1711_v26  ;;  %v1716_v28 = vrot.slane %v1696_v2, 2  ;;  %v2014_v2 = vld [vmem:[#allocation2 + $0x3b] sm:$0x1] }
 0x83c   :  { %v1714_v22 = vrot.slane %v1695_v47, 3  ;;  %v1281_v32 = vpop.permute.xlu0 %1280 }
 0x83d   :  { %v1681_v38 = vpop.permute.xlu1 %1680  ;;  %v7002_v13 = vadd.f32 %v1281_v32, %v1273_v11 }
 0x83e   :  { %v1697_v23 = vmul.f32 %v6936_v34, %v1681_v38  ;;  %v1715_v21 = vsel %vm502_vm6, %v1714_v22, %v1713_v6  ;;  %v7023_v34 = vld [vmem:[#allocation10 + $0x18] sm:$0xff] }
 0x83f   :  { %5814 = vtanh.f32 %v7002_v13  ;;  %v1717_v27 = vsel %vm505_vm7, %v1716_v28, %v1715_v21 }
 0x840   :  { %v1718_v16 = vrot.slane %v1697_v23, 1 }
 0x842   :  { %v1719_v17 = vsel %vm508_vm8, %v1718_v16, %v1717_v27 }
 0x843   :  { %1720 = vrot.lane.b32.xlu1 %v1719_v17, %s6425_s5 }
 0x84c   :  { %v5815_v54 = vpop.eup %5814 }
 0x84d   :  { %1286 = vrot.lane.b32.xlu0 %v5815_v54, %s6424_s4 }
 0x8b5   :  { %v1721_v41 = vpop.permute.xlu1 %1720 }
 0x8b6   :  { %5413 = vmatmul.mubr.msk.f32.vlgmr.msra.gmra.mxu1 %vm119_vm1, %v1721_v41 }
 0x8b7   :  { %5427 = vmatpush3.msra.mxu1 %v6851_v8  ;;  %5434 = vmatprep.mubr.msk.f32.mxu1 %vm6423_vm0, %v6422_v0 }
 0x8b8   :  { %5428 = vmatprep.subr.mxu1 %v6422_v0 }
 0x8b9   :  { %5429 = vmatpush3.msra.mxu1 %v6857_v4 }
 0x8ba   :  { %5430 = vmatprep.subr.mxu1 %v6422_v0 }
 0x8bb   :  { %5431 = vmatpush3.msra.mxu1 %v6861_v45  ;;  %v7031_v45 = vld [vmem:[#allocation10 + $0x10] sm:$0xff] }
 0x8bc   :  { %5432 = vmatprep.subr.mxu1 %v6422_v0 }
 0x8bd   :  { %5433 = vmatpush3.msra.mxu1 %v6865_v14  ;;  %v7037_v14 = vld [vmem:[#allocation10 + $0x8] sm:$0xff] }
 0x8be   :  { %5435 = vmatmul.mubr.msk.f32.vlgmr.msra.gmra.mxu1 %vm119_vm1, %v1721_v41  ;;  %5448 = vmatprep.subr.mxu1 %v6422_v0 }
 0x8bf   :  { %v1287_v8 = vpop.permute.xlu0 %1286  ;;  %5449 = vmatpush3.msra.mxu1 %v7023_v34  ;;  %5456 = vmatprep.mubr.msk.f32.mxu1 %vm6423_vm0, %v6422_v0 }
 0x8c0   :  { %v7028_v4 = vmul.f32 %v5811_v5, %v1287_v8  ;;  %5450 = vmatprep.subr.mxu1 %v6422_v0 }
 0x8c1   :  { %5451 = vmatpush3.msra.mxu1 %v7031_v45 }
 0x8c2   :  { %1794 = vrot.lane.b32.xlu1 %v7028_v4, %s6425_s5  ;;  %5452 = vmatprep.subr.mxu1 %v6422_v0 }
 0x8c3   :  { %5453 = vmatpush3.msra.mxu1 %v7037_v14 }
 0x8c4   :  { %5454 = vmatprep.subr.mxu1 %v6422_v0 }
 0x8c5   :  { %5455 = vmatpush3.msra.mxu1 %v7041_v25 }
 0x8c6   :  { %5470 = vmatprep.subr.mxu1 %v6422_v0 }
 0x934   :  { %v1795_v3 = vpop.permute.xlu1 %1794 }
 0x935   :  { %5424 = vmatmul.mubr.msk.f32.vlgmr.msra.gmra.mxu0 %vm119_vm1, %v1795_v3 }
 0x936   :  { %5438 = vmatpush3.msra.mxu0 %v7046_v58  ;;  %5445 = vmatprep.mubr.msk.f32.mxu0 %vm6423_vm0, %v6422_v0 }
 0x937   :  { %5439 = vmatprep.subr.mxu0 %v6422_v0 }
 0x938   :  { %5440 = vmatpush3.msra.mxu0 %v7052_v56 }
 0x939   :  { %5441 = vmatprep.subr.mxu0 %v6422_v0 }
 0x93a   :  { %5442 = vmatpush3.msra.mxu0 %v7056_v37 }
 0x93b   :  { %5443 = vmatprep.subr.mxu0 %v6422_v0 }
 0x93c   :  { %5444 = vmatpush3.msra.mxu0 %v7060_v29 }
 0x93d   :  { %5459 = vmatprep.subr.mxu0 %v6422_v0 }
 0x976   :  { %v7064_v60 = vpop.f32.mrf.mxu1 }
 0x978   :  { %v5414_v62 = vpop.f32.mrf.mxu1 }
 0x97e   :  { %v2081_v42 = vpop.f32.mrf.mxu1 }
 0x97f   :  { %v2101_v36 = vadd.f32 %v2081_v42, %v2007_v31  ;;  %v2086_v7 = vrot.slane %v2081_v42, 1  ;;  %v2087_v46 = vrot.slane %v2081_v42, 2  ;;  %v2089_v43 = vrot.slane %v2081_v42, 4 }
 0x980   :  { %v5436_v5 = vpop.f32.mrf.mxu1  ;;  %v2088_v57 = vrot.slane %v2081_v42, 3  ;;  %v2091_v61 = vrot.slane %v2081_v42, 6  ;;  %v2090_v39 = vrot.slane %v2081_v42, 5  ;;  %v2092_v59 = vrot.slane %v2081_v42, 7 }
 0x981   :  { %5816 = vtanh.f32 %v2101_v36  ;;  %v2102_v51 = vadd.f32 %v2086_v7, %v2008_v12  ;;  %v2103_v33 = vadd.f32 %v2087_v46, %v2009_v15  ;;  %v2105_v50 = vadd.f32 %v2089_v43, %v2011_v44 }
 0x982   :  { %v2104_v9 = vadd.f32 %v2088_v57, %v2010_v48  ;;  %v2107_v1 = vadd.f32 %v2091_v61, %v2013_v35  ;;  %v2106_v63 = vadd.f32 %v2090_v39, %v2012_v53  ;;  %v2108_v26 = vadd.f32 %v2092_v59, %v2014_v2 }
 0x983   :  { %5818 = vtanh.f32 %v2102_v51  ;;  %v5148_v23 = vmul.f32 -1.442695, %v2101_v36  ;;  %v5149_v21 = vmul.f32 -1.442695, %v2102_v51  ;;  %v5150_v27 = vmul.f32 -1.442695, %v2103_v33 }
 0x984   :  { %5820 = vtanh.f32 %v2103_v33  ;;  %v5152_v16 = vmul.f32 -1.442695, %v2105_v50  ;;  %v5151_v17 = vmul.f32 -1.442695, %v2104_v9  ;;  %v5154_v41 = vmul.f32 -1.442695, %v2107_v1 }
 0x985   :  { %5822 = vtanh.f32 %v2105_v50  ;;  %v5153_v8 = vmul.f32 -1.442695, %v2106_v63  ;;  %v5155_v62 = vmul.f32 -1.442695, %v2108_v26 }
 0x986   :  { %5824 = vtanh.f32 %v2104_v9 }
 0x987   :  { %5826 = vtanh.f32 %v2107_v1 }
 0x988   :  { %5828 = vtanh.f32 %v2106_v63 }
 0x989   :  { %5830 = vtanh.f32 %v2108_v26 }
 0x98a   :  { %5832 = vpow2.f32 %v5148_v23 }
 0x98b   :  { %5834 = vpow2.f32 %v5149_v21 }
 0x98c   :  { %5836 = vpow2.f32 %v5150_v27 }
 0x98d   :  { %5838 = vpow2.f32 %v5152_v16 }
 0x98e   :  { %v5817_v10 = vpop.eup %5816  ;;  %5840 = vpow2.f32 %v5151_v17 }
 0x98f   :  { %2181 = vrot.lane.b32.xlu0 %v5817_v10, %s6424_s4  ;;  %5842 = vpow2.f32 %v5154_v41  ;;  %v7082_v10 = vld [vmem:[%s8214_s6] ss:$0 sm:$0xff] }
 0x990   :  { %v5819_v47 = vpop.eup %5818  ;;  %5844 = vpow2.f32 %v5153_v8 }
 0x991   :  { %v5821_v6 = vpop.eup %5820 }
 0x992   :  { %2185 = vrot.lane.b32.xlu1 %v5821_v6, %s6424_s4  ;;  %v5823_v28 = vpop.eup %5822 }
 0x993   :  { %2183 = vrot.lane.b32.xlu0 %v5819_v47, %s6424_s4  ;;  %v5825_v11 = vpop.eup %5824 }
 0x994   :  { %v5827_v22 = vpop.eup %5826 }
 0x995   :  { %v5829_v32 = vpop.eup %5828 }
 0x996   :  { %2187 = vrot.lane.b32.xlu1 %v5825_v11, %s6424_s4  ;;  %v5831_v38 = vpop.eup %5830 }
 0x997   :  { %2189 = vrot.lane.b32.xlu0 %v5823_v28, %s6424_s4  ;;  %v5833_v54 = vpop.eup %5832 }
 0x998   :  { %v2133_v3 = vadd.f32 1.0, %v5833_v54  ;;  %v5835_v36 = vpop.eup %5834 }
 0x999   :  { %v5837_v5 = vpop.eup %5836  ;;  %v2134_v7 = vadd.f32 1.0, %v5835_v36 }
 0x99a   :  { %2191 = vrot.lane.b32.xlu1 %v5829_v32, %s6424_s4  ;;  %5846 = vrcp.f32 %v2133_v3  ;;  %v5839_v12 = vpop.eup %5838  ;;  %v2135_v46 = vadd.f32 1.0, %v5837_v5 }
 0x99b   :  { %2193 = vrot.lane.b32.xlu0 %v5827_v22, %s6424_s4  ;;  %5848 = vpow2.f32 %v5155_v62  ;;  %v5841_v15 = vpop.eup %5840  ;;  %v2137_v43 = vadd.f32 1.0, %v5839_v12 }
 0x99c   :  { %5850 = vrcp.f32 %v2134_v7  ;;  %v5843_v51 = vpop.eup %5842  ;;  %v2136_v44 = vadd.f32 1.0, %v5841_v15 }
 0x99d   :  { %5852 = vrcp.f32 %v2135_v46  ;;  %v5845_v57 = vpop.eup %5844  ;;  %v2139_v48 = vadd.f32 1.0, %v5843_v51 }
 0x99e   :  { %2195 = vrot.lane.b32.xlu1 %v5831_v38, %s6424_s4  ;;  %5854 = vrcp.f32 %v2137_v43  ;;  %v2138_v50 = vadd.f32 1.0, %v5845_v57 }
 0x99f   :  { %5856 = vrcp.f32 %v2136_v44 }
 0x9a0   :  { %5858 = vrcp.f32 %v2139_v48 }
 0x9a1   :  { %5860 = vrcp.f32 %v2138_v50 }
 0x9a7   :  { %v7074_v33 = vpop.eup %5846 }
 0x9a8   :  { %v5849_v39 = vpop.eup %5848 }
 0x9a9   :  { %v2140_v53 = vadd.f32 1.0, %v5849_v39  ;;  %v7085_v59 = vpop.eup %5850 }
 0x9aa   :  { %v7087_v2 = vpop.eup %5852  ;;  %v2166_v46 = vmul.f32 %v7085_v59, %v6950_v19 }
 0x9ab   :  { %5862 = vrcp.f32 %v2140_v53  ;;  %v7092_v6 = vpop.eup %5854  ;;  %v2167_v15 = vmul.f32 %v7087_v2, %v6952_v18 }
 0x9ac   :  { %v7095_v11 = vpop.eup %5856 }
 0x9ad   :  { %v7100_v23 = vpop.eup %5858  ;;  %v2168_v48 = vmul.f32 %v7095_v11, %v6962_v52 }
 0x9ae   :  { %v7103_v27 = vpop.eup %5860  ;;  %v2171_v39 = vmul.f32 %v7100_v23, %v6971_v24 }
 0x9b8   :  { %v7109_v41 = vpop.eup %5862 }
 0x9f5   :  { %v1864_v31 = vpop.f32.mrf.mxu0 }
 0x9f6   :  { %v1865_v9 = vadd.f32 %v1864_v31, %v7064_v60 }
 0x9f7   :  { %v5425_v42 = vpop.f32.mrf.mxu0 }
 0x9f8   :  { %v1868_v1 = vadd.f32 %v7082_v10, %v1865_v9  ;;  %v2165_v42 = vmul.f32 %v7074_v33, %v6943_v40  ;;  %v2169_v40 = vmul.f32 %v7092_v6, %v6960_v49  ;;  %v2170_v49 = vmul.f32 %v7103_v27, %v6973_v55 }
 0x9fa   :  { %5864 = vtanh.f32 %v1868_v1  ;;  %v5146_v31 = vmul.f32 -1.442695, %v1868_v1 }
 0x9fc   :  { %5866 = vpow2.f32 %v5146_v31 }
 0xa01   :  { %v2182_v61 = vpop.permute.xlu0 %2181 }
 0xa02   :  { %v2205_v35 = vmul.f32 %v7074_v33, %v2182_v61 }
 0xa04   :  { %2221 = vrot.lane.b32.xlu0 %v2205_v35, %s6425_s5  ;;  %v2186_v60 = vpop.permute.xlu1 %2185 }
 0xa05   :  { %v2184_v63 = vpop.permute.xlu0 %2183  ;;  %v2207_v47 = vmul.f32 %v7087_v2, %v2186_v60  ;;  %v2172_v60 = vmul.f32 %v7109_v41, %v6979_v30 }
 0xa06   :  { %v2206_v26 = vmul.f32 %v7085_v59, %v2184_v63 }
 0xa07   :  { %2225 = vrot.lane.b32.xlu1 %v2207_v47, %s6425_s5  ;;  %v5865_v3 = vpop.eup %5864 }
 0xa08   :  { %2223 = vrot.lane.b32.xlu0 %v2206_v26, %s6425_s5  ;;  %v2188_v22 = vpop.permute.xlu1 %2187 }
 0xa09   :  { %v2190_v28 = vpop.permute.xlu0 %2189  ;;  %v2208_v38 = vmul.f32 %v7095_v11, %v2188_v22  ;;  %v5867_v5 = vpop.eup %5866 }
 0xa0a   :  { %v2209_v32 = vmul.f32 %v7092_v6, %v2190_v28  ;;  %v1872_v12 = vadd.f32 1.0, %v5867_v5 }
 0xa0b   :  { %2227 = vrot.lane.b32.xlu1 %v2208_v38, %s6425_s5 }
 0xa0c   :  { %2229 = vrot.lane.b32.xlu0 %v2209_v32, %s6425_s5  ;;  %v2192_v16 = vpop.permute.xlu1 %2191 }
 0xa0d   :  { %v2194_v21 = vpop.permute.xlu0 %2193  ;;  %v2210_v54 = vmul.f32 %v7103_v27, %v2192_v16 }
 0xa0e   :  { %v2211_v17 = vmul.f32 %v7100_v23, %v2194_v21 }
 0xa0f   :  { %2231 = vrot.lane.b32.xlu1 %v2210_v54, %s6425_s5 }
 0xa10   :  { %2233 = vrot.lane.b32.xlu0 %v2211_v17, %s6425_s5  ;;  %v2196_v8 = vpop.permute.xlu1 %2195 }
 0xa11   :  { %v2212_v62 = vmul.f32 %v7109_v41, %v2196_v8 }
 0xa13   :  { %2235 = vrot.lane.b32.xlu1 %v2212_v62, %s6425_s5 }
 0xa14   :  { %1878 = vrot.lane.b32.xlu0 %v5865_v3, %s6424_s4 }
 0xa76   :  { %v2222_v36 = vpop.permute.xlu0 %2221 }
 0xa77   :  { %v7116_v7 = vadd.f32 %v2222_v36, %v2165_v42 }
 0xa79   :  { %5868 = vtanh.f32 %v7116_v7  ;;  %v2226_v51 = vpop.permute.xlu1 %2225 }
 0xa7a   :  { %5870 = vrcp.f32 %v1872_v12  ;;  %v2224_v43 = vpop.permute.xlu0 %2223  ;;  %v7125_v57 = vadd.f32 %v2226_v51, %v2167_v15 }
 0xa7b   :  { %v7123_v44 = vadd.f32 %v2224_v43, %v2166_v46 }
 0xa7d   :  { %5872 = vtanh.f32 %v7123_v44  ;;  %v2228_v19 = vpop.permute.xlu1 %2227 }
 0xa7e   :  { %v2230_v61 = vpop.permute.xlu0 %2229  ;;  %5874 = vtanh.f32 %v7125_v57  ;;  %v7135_v18 = vadd.f32 %v2228_v19, %v2168_v48 }
 0xa7f   :  { %v7133_v50 = vadd.f32 %v2230_v61, %v2169_v40 }
 0xa81   :  { %5876 = vtanh.f32 %v7133_v50  ;;  %v2232_v52 = vpop.permute.xlu1 %2231 }
 0xa82   :  { %v2234_v9 = vpop.permute.xlu0 %2233  ;;  %5878 = vtanh.f32 %v7135_v18  ;;  %v7146_v1 = vadd.f32 %v2232_v52, %v2170_v49 }
 0xa83   :  { %v7144_v53 = vadd.f32 %v2234_v9, %v2171_v39 }
 0xa85   :  { %5880 = vtanh.f32 %v7144_v53  ;;  %v2236_v55 = vpop.permute.xlu1 %2235 }
 0xa86   :  { %v5869_v35 = vpop.eup %5868  ;;  %v1879_v24 = vpop.permute.xlu0 %1878  ;;  %5882 = vtanh.f32 %v7146_v1  ;;  %v7152_v47 = vadd.f32 %v2236_v55, %v2172_v60 }
 0xa87   :  { %2269 = vrot.lane.b32.xlu0 %v5869_v35, %s6424_s4  ;;  %v5871_v63 = vpop.eup %5870 }
 0xa88   :  { %v1881_v26 = vmul.f32 %v5871_v63, %v1879_v24  ;;  %5884 = vtanh.f32 %v7152_v47  ;;  %v1876_v54 = vmul.f32 %v5871_v63, %v7002_v13 }
 0xa8a   :  { %1883 = vrot.lane.b32.xlu1 %v1881_v26, %s6425_s5  ;;  %v5873_v28 = vpop.eup %5872 }
 0xa8b   :  { %2271 = vrot.lane.b32.xlu0 %v5873_v28, %s6424_s4  ;;  %v5875_v22 = vpop.eup %5874 }
 0xa8e   :  { %2273 = vrot.lane.b32.xlu1 %v5875_v22, %s6424_s4  ;;  %v5877_v32 = vpop.eup %5876 }
 0xa8f   :  { %2277 = vrot.lane.b32.xlu0 %v5877_v32, %s6424_s4  ;;  %v5879_v30 = vpop.eup %5878  ;;  %v7195_v32 = vld [vmem:[#allocation8 + $0x10] sm:$0xff] }
 0xa92   :  { %2275 = vrot.lane.b32.xlu1 %v5879_v30, %s6424_s4  ;;  %v5881_v38 = vpop.eup %5880  ;;  %v7203_v30 = vld [vmem:[#allocation8] sm:$0xff] }
 0xa93   :  { %2281 = vrot.lane.b32.xlu0 %v5881_v38, %s6424_s4  ;;  %v5883_v21 = vpop.eup %5882 }
 0xa95   :  { %v5885_v16 = vpop.eup %5884 }
 0xa96   :  { %2279 = vrot.lane.b32.xlu1 %v5883_v21, %s6424_s4 }
 0xa9a   :  { %2283 = vrot.lane.b32.xlu1 %v5885_v16, %s6424_s4 }
 0xaf9   :  { %v2270_v17 = vpop.permute.xlu0 %2269 }
 0xafa   :  { %v2293_v46 = vmul.f32 %v7074_v33, %v2270_v17  ;;  %v2611_v17 = vld [vmem:[#allocation2 + $0xc] sm:$0x1] }
 0xafc   :  { %v1884_v8 = vpop.permute.xlu1 %1883 }
 0xafd   :  { %v7164_v3 = vadd.f32 %v1884_v8, %v1876_v54  ;;  %v2272_v62 = vpop.permute.xlu0 %2271  ;;  %v2612_v54 = vld [vmem:[#allocation2 + $0x14] sm:$0x1] }
 0xafe   :  { %v2294_v31 = vmul.f32 %v7085_v59, %v2272_v62 }
 0xaff   :  { %5886 = vtanh.f32 %v7164_v3 }
 0xb00   :  { %v2274_v42 = vpop.permute.xlu1 %2273  ;;  %v2309_v36 = vrot.slane %v2294_v31, 7 }
 0xb01   :  { %v2295_v5 = vmul.f32 %v7087_v2, %v2274_v42  ;;  %v2278_v12 = vpop.permute.xlu0 %2277 }
 0xb02   :  { %v2310_v51 = vsel %vm490_vm2, %v2309_v36, %v2293_v46  ;;  %v2297_v40 = vmul.f32 %v7092_v6, %v2278_v12  ;;  %v2613_v36 = vld [vmem:[#allocation2 + $0x1c] sm:$0x1]  ;;  %v2616_v12 = vld [vmem:[#allocation2 + $0x34] sm:$0x1] }
 0xb03   :  { %v2311_v15 = vrot.slane %v2295_v5, 6 }
 0xb04   :  { %v2276_v43 = vpop.permute.xlu1 %2275  ;;  %v2315_v39 = vrot.slane %v2297_v40, 4 }
 0xb05   :  { %v2296_v13 = vmul.f32 %v7095_v11, %v2276_v43  ;;  %v2282_v61 = vpop.permute.xlu0 %2281  ;;  %v2312_v19 = vsel %vm493_vm3, %v2311_v15, %v2310_v51  ;;  %v2615_v43 = vld [vmem:[#allocation2 + $0x2c] sm:$0x1] }
 0xb06   :  { %v2299_v33 = vmul.f32 %v7100_v23, %v2282_v61  ;;  %v2617_v61 = vld [vmem:[#allocation2 + $0x3c] sm:$0x1] }
 0xb07   :  { %v2313_v48 = vrot.slane %v2296_v13, 5 }
 0xb08   :  { %v2280_v59 = vpop.permute.xlu1 %2279  ;;  %v2319_v24 = vrot.slane %v2299_v33, 2 }
 0xb09   :  { %v2314_v35 = vsel %vm496_vm4, %v2313_v48, %v2312_v19  ;;  %v2298_v2 = vmul.f32 %v7103_v27, %v2280_v59 }
 0xb0a   :  { %v2316_v52 = vsel %vm499_vm5, %v2315_v39, %v2314_v35 }
 0xb0b   :  { %v2317_v49 = vrot.slane %v2298_v2, 3 }
 0xb0c   :  { %v5887_v9 = vpop.eup %5886  ;;  %v2284_v60 = vpop.permute.xlu1 %2283 }
 0xb0d   :  { %v2318_v11 = vsel %vm502_vm6, %v2317_v49, %v2316_v52  ;;  %v2300_v6 = vmul.f32 %v7109_v41, %v2284_v60  ;;  %1889 = vrot.lane.b32.xlu1 %v5887_v9, %s6424_s4  ;;  %v7189_v41 = vld [vmem:[#allocation8 + $0x18] sm:$0xff] }
 0xb0e   :  { %v2320_v26 = vsel %vm505_vm7, %v2319_v24, %v2318_v11 }
 0xb0f   :  { %v2321_v55 = vrot.slane %v2300_v6, 1 }
 0xb11   :  { %v2322_v27 = vsel %vm508_vm8, %v2321_v55, %v2320_v26 }
 0xb12   :  { %2323 = vrot.lane.b32.xlu0 %v2322_v27, %s6425_s5 }
 0xb7f   :  { %v1890_v23 = vpop.permute.xlu1 %1889 }
 0xb80   :  { %v7184_v28 = vmul.f32 %v5871_v63, %v1890_v23  ;;  %v7199_v63 = vld [vmem:[#allocation8 + $0x8] sm:$0xff] }
 0xb82   :  { %2397 = vrot.lane.b32.xlu0 %v7184_v28, %s6425_s5 }
 0xb84   :  { %v2324_v22 = vpop.permute.xlu0 %2323 }
 0xb85   :  { %5446 = vmatmul.mubr.msk.f32.vlgmr.msra.gmra.mxu0 %vm119_vm1, %v2324_v22 }
 0xb86   :  { %5460 = vmatpush3.msra.mxu0 %v7189_v41  ;;  %5467 = vmatprep.mubr.msk.f32.mxu0 %vm6423_vm0, %v6422_v0 }
 0xb87   :  { %5461 = vmatprep.subr.mxu0 %v6422_v0 }
 0xb88   :  { %5462 = vmatpush3.msra.mxu0 %v7195_v32 }
 0xb89   :  { %5463 = vmatprep.subr.mxu0 %v6422_v0 }
 0xb8a   :  { %5464 = vmatpush3.msra.mxu0 %v7199_v63 }
 0xb8b   :  { %5465 = vmatprep.subr.mxu0 %v6422_v0 }
 0xb8c   :  { %5466 = vmatpush3.msra.mxu0 %v7203_v30 }
 0xb8d   :  { %5468 = vmatmul.mubr.msk.f32.vlgmr.msra.gmra.mxu0 %vm119_vm1, %v2324_v22  ;;  %5481 = vmatprep.subr.mxu0 %v6422_v0 }
 0xb8e   :  { %5482 = vmatpush3.msra.mxu0 %v7023_v34  ;;  %5489 = vmatprep.mubr.msk.f32.mxu0 %vm6423_vm0, %v6422_v0 }
 0xb8f   :  { %5483 = vmatprep.subr.mxu0 %v6422_v0 }
 0xb90   :  { %5484 = vmatpush3.msra.mxu0 %v7031_v45 }
 0xb91   :  { %5485 = vmatprep.subr.mxu0 %v6422_v0 }
 0xb92   :  { %5486 = vmatpush3.msra.mxu0 %v7037_v14  ;;  %v2610_v14 = vld [vmem:[#allocation2 + $0x4] sm:$0x1] }
 0xb93   :  { %5487 = vmatprep.subr.mxu0 %v6422_v0 }
 0xb94   :  { %5488 = vmatpush3.msra.mxu0 %v7041_v25 }
 0xb95   :  { %5503 = vmatprep.subr.mxu0 %v6422_v0 }
 0xbf4   :  { %v2398_v38 = vpop.permute.xlu0 %2397 }
 0xbf5   :  { %5457 = vmatmul.mubr.msk.f32.vlgmr.msra.gmra.mxu1 %vm119_vm1, %v2398_v38 }
 0xbf6   :  { %5471 = vmatpush3.msra.mxu1 %v7046_v58  ;;  %5478 = vmatprep.mubr.msk.f32.mxu1 %vm6423_vm0, %v6422_v0 }
 0xbf7   :  { %5472 = vmatprep.subr.mxu1 %v6422_v0 }
 0xbf8   :  { %5473 = vmatpush3.msra.mxu1 %v7052_v56 }
 0xbf9   :  { %5474 = vmatprep.subr.mxu1 %v6422_v0 }
 0xbfa   :  { %5475 = vmatpush3.msra.mxu1 %v7056_v37  ;;  %v2614_v37 = vld [vmem:[#allocation2 + $0x24] sm:$0x1] }
 0xbfb   :  { %5476 = vmatprep.subr.mxu1 %v6422_v0 }
 0xbfc   :  { %5477 = vmatpush3.msra.mxu1 %v7060_v29 }
 0xbfd   :  { %5492 = vmatprep.subr.mxu1 %v6422_v0 }
 0xc45   :  { %v2393_v34 = vpop.f32.mrf.mxu0 }
 0xc47   :  { %v5447_v45 = vpop.f32.mrf.mxu0 }
 0xc4d   :  { %v2684_v25 = vpop.f32.mrf.mxu0 }
 0xc4e   :  { %v2704_v58 = vadd.f32 %v2684_v25, %v2610_v14  ;;  %v2689_v16 = vrot.slane %v2684_v25, 1  ;;  %v2690_v56 = vrot.slane %v2684_v25, 2  ;;  %v2692_v8 = vrot.slane %v2684_v25, 4 }
 0xc4f   :  { %v5469_v21 = vpop.f32.mrf.mxu0  ;;  %v2691_v31 = vrot.slane %v2684_v25, 3  ;;  %v2694_v29 = vrot.slane %v2684_v25, 6  ;;  %v2693_v46 = vrot.slane %v2684_v25, 5  ;;  %v2695_v40 = vrot.slane %v2684_v25, 7 }
 0xc50   :  { %5888 = vtanh.f32 %v2704_v58  ;;  %v2705_v62 = vadd.f32 %v2689_v16, %v2611_v17  ;;  %v2706_v42 = vadd.f32 %v2690_v56, %v2612_v54  ;;  %v2708_v5 = vadd.f32 %v2692_v8, %v2614_v37 }
 0xc51   :  { %v2707_v15 = vadd.f32 %v2691_v31, %v2613_v36  ;;  %v2710_v13 = vadd.f32 %v2694_v29, %v2616_v12  ;;  %v2709_v48 = vadd.f32 %v2693_v46, %v2615_v43  ;;  %v2711_v19 = vadd.f32 %v2695_v40, %v2617_v61 }
 0xc52   :  { %5890 = vtanh.f32 %v2705_v62  ;;  %v5160_v52 = vmul.f32 -1.442695, %v2704_v58  ;;  %v5161_v60 = vmul.f32 -1.442695, %v2705_v62  ;;  %v5162_v24 = vmul.f32 -1.442695, %v2706_v42 }
 0xc53   :  { %5892 = vtanh.f32 %v2706_v42  ;;  %v5164_v27 = vmul.f32 -1.442695, %v2708_v5  ;;  %v5163_v23 = vmul.f32 -1.442695, %v2707_v15  ;;  %v5166_v38 = vmul.f32 -1.442695, %v2710_v13 }
 0xc54   :  { %5894 = vtanh.f32 %v2708_v5  ;;  %v5165_v45 = vmul.f32 -1.442695, %v2709_v48 }
 0xc55   :  { %5896 = vtanh.f32 %v2707_v15 }
 0xc56   :  { %5898 = vtanh.f32 %v2710_v13 }
 0xc57   :  { %5900 = vtanh.f32 %v2709_v48 }
 0xc58   :  { %5902 = vtanh.f32 %v2711_v19 }
 0xc59   :  { %5904 = vpow2.f32 %v5160_v52 }
 0xc5a   :  { %5906 = vpow2.f32 %v5161_v60 }
 0xc5d   :  { %v5889_v51 = vpop.eup %5888 }
 0xc5e   :  { %2784 = vrot.lane.b32.xlu1 %v5889_v51, %s6424_s4 }
 0xc5f   :  { %v5891_v59 = vpop.eup %5890 }
 0xc60   :  { %v5893_v35 = vpop.eup %5892 }
 0xc61   :  { %2788 = vrot.lane.b32.xlu0 %v5893_v35, %s6424_s4  ;;  %v5895_v2 = vpop.eup %5894 }
 0xc62   :  { %2786 = vrot.lane.b32.xlu1 %v5891_v59, %s6424_s4  ;;  %v5897_v39 = vpop.eup %5896 }
 0xc63   :  { %v5899_v33 = vpop.eup %5898 }
 0xc64   :  { %v5901_v49 = vpop.eup %5900 }
 0xc65   :  { %2790 = vrot.lane.b32.xlu0 %v5897_v39, %s6424_s4  ;;  %v5903_v9 = vpop.eup %5902 }
 0xc66   :  { %2792 = vrot.lane.b32.xlu1 %v5895_v2, %s6424_s4  ;;  %v5905_v22 = vpop.eup %5904 }
 0xc67   :  { %v2736_v14 = vadd.f32 1.0, %v5905_v22  ;;  %v5907_v25 = vpop.eup %5906 }
 0xc68   :  { %v2737_v16 = vadd.f32 1.0, %v5907_v25 }
 0xc69   :  { %2794 = vrot.lane.b32.xlu0 %v5901_v49, %s6424_s4 }
 0xc6a   :  { %2796 = vrot.lane.b32.xlu1 %v5899_v33, %s6424_s4 }
 0xc6d   :  { %2798 = vrot.lane.b32.xlu0 %v5903_v9, %s6424_s4 }
 0xcb5   :  { %v2467_v11 = vpop.f32.mrf.mxu1 }
 0xcb6   :  { %v2468_v6 = vadd.f32 %v2467_v11, %v2393_v34  ;;  %v5167_v34 = vmul.f32 -1.442695, %v2711_v19 }
 0xcb7   :  { %v5458_v55 = vpop.f32.mrf.mxu1 }
 0xcb8   :  { %v7238_v26 = vadd.f32 %v7082_v10, %v2468_v6 }
 0xcba   :  { %5908 = vtanh.f32 %v7238_v26 }
 0xcbb   :  { %5910 = vpow2.f32 %v5162_v24 }
 0xcbc   :  { %5912 = vpow2.f32 %v5164_v27 }
 0xcbd   :  { %5914 = vpow2.f32 %v5163_v23  ;;  %v5158_v23 = vmul.f32 -1.442695, %v7238_v26 }
 0xcbe   :  { %5916 = vpow2.f32 %v5166_v38 }
 0xcbf   :  { %5918 = vpow2.f32 %v5165_v45 }
 0xcc0   :  { %5920 = vrcp.f32 %v2736_v14 }
 0xcc1   :  { %5922 = vpow2.f32 %v5167_v34 }
 0xcc2   :  { %5924 = vrcp.f32 %v2737_v16 }
 0xcc7   :  { %v5909_v58 = vpop.eup %5908 }
 0xcc8   :  { %v5911_v21 = vpop.eup %5910  ;;  %2481 = vrot.lane.b32.xlu1 %v5909_v58, %s6424_s4 }
 0xcc9   :  { %v5913_v17 = vpop.eup %5912  ;;  %v2738_v56 = vadd.f32 1.0, %v5911_v21 }
 0xcca   :  { %v5915_v54 = vpop.eup %5914  ;;  %v2740_v8 = vadd.f32 1.0, %v5913_v17 }
 0xccb   :  { %v5917_v62 = vpop.eup %5916  ;;  %v2739_v37 = vadd.f32 1.0, %v5915_v54  ;;  %5926 = vrcp.f32 %v2738_v56 }
 0xccc   :  { %v5919_v31 = vpop.eup %5918  ;;  %v2742_v36 = vadd.f32 1.0, %v5917_v62  ;;  %5928 = vrcp.f32 %v2740_v8 }
 0xccd   :  { %v7242_v42 = vpop.eup %5920  ;;  %v2741_v5 = vadd.f32 1.0, %v5919_v31  ;;  %5930 = vrcp.f32 %v2739_v37 }
 0xcce   :  { %v5923_v46 = vpop.eup %5922  ;;  %5932 = vrcp.f32 %v2742_v36  ;;  %v2768_v25 = vmul.f32 %v7242_v42, %v7116_v7 }
 0xccf   :  { %v2743_v15 = vadd.f32 1.0, %v5923_v46  ;;  %5934 = vrcp.f32 %v2741_v5  ;;  %v7246_v43 = vpop.eup %5924 }
 0xcd0   :  { %v2785_v29 = vpop.permute.xlu1 %2784  ;;  %v2769_v26 = vmul.f32 %v7246_v43, %v7123_v44 }
 0xcd1   :  { %v2808_v12 = vmul.f32 %v7242_v42, %v2785_v29  ;;  %5936 = vrcp.f32 %v2743_v15 }
 0xcd2   :  { %5938 = vpow2.f32 %v5158_v23 }
 0xcd3   :  { %2824 = vrot.lane.b32.xlu0 %v2808_v12, %s6425_s5  ;;  %v2789_v40 = vpop.permute.xlu0 %2788 }
 0xcd4   :  { %v2787_v51 = vpop.permute.xlu1 %2786 }
 0xcd5   :  { %v2809_v48 = vmul.f32 %v7246_v43, %v2787_v51 }
 0xcd7   :  { %2826 = vrot.lane.b32.xlu0 %v2809_v48, %s6425_s5  ;;  %v2791_v2 = vpop.permute.xlu0 %2790 }
 0xcd8   :  { %v7248_v13 = vpop.eup %5926  ;;  %v2793_v59 = vpop.permute.xlu1 %2792 }
 0xcd9   :  { %v2810_v61 = vmul.f32 %v7248_v13, %v2789_v40  ;;  %v7253_v19 = vpop.eup %5928  ;;  %v2770_v16 = vmul.f32 %v7248_v13, %v7125_v57 }
 0xcda   :  { %v7256_v35 = vpop.eup %5930  ;;  %v2812_v39 = vmul.f32 %v7253_v19, %v2793_v59  ;;  %v2772_v7 = vmul.f32 %v7253_v19, %v7133_v50 }
 0xcdb   :  { %2828 = vrot.lane.b32.xlu1 %v2810_v61, %s6425_s5  ;;  %v2811_v33 = vmul.f32 %v7256_v35, %v2791_v2  ;;  %v7261_v49 = vpop.eup %5932  ;;  %v2795_v60 = vpop.permute.xlu0 %2794  ;;  %v2771_v62 = vmul.f32 %v7256_v35, %v7135_v18 }
 0xcdc   :  { %2832 = vrot.lane.b32.xlu0 %v2812_v39, %s6425_s5  ;;  %v2797_v9 = vpop.permute.xlu1 %2796  ;;  %v7264_v52 = vpop.eup %5934  ;;  %v2774_v29 = vmul.f32 %v7261_v49, %v7144_v53 }
 0xcdd   :  { %v2814_v11 = vmul.f32 %v7261_v49, %v2797_v9  ;;  %v2813_v6 = vmul.f32 %v7264_v52, %v2795_v60  ;;  %v2773_v50 = vmul.f32 %v7264_v52, %v7146_v1 }
 0xcde   :  { %v7270_v24 = vpop.eup %5936 }
 0xcdf   :  { %2830 = vrot.lane.b32.xlu1 %v2811_v33, %s6425_s5  ;;  %v2799_v55 = vpop.permute.xlu0 %2798  ;;  %v5939_v22 = vpop.eup %5938  ;;  %v2775_v53 = vmul.f32 %v7270_v24, %v7152_v47 }
 0xce0   :  { %2836 = vrot.lane.b32.xlu0 %v2814_v11, %s6425_s5  ;;  %v2815_v27 = vmul.f32 %v7270_v24, %v2799_v55  ;;  %v2475_v38 = vadd.f32 1.0, %v5939_v22 }
 0xce2   :  { %5940 = vrcp.f32 %v2475_v38 }
 0xce3   :  { %2834 = vrot.lane.b32.xlu1 %v2813_v6, %s6425_s5 }
 0xce7   :  { %2838 = vrot.lane.b32.xlu1 %v2815_v27, %s6425_s5 }
 0xcef   :  { %v7275_v45 = vpop.eup %5940 }
 0xcf0   :  { %v2479_v39 = vmul.f32 %v7275_v45, %v7164_v3 }
 0xd3a   :  { %v2482_v14 = vpop.permute.xlu1 %2481 }
 0xd3b   :  { %v2484_v34 = vmul.f32 %v7275_v45, %v2482_v14 }
 0xd3d   :  { %2486 = vrot.lane.b32.xlu0 %v2484_v34, %s6425_s5 }
 0xd45   :  { %v2825_v58 = vpop.permute.xlu0 %2824 }
 0xd46   :  { %v7281_v21 = vadd.f32 %v2825_v58, %v2768_v25 }
 0xd48   :  { %5942 = vtanh.f32 %v7281_v21 }
 0xd49   :  { %v2827_v17 = vpop.permute.xlu0 %2826 }
 0xd4a   :  { %v7288_v54 = vadd.f32 %v2827_v17, %v2769_v26 }
 0xd4c   :  { %5944 = vtanh.f32 %v7288_v54 }
 0xd4d   :  { %v2829_v56 = vpop.permute.xlu1 %2828 }
 0xd4e   :  { %v7290_v8 = vadd.f32 %v2829_v56, %v2770_v16  ;;  %v2833_v44 = vpop.permute.xlu0 %2832 }
 0xd4f   :  { %v7298_v31 = vadd.f32 %v2833_v44, %v2772_v7 }
 0xd50   :  { %5946 = vtanh.f32 %v7290_v8 }
 0xd51   :  { %v2831_v37 = vpop.permute.xlu1 %2830  ;;  %5948 = vtanh.f32 %v7298_v31 }
 0xd52   :  { %v7300_v57 = vadd.f32 %v2831_v37, %v2771_v62  ;;  %v2837_v5 = vpop.permute.xlu0 %2836 }
 0xd53   :  { %v7309_v12 = vadd.f32 %v2837_v5, %v2774_v29 }
 0xd54   :  { %5950 = vtanh.f32 %v7300_v57 }
 0xd55   :  { %v5943_v36 = vpop.eup %5942  ;;  %v2835_v18 = vpop.permute.xlu1 %2834  ;;  %5952 = vtanh.f32 %v7309_v12 }
 0xd56   :  { %2872 = vrot.lane.b32.xlu1 %v5943_v36, %s6424_s4  ;;  %v7311_v46 = vadd.f32 %v2835_v18, %v2773_v50 }
 0xd58   :  { %5954 = vtanh.f32 %v7311_v46 }
 0xd59   :  { %v2839_v15 = vpop.permute.xlu1 %2838  ;;  %v5945_v40 = vpop.eup %5944 }
 0xd5a   :  { %v7317_v51 = vadd.f32 %v2839_v15, %v2775_v53  ;;  %2874 = vrot.lane.b32.xlu1 %v5945_v40, %s6424_s4  ;;  %v7391_v15 = vld [vmem:[#allocation11 + $0x10] sm:$0xff]  ;;  %v7395_v40 = vld [vmem:[#allocation11 + $0x8] sm:$0xff] }
 0xd5c   :  { %5956 = vtanh.f32 %v7317_v51 }
 0xd5d   :  { %v5947_v1 = vpop.eup %5946 }
 0xd5e   :  { %2876 = vrot.lane.b32.xlu0 %v5947_v1, %s6424_s4  ;;  %v5949_v48 = vpop.eup %5948  ;;  %v7399_v1 = vld [vmem:[#allocation11] sm:$0xff] }
 0xd5f   :  { %2880 = vrot.lane.b32.xlu1 %v5949_v48, %s6424_s4 }
 0xd61   :  { %v5951_v61 = vpop.eup %5950 }
 0xd62   :  { %2878 = vrot.lane.b32.xlu0 %v5951_v61, %s6424_s4  ;;  %v5953_v59 = vpop.eup %5952 }
 0xd63   :  { %2884 = vrot.lane.b32.xlu1 %v5953_v59, %s6424_s4  ;;  %v3213_v59 = vld [vmem:[#allocation2 + $0x5] sm:$0x1] }
 0xd65   :  { %v5955_v2 = vpop.eup %5954 }
 0xd66   :  { %2882 = vrot.lane.b32.xlu0 %v5955_v2, %s6424_s4 }
 0xd69   :  { %v5957_v47 = vpop.eup %5956 }
 0xd6a   :  { %2886 = vrot.lane.b32.xlu0 %v5957_v47, %s6424_s4 }
 0xdaf   :  { %v2487_v33 = vpop.permute.xlu0 %2486 }
 0xdb0   :  { %v7329_v9 = vadd.f32 %v2487_v33, %v2479_v39 }
 0xdb2   :  { %5958 = vtanh.f32 %v7329_v9 }
 0xdbf   :  { %v5959_v60 = vpop.eup %5958 }
 0xdc0   :  { %2492 = vrot.lane.b32.xlu1 %v5959_v60, %s6424_s4  ;;  %v3214_v60 = vld [vmem:[#allocation2 + $0xd] sm:$0x1] }
 0xdc8   :  { %v2873_v11 = vpop.permute.xlu1 %2872 }
 0xdc9   :  { %v2896_v22 = vmul.f32 %v7242_v42, %v2873_v11 }
 0xdcc   :  { %v2875_v6 = vpop.permute.xlu1 %2874 }
 0xdcd   :  { %v2897_v27 = vmul.f32 %v7246_v43, %v2875_v6  ;;  %v3215_v6 = vld [vmem:[#allocation2 + $0x15] sm:$0x1] }
 0xdcf   :  { %v2912_v38 = vrot.slane %v2897_v27, 7 }
 0xdd0   :  { %v2877_v55 = vpop.permute.xlu0 %2876 }
 0xdd1   :  { %v2898_v23 = vmul.f32 %v7248_v13, %v2877_v55  ;;  %v2881_v14 = vpop.permute.xlu1 %2880  ;;  %v2913_v34 = vsel %vm490_vm2, %v2912_v38, %v2896_v22 }
 0xdd2   :  { %v2900_v58 = vmul.f32 %v7253_v19, %v2881_v14  ;;  %v3216_v14 = vld [vmem:[#allocation2 + $0x1d] sm:$0x1] }
 0xdd3   :  { %v2914_v3 = vrot.slane %v2898_v23, 6  ;;  %v3217_v23 = vld [vmem:[#allocation2 + $0x25] sm:$0x1] }
 0xdd4   :  { %v2879_v25 = vpop.permute.xlu0 %2878  ;;  %v2918_v17 = vrot.slane %v2900_v58, 4 }
 0xdd5   :  { %v2899_v26 = vmul.f32 %v7256_v35, %v2879_v25  ;;  %v2915_v16 = vsel %vm493_vm3, %v2914_v3, %v2913_v34  ;;  %v2885_v7 = vpop.permute.xlu1 %2884  ;;  %v3219_v25 = vld [vmem:[#allocation2 + $0x35] sm:$0x1] }
 0xdd6   :  { %v2902_v13 = vmul.f32 %v7261_v49, %v2885_v7 }
 0xdd7   :  { %v2916_v56 = vrot.slane %v2899_v26, 5 }
 0xdd8   :  { %v2883_v43 = vpop.permute.xlu0 %2882  ;;  %v2922_v37 = vrot.slane %v2902_v13, 2  ;;  %v3220_v13 = vld [vmem:[#allocation2 + $0x3d] sm:$0x1] }
 0xdd9   :  { %v2917_v42 = vsel %vm496_vm4, %v2916_v56, %v2915_v16  ;;  %v2901_v62 = vmul.f32 %v7264_v52, %v2883_v43  ;;  %v3218_v16 = vld [vmem:[#allocation2 + $0x2d] sm:$0x1] }
 0xdda   :  { %v2919_v44 = vsel %vm499_vm5, %v2918_v17, %v2917_v42 }
 0xddb   :  { %v2920_v36 = vrot.slane %v2901_v62, 3 }
 0xddc   :  { %v2887_v29 = vpop.permute.xlu0 %2886 }
 0xddd   :  { %v2921_v19 = vsel %vm502_vm6, %v2920_v36, %v2919_v44  ;;  %v2903_v35 = vmul.f32 %v7270_v24, %v2887_v29 }
 0xdde   :  { %v2923_v50 = vsel %vm505_vm7, %v2922_v37, %v2921_v19 }
 0xddf   :  { %v2924_v5 = vrot.slane %v2903_v35, 1 }
 0xde1   :  { %v2925_v18 = vsel %vm508_vm8, %v2924_v5, %v2923_v50 }
 0xde2   :  { %2926 = vrot.lane.b32.xlu0 %v2925_v18, %s6425_s5 }
 0xe32   :  { %v2493_v49 = vpop.permute.xlu1 %2492 }
 0xe33   :  { %v7350_v53 = vmul.f32 %v7275_v45, %v2493_v49  ;;  %v7385_v45 = vld [vmem:[#allocation11 + $0x18] sm:$0xff] }
 0xe35   :  { %3000 = vrot.lane.b32.xlu1 %v7350_v53, %s6425_s5 }
 0xe54   :  { %v2927_v52 = vpop.permute.xlu0 %2926 }
 0xe55   :  { %5479 = vmatmul.mubr.msk.f32.vlgmr.msra.gmra.mxu1 %vm119_vm1, %v2927_v52 }
 0xe56   :  { %5493 = vmatpush3.msra.mxu1 %v7189_v41  ;;  %5500 = vmatprep.mubr.msk.f32.mxu1 %vm6423_vm0, %v6422_v0  ;;  %v7366_v41 = vld [vmem:[#allocation10 + $0x18] sm:$0xff] }
 0xe57   :  { %5494 = vmatprep.subr.mxu1 %v6422_v0 }
 0xe58   :  { %5495 = vmatpush3.msra.mxu1 %v7195_v32  ;;  %v7372_v32 = vld [vmem:[#allocation10 + $0x10] sm:$0xff] }
 0xe59   :  { %5496 = vmatprep.subr.mxu1 %v6422_v0 }
 0xe5a   :  { %5497 = vmatpush3.msra.mxu1 %v7199_v63  ;;  %v7376_v63 = vld [vmem:[#allocation10 + $0x8] sm:$0xff] }
 0xe5b   :  { %5498 = vmatprep.subr.mxu1 %v6422_v0 }
 0xe5c   :  { %5499 = vmatpush3.msra.mxu1 %v7203_v30  ;;  %v7380_v30 = vld [vmem:[#allocation10] sm:$0xff] }
 0xe5d   :  { %5501 = vmatmul.mubr.msk.f32.vlgmr.msra.gmra.mxu1 %vm119_vm1, %v2927_v52  ;;  %5514 = vmatprep.subr.mxu1 %v6422_v0 }
 0xe5e   :  { %5515 = vmatpush3.msra.mxu1 %v7366_v41  ;;  %5522 = vmatprep.mubr.msk.f32.mxu1 %vm6423_vm0, %v6422_v0 }
 0xe5f   :  { %5516 = vmatprep.subr.mxu1 %v6422_v0 }
 0xe60   :  { %5517 = vmatpush3.msra.mxu1 %v7372_v32 }
 0xe61   :  { %5518 = vmatprep.subr.mxu1 %v6422_v0 }
 0xe62   :  { %5519 = vmatpush3.msra.mxu1 %v7376_v63 }
 0xe63   :  { %5520 = vmatprep.subr.mxu1 %v6422_v0 }
 0xe64   :  { %5521 = vmatpush3.msra.mxu1 %v7380_v30 }
 0xe65   :  { %5536 = vmatprep.subr.mxu1 %v6422_v0 }
 0xea7   :  { %v3001_v24 = vpop.permute.xlu1 %3000 }
 0xea8   :  { %5490 = vmatmul.mubr.msk.f32.vlgmr.msra.gmra.mxu0 %vm119_vm1, %v3001_v24 }
 0xea9   :  { %5504 = vmatpush3.msra.mxu0 %v7385_v45  ;;  %5511 = vmatprep.mubr.msk.f32.mxu0 %vm6423_vm0, %v6422_v0 }
 0xeaa   :  { %5505 = vmatprep.subr.mxu0 %v6422_v0 }
 0xeab   :  { %5506 = vmatpush3.msra.mxu0 %v7391_v15 }
 0xeac   :  { %5507 = vmatprep.subr.mxu0 %v6422_v0 }
 0xead   :  { %5508 = vmatpush3.msra.mxu0 %v7395_v40 }
 0xeae   :  { %5509 = vmatprep.subr.mxu0 %v6422_v0 }
 0xeaf   :  { %5510 = vmatpush3.msra.mxu0 %v7399_v1 }
 0xeb0   :  { %5525 = vmatprep.subr.mxu0 %v6422_v0 }
 0xf15   :  { %v2996_v48 = vpop.f32.mrf.mxu1 }
 0xf17   :  { %v5480_v61 = vpop.f32.mrf.mxu1 }
 0xf1d   :  { %v3287_v2 = vpop.f32.mrf.mxu1 }
 0xf1e   :  { %v3307_v47 = vadd.f32 %v3287_v2, %v3213_v59  ;;  %v3292_v33 = vrot.slane %v3287_v2, 1  ;;  %v3293_v11 = vrot.slane %v3287_v2, 2  ;;  %v3295_v55 = vrot.slane %v3287_v2, 4 }
 0xf1f   :  { %v5502_v39 = vpop.f32.mrf.mxu1  ;;  %v3294_v22 = vrot.slane %v3287_v2, 3  ;;  %v3297_v3 = vrot.slane %v3287_v2, 6  ;;  %v3296_v58 = vrot.slane %v3287_v2, 5  ;;  %v3298_v7 = vrot.slane %v3287_v2, 7 }
 0xf20   :  { %5960 = vtanh.f32 %v3307_v47  ;;  %v3308_v27 = vadd.f32 %v3292_v33, %v3214_v60  ;;  %v3309_v38 = vadd.f32 %v3293_v11, %v3215_v6  ;;  %v3311_v34 = vadd.f32 %v3295_v55, %v3217_v23 }
 0xf21   :  { %v3310_v26 = vadd.f32 %v3294_v22, %v3216_v14  ;;  %v3313_v56 = vadd.f32 %v3297_v3, %v3219_v25  ;;  %v3312_v43 = vadd.f32 %v3296_v58, %v3218_v16  ;;  %v3314_v42 = vadd.f32 %v3298_v7, %v3220_v13 }
 0xf22   :  { %5962 = vtanh.f32 %v3308_v27  ;;  %v5172_v24 = vmul.f32 -1.442695, %v3307_v47  ;;  %v5173_v61 = vmul.f32 -1.442695, %v3308_v27  ;;  %v5174_v59 = vmul.f32 -1.442695, %v3309_v38 }
 0xf23   :  { %5964 = vtanh.f32 %v3309_v38  ;;  %v5176_v2 = vmul.f32 -1.442695, %v3311_v34  ;;  %v5175_v39 = vmul.f32 -1.442695, %v3310_v26  ;;  %v5177_v60 = vmul.f32 -1.442695, %v3312_v43 }
 0xf24   :  { %5966 = vtanh.f32 %v3311_v34  ;;  %v5179_v11 = vmul.f32 -1.442695, %v3314_v42 }
 0xf25   :  { %5968 = vtanh.f32 %v3310_v26 }
 0xf26   :  { %5970 = vtanh.f32 %v3313_v56 }
 0xf27   :  { %5972 = vtanh.f32 %v3312_v43 }
 0xf28   :  { %5974 = vtanh.f32 %v3314_v42 }
 0xf2d   :  { %v5961_v17 = vpop.eup %5960 }
 0xf2e   :  { %3387 = vrot.lane.b32.xlu0 %v5961_v17, %s6424_s4 }
 0xf2f   :  { %v5963_v62 = vpop.eup %5962 }
 0xf30   :  { %v5965_v44 = vpop.eup %5964 }
 0xf31   :  { %3391 = vrot.lane.b32.xlu1 %v5965_v44, %s6424_s4  ;;  %v5967_v37 = vpop.eup %5966 }
 0xf32   :  { %3389 = vrot.lane.b32.xlu0 %v5963_v62, %s6424_s4  ;;  %v5969_v36 = vpop.eup %5968 }
 0xf33   :  { %v5971_v29 = vpop.eup %5970 }
 0xf34   :  { %v5973_v19 = vpop.eup %5972 }
 0xf35   :  { %3393 = vrot.lane.b32.xlu1 %v5969_v36, %s6424_s4  ;;  %v5975_v35 = vpop.eup %5974 }
 0xf36   :  { %3395 = vrot.lane.b32.xlu0 %v5967_v37, %s6424_s4 }
 0xf39   :  { %3397 = vrot.lane.b32.xlu1 %v5973_v19, %s6424_s4 }
 0xf3a   :  { %3399 = vrot.lane.b32.xlu0 %v5971_v29, %s6424_s4 }
 0xf3d   :  { %3401 = vrot.lane.b32.xlu1 %v5975_v35, %s6424_s4 }
 0xf68   :  { %v3070_v50 = vpop.f32.mrf.mxu0 }
 0xf69   :  { %v3071_v5 = vadd.f32 %v3070_v50, %v2996_v48  ;;  %v5178_v48 = vmul.f32 -1.442695, %v3313_v56 }
 0xf6a   :  { %v5491_v18 = vpop.f32.mrf.mxu0 }
 0xf6b   :  { %v7412_v49 = vadd.f32 %v7082_v10, %v3071_v5 }
 0xf6d   :  { %5976 = vtanh.f32 %v7412_v49 }
 0xf6e   :  { %5978 = vpow2.f32 %v5172_v24 }
 0xf6f   :  { %5980 = vpow2.f32 %v5173_v61 }
 0xf70   :  { %5982 = vpow2.f32 %v5174_v59 }
 0xf71   :  { %5984 = vpow2.f32 %v5176_v2 }
 0xf72   :  { %5986 = vpow2.f32 %v5175_v39 }
 0xf73   :  { %5988 = vpow2.f32 %v5178_v48 }
 0xf74   :  { %5990 = vpow2.f32 %v5177_v60  ;;  %v5170_v60 = vmul.f32 -1.442695, %v7412_v49 }
 0xf7a   :  { %v5977_v52 = vpop.eup %5976 }
 0xf7b   :  { %3084 = vrot.lane.b32.xlu0 %v5977_v52, %s6424_s4  ;;  %v5979_v33 = vpop.eup %5978 }
 0xf7c   :  { %v3339_v10 = vadd.f32 1.0, %v5979_v33  ;;  %v5981_v6 = vpop.eup %5980 }
 0xf7d   :  { %v5983_v47 = vpop.eup %5982  ;;  %v3340_v55 = vadd.f32 1.0, %v5981_v6 }
 0xf7e   :  { %5992 = vrcp.f32 %v3339_v10  ;;  %v5985_v27 = vpop.eup %5984  ;;  %v3341_v23 = vadd.f32 1.0, %v5983_v47 }
 0xf7f   :  { %5994 = vpow2.f32 %v5179_v11  ;;  %v5987_v22 = vpop.eup %5986  ;;  %v3343_v38 = vadd.f32 1.0, %v5985_v27 }
 0xf80   :  { %5996 = vrcp.f32 %v3340_v55  ;;  %v5989_v14 = vpop.eup %5988  ;;  %v3342_v3 = vadd.f32 1.0, %v5987_v22 }
 0xf81   :  { %5998 = vrcp.f32 %v3341_v23  ;;  %v5991_v34 = vpop.eup %5990  ;;  %v3345_v58 = vadd.f32 1.0, %v5989_v14 }
 0xf82   :  { %6000 = vrcp.f32 %v3343_v38  ;;  %v3344_v16 = vadd.f32 1.0, %v5991_v34 }
 0xf83   :  { %6002 = vrcp.f32 %v3342_v3 }
 0xf84   :  { %6004 = vrcp.f32 %v3345_v58 }
 0xf85   :  { %6006 = vrcp.f32 %v3344_v16 }
 0xf8b   :  { %v7416_v25 = vpop.eup %5992 }
 0xf8c   :  { %v5995_v56 = vpop.eup %5994  ;;  %v3371_v27 = vmul.f32 %v7416_v25, %v7281_v21 }
 0xf8d   :  { %v3346_v7 = vadd.f32 1.0, %v5995_v56  ;;  %v7420_v43 = vpop.eup %5996 }
 0xf8e   :  { %v7422_v42 = vpop.eup %5998  ;;  %v3372_v49 = vmul.f32 %v7420_v43, %v7288_v54 }
 0xf8f   :  { %6008 = vrcp.f32 %v3346_v7  ;;  %v7427_v36 = vpop.eup %6000  ;;  %v3373_v38 = vmul.f32 %v7422_v42, %v7290_v8 }
 0xf90   :  { %v7430_v19 = vpop.eup %6002  ;;  %6010 = vpow2.f32 %v5170_v60  ;;  %v3375_v21 = vmul.f32 %v7427_v36, %v7298_v31 }
 0xf91   :  { %v7435_v18 = vpop.eup %6004 }
 0xf92   :  { %v7438_v24 = vpop.eup %6006  ;;  %v3377_v7 = vmul.f32 %v7435_v18, %v7309_v12 }
 0xf93   :  { %v3376_v31 = vmul.f32 %v7438_v24, %v7311_v46 }
 0xf9c   :  { %v7444_v39 = vpop.eup %6008 }
 0xf9d   :  { %v6011_v10 = vpop.eup %6010  ;;  %v3378_v12 = vmul.f32 %v7444_v39, %v7317_v51 }
 0xf9e   :  { %v3078_v11 = vadd.f32 1.0, %v6011_v10 }
 0xfa0   :  { %v3388_v26 = vpop.permute.xlu0 %3387  ;;  %6012 = vrcp.f32 %v3078_v11 }
 0xfa1   :  { %v3411_v17 = vmul.f32 %v7416_v25, %v3388_v26  ;;  %v3374_v26 = vmul.f32 %v7430_v19, %v7300_v57 }
 0xfa3   :  { %3427 = vrot.lane.b32.xlu1 %v3411_v17, %s6425_s5  ;;  %v3392_v62 = vpop.permute.xlu1 %3391 }
 0xfa4   :  { %v3390_v13 = vpop.permute.xlu0 %3389  ;;  %v3413_v37 = vmul.f32 %v7422_v42, %v3392_v62 }
 0xfa5   :  { %v3412_v44 = vmul.f32 %v7420_v43, %v3390_v13 }
 0xfa6   :  { %3431 = vrot.lane.b32.xlu0 %v3413_v37, %s6425_s5 }
 0xfa7   :  { %3429 = vrot.lane.b32.xlu1 %v3412_v44, %s6425_s5  ;;  %v3394_v35 = vpop.permute.xlu1 %3393 }
 0xfa8   :  { %v3396_v29 = vpop.permute.xlu0 %3395  ;;  %v3414_v5 = vmul.f32 %v7430_v19, %v3394_v35 }
 0xfa9   :  { %v3415_v50 = vmul.f32 %v7427_v36, %v3396_v29 }
 0xfaa   :  { %3433 = vrot.lane.b32.xlu0 %v3414_v5, %s6425_s5 }
 0xfab   :  { %3435 = vrot.lane.b32.xlu1 %v3415_v50, %s6425_s5  ;;  %v3398_v61 = vpop.permute.xlu1 %3397 }
 0xfac   :  { %v3400_v52 = vpop.permute.xlu0 %3399  ;;  %v3416_v2 = vmul.f32 %v7438_v24, %v3398_v61 }
 0xfad   :  { %v3417_v59 = vmul.f32 %v7435_v18, %v3400_v52  ;;  %v7449_v6 = vpop.eup %6012 }
 0xfae   :  { %3437 = vrot.lane.b32.xlu0 %v3416_v2, %s6425_s5 }
 0xfaf   :  { %3439 = vrot.lane.b32.xlu1 %v3417_v59, %s6425_s5  ;;  %v3402_v33 = vpop.permute.xlu1 %3401  ;;  %v3082_v59 = vmul.f32 %v7449_v6, %v7329_v9 }
 0xfb0   :  { %v3418_v48 = vmul.f32 %v7444_v39, %v3402_v33 }
 0xfb2   :  { %3441 = vrot.lane.b32.xlu0 %v3418_v48, %s6425_s5 }
 0xfed   :  { %v3085_v47 = vpop.permute.xlu0 %3084 }
 0xfee   :  { %v3087_v55 = vmul.f32 %v7449_v6, %v3085_v47 }
 0xff0   :  { %3089 = vrot.lane.b32.xlu1 %v3087_v55, %s6425_s5 }
0x1015   :  { %v3428_v23 = vpop.permute.xlu1 %3427 }
0x1016   :  { %v7455_v22 = vadd.f32 %v3428_v23, %v3371_v27 }
0x1018   :  { %6014 = vtanh.f32 %v7455_v22  ;;  %v3432_v3 = vpop.permute.xlu0 %3431 }
0x1019   :  { %v3430_v14 = vpop.permute.xlu1 %3429  ;;  %v7464_v58 = vadd.f32 %v3432_v3, %v3373_v38 }
0x101a   :  { %v7462_v34 = vadd.f32 %v3430_v14, %v3372_v49 }
0x101c   :  { %6016 = vtanh.f32 %v7462_v34  ;;  %v3434_v16 = vpop.permute.xlu0 %3433 }
0x101d   :  { %6018 = vtanh.f32 %v7464_v58  ;;  %v3436_v54 = vpop.permute.xlu1 %3435  ;;  %v7474_v8 = vadd.f32 %v3434_v16, %v3374_v26 }
0x101e   :  { %v7472_v17 = vadd.f32 %v3436_v54, %v3375_v21 }
0x1020   :  { %6020 = vtanh.f32 %v7472_v17  ;;  %v3438_v57 = vpop.permute.xlu0 %3437 }
0x1021   :  { %6022 = vtanh.f32 %v7474_v8  ;;  %v3440_v13 = vpop.permute.xlu1 %3439  ;;  %v7485_v44 = vadd.f32 %v3438_v57, %v3376_v31 }
0x1022   :  { %v7483_v62 = vadd.f32 %v3440_v13, %v3377_v7 }
0x1024   :  { %6024 = vtanh.f32 %v7483_v62  ;;  %v3442_v37 = vpop.permute.xlu0 %3441 }
0x1025   :  { %v6015_v56 = vpop.eup %6014  ;;  %6026 = vtanh.f32 %v7485_v44  ;;  %v7491_v29 = vadd.f32 %v3442_v37, %v3378_v12 }
0x1026   :  { %3475 = vrot.lane.b32.xlu0 %v6015_v56, %s6424_s4 }
0x1027   :  { %6028 = vtanh.f32 %v7491_v29 }
0x1029   :  { %v6017_v35 = vpop.eup %6016 }
0x102a   :  { %v6019_v46 = vpop.eup %6018  ;;  %3477 = vrot.lane.b32.xlu0 %v6017_v35, %s6424_s4 }
0x102b   :  { %3479 = vrot.lane.b32.xlu1 %v6019_v46, %s6424_s4 }
0x102d   :  { %v6021_v50 = vpop.eup %6020 }
0x102e   :  { %v6023_v5 = vpop.eup %6022  ;;  %3483 = vrot.lane.b32.xlu0 %v6021_v50, %s6424_s4 }
0x102f   :  { %3481 = vrot.lane.b32.xlu1 %v6023_v5, %s6424_s4  ;;  %v7529_v5 = vld [vmem:[#allocation8 + $0x18] sm:$0xff] }
0x1031   :  { %v6025_v52 = vpop.eup %6024 }
0x1032   :  { %v6027_v61 = vpop.eup %6026  ;;  %3487 = vrot.lane.b32.xlu0 %v6025_v52, %s6424_s4  ;;  %v7543_v52 = vld [vmem:[#allocation8] sm:$0xff] }
0x1033   :  { %3485 = vrot.lane.b32.xlu1 %v6027_v61, %s6424_s4 }
0x1034   :  { %v6029_v51 = vpop.eup %6028 }
0x1037   :  { %3489 = vrot.lane.b32.xlu1 %v6029_v51, %s6424_s4 }
0x1062   :  { %v3090_v2 = vpop.permute.xlu1 %3089 }
0x1063   :  { %v7503_v33 = vadd.f32 %v3090_v2, %v3082_v59  ;;  %v3817_v2 = vld [vmem:[#allocation2 + $0xe] sm:$0x1] }
0x1065   :  { %6030 = vtanh.f32 %v7503_v33 }
0x1072   :  { %v6031_v48 = vpop.eup %6030 }
0x1073   :  { %3095 = vrot.lane.b32.xlu0 %v6031_v48, %s6424_s4  ;;  %v3818_v48 = vld [vmem:[#allocation2 + $0x16] sm:$0x1] }
0x1098   :  { %v3476_v60 = vpop.permute.xlu0 %3475 }
0x1099   :  { %v3499_v27 = vmul.f32 %v7416_v25, %v3476_v60 }
0x109c   :  { %v3478_v10 = vpop.permute.xlu0 %3477 }
0x109d   :  { %v3480_v11 = vpop.permute.xlu1 %3479  ;;  %v3500_v47 = vmul.f32 %v7420_v43, %v3478_v10 }
0x109e   :  { %v3501_v55 = vmul.f32 %v7422_v42, %v3480_v11 }
0x109f   :  { %v3515_v23 = vrot.slane %v3500_v47, 7 }
0x10a0   :  { %v3484_v49 = vpop.permute.xlu0 %3483  ;;  %v3517_v9 = vrot.slane %v3501_v55, 6  ;;  %v3819_v55 = vld [vmem:[#allocation2 + $0x1e] sm:$0x1] }
0x10a1   :  { %v3516_v38 = vsel %vm490_vm2, %v3515_v23, %v3499_v27  ;;  %v3482_v14 = vpop.permute.xlu1 %3481  ;;  %v3503_v3 = vmul.f32 %v7427_v36, %v3484_v49  ;;  %v3822_v23 = vld [vmem:[#allocation2 + $0x36] sm:$0x1] }
0x10a2   :  { %v3502_v21 = vmul.f32 %v7430_v19, %v3482_v14  ;;  %v3518_v26 = vsel %vm493_vm3, %v3517_v9, %v3516_v38  ;;  %v3821_v38 = vld [vmem:[#allocation2 + $0x2e] sm:$0x1] }
0x10a3   :  { %v3521_v54 = vrot.slane %v3503_v3, 4 }
0x10a4   :  { %v3519_v16 = vrot.slane %v3502_v21, 5  ;;  %v3488_v56 = vpop.permute.xlu0 %3487 }
0x10a5   :  { %v3486_v43 = vpop.permute.xlu1 %3485  ;;  %v3505_v42 = vmul.f32 %v7435_v18, %v3488_v56 }
0x10a6   :  { %v3520_v25 = vsel %vm496_vm4, %v3519_v16, %v3518_v26  ;;  %v3504_v7 = vmul.f32 %v7438_v24, %v3486_v43 }
0x10a7   :  { %v3522_v31 = vsel %vm499_vm5, %v3521_v54, %v3520_v25  ;;  %v3525_v13 = vrot.slane %v3505_v42, 2  ;;  %v3823_v54 = vld [vmem:[#allocation2 + $0x3e] sm:$0x1] }
0x10a8   :  { %v3523_v57 = vrot.slane %v3504_v7, 3 }
0x10a9   :  { %v3490_v12 = vpop.permute.xlu1 %3489 }
0x10aa   :  { %v3524_v36 = vsel %vm502_vm6, %v3523_v57, %v3522_v31  ;;  %v3506_v19 = vmul.f32 %v7444_v39, %v3490_v12  ;;  %v7535_v39 = vld [vmem:[#allocation8 + $0x10] sm:$0xff] }
0x10ab   :  { %v3526_v37 = vsel %vm505_vm7, %v3525_v13, %v3524_v36 }
0x10ac   :  { %v3527_v35 = vrot.slane %v3506_v19, 1  ;;  %v7580_v19 = vld [vmem:[%s8214_s6] ss:$0 sm:$0xff]  ;;  %s6427_s6 = smov 96  }
0x10ae   :  { %v3528_v46 = vsel %vm508_vm8, %v3527_v35, %v3526_v37 }
0x10af   :  { %3529 = vrot.lane.b32.xlu1 %v3528_v46, %s6425_s5 }
0x10e5   :  { %v3096_v18 = vpop.permute.xlu0 %3095 }
0x10e6   :  { %v7524_v50 = vmul.f32 %v7449_v6, %v3096_v18  ;;  %v7539_v6 = vld [vmem:[#allocation8 + $0x8] sm:$0xff] }
0x10e8   :  { %3603 = vrot.lane.b32.xlu0 %v7524_v50, %s6425_s5 }
0x1121   :  { %v3530_v24 = vpop.permute.xlu1 %3529 }
0x1122   :  { %5512 = vmatmul.mubr.msk.f32.vlgmr.msra.gmra.mxu0 %vm119_vm1, %v3530_v24 }
0x1123   :  { %5526 = vmatpush3.msra.mxu0 %v7529_v5  ;;  %5533 = vmatprep.mubr.msk.f32.mxu0 %vm6423_vm0, %v6422_v0 }
0x1124   :  { %5527 = vmatprep.subr.mxu0 %v6422_v0 }
0x1125   :  { %5528 = vmatpush3.msra.mxu0 %v7535_v39 }
0x1126   :  { %5529 = vmatprep.subr.mxu0 %v6422_v0 }
0x1127   :  { %5530 = vmatpush3.msra.mxu0 %v7539_v6 }
0x1128   :  { %5531 = vmatprep.subr.mxu0 %v6422_v0 }
0x1129   :  { %5532 = vmatpush3.msra.mxu0 %v7543_v52 }
0x112a   :  { %5534 = vmatmul.mubr.msk.f32.vlgmr.msra.gmra.mxu0 %vm119_vm1, %v3530_v24  ;;  %5547 = vmatprep.subr.mxu0 %v6422_v0 }
0x112b   :  { %5548 = vmatpush3.msra.mxu0 %v7366_v41  ;;  %5555 = vmatprep.mubr.msk.f32.mxu0 %vm6423_vm0, %v6422_v0 }
0x112c   :  { %5549 = vmatprep.subr.mxu0 %v6422_v0 }
0x112d   :  { %5550 = vmatpush3.msra.mxu0 %v7372_v32 }
0x112e   :  { %5551 = vmatprep.subr.mxu0 %v6422_v0 }
0x112f   :  { %5552 = vmatpush3.msra.mxu0 %v7376_v63  ;;  %v3816_v63 = vld [vmem:[#allocation2 + $0x6] sm:$0x1] }
0x1130   :  { %5553 = vmatprep.subr.mxu0 %v6422_v0 }
0x1131   :  { %5554 = vmatpush3.msra.mxu0 %v7380_v30 }
0x1132   :  { %5569 = vmatprep.subr.mxu0 %v6422_v0 }
0x115a   :  { %v3604_v61 = vpop.permute.xlu0 %3603 }
0x115b   :  { %5523 = vmatmul.mubr.msk.f32.vlgmr.msra.gmra.mxu1 %vm119_vm1, %v3604_v61 }
0x115c   :  { %5537 = vmatpush3.msra.mxu1 %v7385_v45  ;;  %5544 = vmatprep.mubr.msk.f32.mxu1 %vm6423_vm0, %v6422_v0 }
0x115d   :  { %5538 = vmatprep.subr.mxu1 %v6422_v0 }
0x115e   :  { %5539 = vmatpush3.msra.mxu1 %v7391_v15 }
0x115f   :  { %5540 = vmatprep.subr.mxu1 %v6422_v0 }
0x1160   :  { %5541 = vmatpush3.msra.mxu1 %v7395_v40  ;;  %v3820_v40 = vld [vmem:[#allocation2 + $0x26] sm:$0x1] }
0x1161   :  { %5542 = vmatprep.subr.mxu1 %v6422_v0 }
0x1162   :  { %5543 = vmatpush3.msra.mxu1 %v7399_v1 }
0x1163   :  { %5558 = vmatprep.subr.mxu1 %v6422_v0 }
0x11e2   :  { %v3599_v41 = vpop.f32.mrf.mxu0 }
0x11e4   :  { %v5513_v32 = vpop.f32.mrf.mxu0 }
0x11ea   :  { %v3890_v30 = vpop.f32.mrf.mxu0 }
0x11eb   :  { %v3910_v45 = vadd.f32 %v3890_v30, %v3816_v63  ;;  %v3895_v59 = vrot.slane %v3890_v30, 1  ;;  %v3896_v15 = vrot.slane %v3890_v30, 2  ;;  %v3898_v60 = vrot.slane %v3890_v30, 4 }
0x11ec   :  { %v5535_v51 = vpop.f32.mrf.mxu0  ;;  %v3897_v11 = vrot.slane %v3890_v30, 3  ;;  %v3900_v1 = vrot.slane %v3890_v30, 6  ;;  %v3899_v49 = vrot.slane %v3890_v30, 5  ;;  %v3901_v21 = vrot.slane %v3890_v30, 7 }
0x11ed   :  { %6032 = vtanh.f32 %v3910_v45  ;;  %v3911_v10 = vadd.f32 %v3895_v59, %v3817_v2  ;;  %v3912_v47 = vadd.f32 %v3896_v15, %v3818_v48  ;;  %v3914_v27 = vadd.f32 %v3898_v60, %v3820_v40 }
0x11ee   :  { %v3913_v9 = vadd.f32 %v3897_v11, %v3819_v55  ;;  %v3916_v3 = vadd.f32 %v3900_v1, %v3822_v23  ;;  %v3915_v26 = vadd.f32 %v3899_v49, %v3821_v38  ;;  %v3917_v16 = vadd.f32 %v3901_v21, %v3823_v54 }
0x11ef   :  { %6034 = vtanh.f32 %v3911_v10  ;;  %v5184_v46 = vmul.f32 -1.442695, %v3910_v45  ;;  %v5185_v18 = vmul.f32 -1.442695, %v3911_v10  ;;  %v5186_v24 = vmul.f32 -1.442695, %v3912_v47 }
0x11f0   :  { %6036 = vtanh.f32 %v3912_v47  ;;  %v5188_v61 = vmul.f32 -1.442695, %v3914_v27  ;;  %v5189_v32 = vmul.f32 -1.442695, %v3915_v26  ;;  %v5190_v30 = vmul.f32 -1.442695, %v3916_v3 }
0x11f1   :  { %6038 = vtanh.f32 %v3914_v27  ;;  %v5191_v59 = vmul.f32 -1.442695, %v3917_v16 }
0x11f2   :  { %6040 = vtanh.f32 %v3913_v9 }
0x11f3   :  { %6042 = vtanh.f32 %v3916_v3 }
0x11f4   :  { %6044 = vtanh.f32 %v3915_v26 }
0x11f5   :  { %6046 = vtanh.f32 %v3917_v16 }
0x11fa   :  { %v6033_v14 = vpop.eup %6032 }
0x11fb   :  { %3990 = vrot.lane.b32.xlu1 %v6033_v14, %s6424_s4 }
0x11fc   :  { %v6035_v56 = vpop.eup %6034 }
0x11fd   :  { %v6037_v43 = vpop.eup %6036 }
0x11fe   :  { %3994 = vrot.lane.b32.xlu0 %v6037_v43, %s6424_s4  ;;  %v6039_v42 = vpop.eup %6038 }
0x11ff   :  { %3992 = vrot.lane.b32.xlu1 %v6035_v56, %s6424_s4  ;;  %v6041_v25 = vpop.eup %6040 }
0x1200   :  { %v6043_v7 = vpop.eup %6042 }
0x1201   :  { %v6045_v31 = vpop.eup %6044 }
0x1202   :  { %3996 = vrot.lane.b32.xlu0 %v6041_v25, %s6424_s4  ;;  %v6047_v12 = vpop.eup %6046 }
0x1203   :  { %3998 = vrot.lane.b32.xlu1 %v6039_v42, %s6424_s4 }
0x1206   :  { %4000 = vrot.lane.b32.xlu0 %v6045_v31, %s6424_s4 }
0x1207   :  { %4002 = vrot.lane.b32.xlu1 %v6043_v7, %s6424_s4 }
0x120a   :  { %4004 = vrot.lane.b32.xlu0 %v6047_v12, %s6424_s4 }
0x121b   :  { %v3673_v13 = vpop.f32.mrf.mxu1 }
0x121c   :  { %v3674_v57 = vadd.f32 %v3673_v13, %v3599_v41  ;;  %v5187_v41 = vmul.f32 -1.442695, %v3913_v9 }
0x121d   :  { %v5524_v36 = vpop.f32.mrf.mxu1 }
0x121e   :  { %v3677_v37 = vadd.f32 %v7580_v19, %v3674_v57 }
0x1220   :  { %6048 = vtanh.f32 %v3677_v37  ;;  %v5182_v9 = vmul.f32 -1.442695, %v3677_v37 }
0x1221   :  { %6050 = vpow2.f32 %v5184_v46 }
0x1222   :  { %6052 = vpow2.f32 %v5185_v18 }
0x1223   :  { %6054 = vpow2.f32 %v5186_v24 }
0x1224   :  { %6056 = vpow2.f32 %v5188_v61 }
0x1225   :  { %6058 = vpow2.f32 %v5187_v41 }
0x1226   :  { %6060 = vpow2.f32 %v5189_v32 }
0x1227   :  { %6062 = vpow2.f32 %v5190_v30 }
0x122d   :  { %v6049_v35 = vpop.eup %6048 }
0x122e   :  { %3687 = vrot.lane.b32.xlu1 %v6049_v35, %s6424_s4  ;;  %v6051_v63 = vpop.eup %6050 }
0x122f   :  { %v3942_v51 = vadd.f32 1.0, %v6051_v63  ;;  %v6053_v2 = vpop.eup %6052 }
0x1230   :  { %v6055_v45 = vpop.eup %6054  ;;  %v3943_v15 = vadd.f32 1.0, %v6053_v2 }
0x1231   :  { %6064 = vrcp.f32 %v3942_v51  ;;  %v6057_v48 = vpop.eup %6056  ;;  %v3944_v60 = vadd.f32 1.0, %v6055_v45 }
0x1232   :  { %6066 = vpow2.f32 %v5191_v59  ;;  %v6059_v10 = vpop.eup %6058  ;;  %v3946_v11 = vadd.f32 1.0, %v6057_v48 }
0x1233   :  { %v6061_v40 = vpop.eup %6060  ;;  %6068 = vrcp.f32 %v3943_v15  ;;  %v3945_v55 = vadd.f32 1.0, %v6059_v10 }
0x1234   :  { %v6063_v47 = vpop.eup %6062  ;;  %6070 = vrcp.f32 %v3944_v60  ;;  %v3947_v1 = vadd.f32 1.0, %v6061_v40 }
0x1235   :  { %v3948_v23 = vadd.f32 1.0, %v6063_v47  ;;  %6072 = vrcp.f32 %v3946_v11 }
0x1236   :  { %6074 = vrcp.f32 %v3945_v55 }
0x1237   :  { %6076 = vrcp.f32 %v3947_v1 }
0x1238   :  { %6078 = vrcp.f32 %v3948_v23 }
0x1239   :  { %6080 = vpow2.f32 %v5182_v9 }
0x123e   :  { %v7584_v27 = vpop.eup %6064 }
0x123f   :  { %v6067_v14 = vpop.eup %6066  ;;  %v3974_v2 = vmul.f32 %v7584_v27, %v7455_v22 }
0x1240   :  { %v3949_v3 = vadd.f32 1.0, %v6067_v14  ;;  %v7588_v21 = vpop.eup %6068 }
0x1241   :  { %v7590_v54 = vpop.eup %6070  ;;  %v3975_v48 = vmul.f32 %v7588_v21, %v7462_v34 }
0x1242   :  { %6082 = vrcp.f32 %v3949_v3  ;;  %v7595_v42 = vpop.eup %6072  ;;  %v3976_v60 = vmul.f32 %v7590_v54, %v7464_v58 }
0x1243   :  { %v7598_v7 = vpop.eup %6074  ;;  %v3978_v22 = vmul.f32 %v7595_v42, %v7472_v17 }
0x1244   :  { %v7602_v12 = vpop.eup %6076  ;;  %v3977_v55 = vmul.f32 %v7598_v7, %v7474_v8 }
0x1245   :  { %v7605_v36 = vpop.eup %6078  ;;  %v3979_v17 = vmul.f32 %v7602_v12, %v7485_v44 }
0x1246   :  { %v6081_v35 = vpop.eup %6080  ;;  %v3980_v9 = vmul.f32 %v7605_v36, %v7483_v62 }
0x1247   :  { %v3681_v61 = vadd.f32 1.0, %v6081_v35 }
0x1249   :  { %6084 = vrcp.f32 %v3681_v61 }
0x124f   :  { %v7612_v41 = vpop.eup %6082 }
0x1250   :  { %v3981_v62 = vmul.f32 %v7612_v41, %v7491_v29 }
0x1256   :  { %v7616_v30 = vpop.eup %6084 }
0x1257   :  { %v3685_v29 = vmul.f32 %v7616_v30, %v7503_v33 }
0x126d   :  { %v3991_v49 = vpop.permute.xlu1 %3990 }
0x126e   :  { %v4014_v38 = vmul.f32 %v7584_v27, %v3991_v49 }
0x1270   :  { %4030 = vrot.lane.b32.xlu0 %v4014_v38, %s6425_s5  ;;  %v3995_v16 = vpop.permute.xlu0 %3994 }
0x1271   :  { %v3993_v26 = vpop.permute.xlu1 %3992  ;;  %v4016_v43 = vmul.f32 %v7590_v54, %v3995_v16 }
0x1272   :  { %v4015_v56 = vmul.f32 %v7588_v21, %v3993_v26 }
0x1273   :  { %4034 = vrot.lane.b32.xlu1 %v4016_v43, %s6425_s5 }
0x1274   :  { %4032 = vrot.lane.b32.xlu0 %v4015_v56, %s6425_s5  ;;  %v3997_v31 = vpop.permute.xlu0 %3996 }
0x1275   :  { %v3999_v25 = vpop.permute.xlu1 %3998  ;;  %v4017_v57 = vmul.f32 %v7598_v7, %v3997_v31 }
0x1276   :  { %v4018_v13 = vmul.f32 %v7595_v42, %v3999_v25 }
0x1277   :  { %4036 = vrot.lane.b32.xlu1 %v4017_v57, %s6425_s5 }
0x1278   :  { %4038 = vrot.lane.b32.xlu0 %v4018_v13, %s6425_s5  ;;  %v4001_v46 = vpop.permute.xlu0 %4000 }
0x1279   :  { %v4003_v37 = vpop.permute.xlu1 %4002  ;;  %v4019_v24 = vmul.f32 %v7602_v12, %v4001_v46 }
0x127a   :  { %v4020_v18 = vmul.f32 %v7605_v36, %v4003_v37 }
0x127b   :  { %4040 = vrot.lane.b32.xlu1 %v4019_v24, %s6425_s5 }
0x127c   :  { %4042 = vrot.lane.b32.xlu0 %v4020_v18, %s6425_s5  ;;  %v4005_v32 = vpop.permute.xlu0 %4004 }
0x127d   :  { %v4021_v63 = vmul.f32 %v7612_v41, %v4005_v32 }
0x127f   :  { %4044 = vrot.lane.b32.xlu1 %v4021_v63, %s6425_s5 }
0x12a0   :  { %v3688_v51 = vpop.permute.xlu1 %3687 }
0x12a1   :  { %v3690_v59 = vmul.f32 %v7616_v30, %v3688_v51 }
0x12a3   :  { %3692 = vrot.lane.b32.xlu0 %v3690_v59, %s6425_s5 }
0x12e2   :  { %v4031_v45 = vpop.permute.xlu0 %4030 }
0x12e3   :  { %v7622_v15 = vadd.f32 %v4031_v45, %v3974_v2 }
0x12e5   :  { %6086 = vtanh.f32 %v7622_v15  ;;  %v4035_v40 = vpop.permute.xlu1 %4034 }
0x12e6   :  { %v4033_v10 = vpop.permute.xlu0 %4032  ;;  %v7631_v47 = vadd.f32 %v4035_v40, %v3976_v60 }
0x12e7   :  { %v7629_v11 = vadd.f32 %v4033_v10, %v3975_v48 }
0x12e9   :  { %6088 = vtanh.f32 %v7629_v11  ;;  %v4037_v1 = vpop.permute.xlu1 %4036 }
0x12ea   :  { %6090 = vtanh.f32 %v7631_v47  ;;  %v4039_v34 = vpop.permute.xlu0 %4038  ;;  %v7641_v58 = vadd.f32 %v4037_v1, %v3977_v55 }
0x12eb   :  { %v7639_v23 = vadd.f32 %v4039_v34, %v3978_v22 }
0x12ed   :  { %6092 = vtanh.f32 %v7639_v23  ;;  %v4041_v8 = vpop.permute.xlu1 %4040 }
0x12ee   :  { %6094 = vtanh.f32 %v7641_v58  ;;  %v4043_v38 = vpop.permute.xlu0 %4042  ;;  %v7652_v3 = vadd.f32 %v4041_v8, %v3979_v17 }
0x12ef   :  { %v7650_v14 = vadd.f32 %v4043_v38, %v3980_v9 }
0x12f1   :  { %6096 = vtanh.f32 %v7650_v14  ;;  %v4045_v26 = vpop.permute.xlu1 %4044 }
0x12f2   :  { %v6087_v49 = vpop.eup %6086  ;;  %6098 = vtanh.f32 %v7652_v3  ;;  %v7658_v16 = vadd.f32 %v4045_v26, %v3981_v62 }
0x12f3   :  { %4078 = vrot.lane.b32.xlu1 %v6087_v49, %s6424_s4 }
0x12f4   :  { %6100 = vtanh.f32 %v7658_v16 }
0x12f6   :  { %v6089_v56 = vpop.eup %6088 }
0x12f7   :  { %v6091_v44 = vpop.eup %6090  ;;  %4080 = vrot.lane.b32.xlu1 %v6089_v56, %s6424_s4 }
0x12f8   :  { %4082 = vrot.lane.b32.xlu0 %v6091_v44, %s6424_s4  ;;  %v6219_v44 = vld [vmem:[#allocation10] sm:$0xff] }
0x12fa   :  { %v6093_v43 = vpop.eup %6092 }
0x12fb   :  { %v6095_v25 = vpop.eup %6094  ;;  %4086 = vrot.lane.b32.xlu1 %v6093_v43, %s6424_s4  ;;  %v6220_v43 = vld [vmem:[#allocation11 + $0x8] sm:$0xff] }
0x12fc   :  { %4084 = vrot.lane.b32.xlu0 %v6095_v25, %s6424_s4  ;;  %v6221_v25 = vld [vmem:[#allocation11] sm:$0xff] }
0x12fe   :  { %v6097_v31 = vpop.eup %6096 }
0x12ff   :  { %v6099_v13 = vpop.eup %6098  ;;  %4090 = vrot.lane.b32.xlu1 %v6097_v31, %s6424_s4 }
0x1300   :  { %4088 = vrot.lane.b32.xlu0 %v6099_v13, %s6424_s4 }
0x1301   :  { %v6101_v57 = vpop.eup %6100 }
0x1304   :  { %4092 = vrot.lane.b32.xlu0 %v6101_v57, %s6424_s4 }
0x1315   :  { %v3693_v37 = vpop.permute.xlu0 %3692 }
0x1316   :  { %v7670_v35 = vadd.f32 %v3693_v37, %v3685_v29  ;;  %v4419_v29 = vld [vmem:[#allocation2 + $0x7] sm:$0x1] }
0x1318   :  { %6102 = vtanh.f32 %v7670_v35 }
0x1325   :  { %v6103_v46 = vpop.eup %6102 }
0x1326   :  { %3698 = vrot.lane.b32.xlu1 %v6103_v46, %s6424_s4 }
0x1365   :  { %v4079_v18 = vpop.permute.xlu1 %4078 }
0x1366   :  { %v4102_v33 = vmul.f32 %v7584_v27, %v4079_v18 }
0x1369   :  { %v4081_v24 = vpop.permute.xlu1 %4080 }
0x136a   :  { %v4083_v61 = vpop.permute.xlu0 %4082  ;;  %v4103_v32 = vmul.f32 %v7588_v21, %v4081_v24 }
0x136b   :  { %v4104_v63 = vmul.f32 %v7590_v54, %v4083_v61  ;;  %v4420_v61 = vld [vmem:[#allocation2 + $0xf] sm:$0x1] }
0x136c   :  { %v4118_v51 = vrot.slane %v4103_v32, 7 }
0x136d   :  { %v4087_v59 = vpop.permute.xlu1 %4086  ;;  %v4120_v2 = vrot.slane %v4104_v63, 6 }
0x136e   :  { %v4119_v45 = vsel %vm490_vm2, %v4118_v51, %v4102_v33  ;;  %v4085_v48 = vpop.permute.xlu0 %4084  ;;  %v4106_v60 = vmul.f32 %v7595_v42, %v4087_v59  ;;  %v4421_v33 = vld [vmem:[#allocation2 + $0x17] sm:$0x1] }
0x136f   :  { %v4105_v10 = vmul.f32 %v7598_v7, %v4085_v48  ;;  %v4121_v40 = vsel %vm493_vm3, %v4120_v2, %v4119_v45  ;;  %v4423_v2 = vld [vmem:[#allocation2 + $0x27] sm:$0x1]  ;;  %v4422_v48 = vld [vmem:[#allocation2 + $0x1f] sm:$0x1] }
0x1370   :  { %v4124_v22 = vrot.slane %v4106_v60, 4 }
0x1371   :  { %v4122_v55 = vrot.slane %v4105_v10, 5  ;;  %v4091_v34 = vpop.permute.xlu1 %4090 }
0x1372   :  { %v4089_v21 = vpop.permute.xlu0 %4088  ;;  %v4108_v54 = vmul.f32 %v7605_v36, %v4091_v34  ;;  %v4424_v34 = vld [vmem:[#allocation2 + $0x2f] sm:$0x1] }
0x1373   :  { %v4123_v27 = vsel %vm496_vm4, %v4122_v55, %v4121_v40  ;;  %v4107_v1 = vmul.f32 %v7602_v12, %v4089_v21  ;;  %v4425_v40 = vld [vmem:[#allocation2 + $0x37] sm:$0x1] }
0x1374   :  { %v4125_v49 = vsel %vm499_vm5, %v4124_v22, %v4123_v27  ;;  %v4128_v9 = vrot.slane %v4108_v54, 2 }
0x1375   :  { %v4126_v17 = vrot.slane %v4107_v1, 3 }
0x1376   :  { %v4093_v38 = vpop.permute.xlu0 %4092 }
0x1377   :  { %v4127_v42 = vsel %vm502_vm6, %v4126_v17, %v4125_v49  ;;  %v4109_v7 = vmul.f32 %v7612_v41, %v4093_v38  ;;  %v4426_v49 = vld [vmem:[#allocation2 + $0x3f] sm:$0x1] }
0x1378   :  { %v4129_v8 = vsel %vm505_vm7, %v4128_v9, %v4127_v42 }
0x1379   :  { %v4130_v62 = vrot.slane %v4109_v7, 1 }
0x137b   :  { %v4131_v26 = vsel %vm508_vm8, %v4130_v62, %v4129_v8 }
0x137c   :  { %4132 = vrot.lane.b32.xlu0 %v4131_v26, %s6425_s5 }
0x1398   :  { %v3699_v36 = vpop.permute.xlu1 %3698 }
0x1399   :  { %v7691_v56 = vmul.f32 %v7616_v30, %v3699_v36  ;;  %v6218_v30 = vld [vmem:[#allocation11 + $0x10] sm:$0xff] }
0x139b   :  { %4206 = vrot.lane.b32.xlu1 %v7691_v56, %s6425_s5 }
0x13ee   :  { %v4133_v12 = vpop.permute.xlu0 %4132 }
0x13ef   :  { %5545 = vmatmul.mubr.msk.f32.vlgmr.msra.gmra.mxu1 %vm119_vm1, %v4133_v12 }
0x13f0   :  { %5559 = vmatpush3.msra.mxu1 %v7529_v5  ;;  %5566 = vmatprep.mubr.msk.f32.mxu1 %vm6423_vm0, %v6422_v0  ;;  %v6214_v5 = vld [vmem:[#allocation10 + $0x18] sm:$0xff] }
0x13f1   :  { %5560 = vmatprep.subr.mxu1 %v6422_v0 }
0x13f2   :  { %5561 = vmatpush3.msra.mxu1 %v7535_v39  ;;  %v6215_v39 = vld [vmem:[#allocation10 + $0x10] sm:$0xff] }
0x13f3   :  { %5562 = vmatprep.subr.mxu1 %v6422_v0 }
0x13f4   :  { %5563 = vmatpush3.msra.mxu1 %v7539_v6  ;;  %v6216_v6 = vld [vmem:[#allocation10 + $0x8] sm:$0xff] }
0x13f5   :  { %5564 = vmatprep.subr.mxu1 %v6422_v0 }
0x13f6   :  { %5565 = vmatpush3.msra.mxu1 %v7543_v52  ;;  %v6217_v52 = vld [vmem:[#allocation11 + $0x18] sm:$0xff] }
0x13f7   :  { %5567 = vmatmul.mubr.msk.f32.vlgmr.msra.gmra.mxu1 %vm119_vm1, %v4133_v12  ;;  %5580 = vmatprep.subr.mxu1 %v6422_v0 }
0x13f8   :  { %5581 = vmatpush3.msra.mxu1 %v6214_v5  ;;  %5588 = vmatprep.mubr.msk.f32.mxu1 %vm6423_vm0, %v6422_v0 }
0x13f9   :  { %5582 = vmatprep.subr.mxu1 %v6422_v0 }
0x13fa   :  { %5583 = vmatpush3.msra.mxu1 %v6215_v39 }
0x13fb   :  { %5584 = vmatprep.subr.mxu1 %v6422_v0 }
0x13fc   :  { %5585 = vmatpush3.msra.mxu1 %v6216_v6 }
0x13fd   :  { %5586 = vmatprep.subr.mxu1 %v6422_v0 }
0x13fe   :  { %5587 = vmatpush3.msra.mxu1 %v6219_v44 }
0x140d   :  { %v4207_v41 = vpop.permute.xlu1 %4206 }
0x140e   :  { %5556 = vmatmul.mubr.msk.f32.vlgmr.msra.gmra.mxu0 %vm119_vm1, %v4207_v41 }
0x140f   :  { %5570 = vmatpush3.msra.mxu0 %v6217_v52  ;;  %5577 = vmatprep.mubr.msk.f32.mxu0 %vm6423_vm0, %v6422_v0 }
0x1410   :  { %5571 = vmatprep.subr.mxu0 %v6422_v0 }
0x1411   :  { %5572 = vmatpush3.msra.mxu0 %v6218_v30 }
0x1412   :  { %5573 = vmatprep.subr.mxu0 %v6422_v0 }
0x1413   :  { %5574 = vmatpush3.msra.mxu0 %v6220_v43 }
0x1414   :  { %5575 = vmatprep.subr.mxu0 %v6422_v0 }
0x1415   :  { %5576 = vmatpush3.msra.mxu0 %v6221_v25 }
0x14af   :  { %v4202_v31 = vpop.f32.mrf.mxu1 }
0x14b1   :  { %v5546_v13 = vpop.f32.mrf.mxu1 }
0x14b7   :  { %v4493_v57 = vpop.f32.mrf.mxu1 }
0x14b8   :  { %v4513_v37 = vadd.f32 %v4493_v57, %v4419_v29  ;;  %v4498_v24 = vrot.slane %v4493_v57, 1  ;;  %v4499_v32 = vrot.slane %v4493_v57, 2  ;;  %v4501_v51 = vrot.slane %v4493_v57, 4 }
0x14b9   :  { %v5568_v46 = vpop.f32.mrf.mxu1  ;;  %v4500_v45 = vrot.slane %v4493_v57, 3  ;;  %v4503_v60 = vrot.slane %v4493_v57, 6  ;;  %v4502_v22 = vrot.slane %v4493_v57, 5  ;;  %v4504_v27 = vrot.slane %v4493_v57, 7 }
0x14ba   :  { %6104 = vtanh.f32 %v4513_v37  ;;  %v4514_v59 = vadd.f32 %v4498_v24, %v4420_v61  ;;  %v4515_v0 = vadd.f32 %v4499_v32, %v4421_v33  ;;  %v4517_v10 = vadd.f32 %v4501_v51, %v4423_v2 }
0x14bb   :  { %v4516_v55 = vadd.f32 %v4500_v45, %v4422_v48  ;;  %v4519_v54 = vadd.f32 %v4503_v60, %v4425_v40  ;;  %v4518_v1 = vadd.f32 %v4502_v22, %v4424_v34  ;;  %v4520_v17 = vadd.f32 %v4504_v27, %v4426_v49 }
0x14bc   :  { %6106 = vtanh.f32 %v4514_v59  ;;  %v5196_v39 = vmul.f32 -1.442695, %v4513_v37  ;;  %v5197_v41 = vmul.f32 -1.442695, %v4514_v59  ;;  %v5198_v6 = vmul.f32 -1.442695, %v4515_v0 }
0x14bd   :  { %6108 = vtanh.f32 %v4515_v0  ;;  %v5200_v52 = vmul.f32 -1.442695, %v4517_v10  ;;  %v5199_v30 = vmul.f32 -1.442695, %v4516_v55  ;;  %v5202_v43 = vmul.f32 -1.442695, %v4519_v54 }
0x14be   :  { %6110 = vtanh.f32 %v4517_v10  ;;  %v5201_v25 = vmul.f32 -1.442695, %v4518_v1  ;;  %v5203_v13 = vmul.f32 -1.442695, %v4520_v17 }
0x14bf   :  { %6112 = vtanh.f32 %v4516_v55 }
0x14c0   :  { %6114 = vtanh.f32 %v4519_v54 }
0x14c1   :  { %6116 = vtanh.f32 %v4518_v1 }
0x14c2   :  { %6118 = vtanh.f32 %v4520_v17 }
0x14c7   :  { %v6105_v21 = vpop.eup %6104 }
0x14c8   :  { %4593 = vrot.lane.b32.xlu0 %v6105_v21, %s6424_s4 }
0x14c9   :  { %v6107_v42 = vpop.eup %6106 }
0x14ca   :  { %v6109_v7 = vpop.eup %6108 }
0x14cb   :  { %4597 = vrot.lane.b32.xlu1 %v6109_v7, %s6424_s4  ;;  %v6111_v8 = vpop.eup %6110 }
0x14cc   :  { %4595 = vrot.lane.b32.xlu0 %v6107_v42, %s6424_s4  ;;  %v6113_v62 = vpop.eup %6112 }
0x14cd   :  { %v6115_v26 = vpop.eup %6114 }
0x14ce   :  { %v4276_v18 = vpop.f32.mrf.mxu0  ;;  %v6117_v36 = vpop.eup %6116 }
0x14cf   :  { %v4277_v9 = vadd.f32 %v4276_v18, %v4202_v31  ;;  %4599 = vrot.lane.b32.xlu1 %v6113_v62, %s6424_s4  ;;  %v6119_v12 = vpop.eup %6118 }
0x14d0   :  { %v5557_v63 = vpop.f32.mrf.mxu0  ;;  %4601 = vrot.lane.b32.xlu0 %v6111_v8, %s6424_s4 }
0x14d1   :  { %v4280_v38 = vadd.f32 %v7580_v19, %v4277_v9 }
0x14d3   :  { %6120 = vtanh.f32 %v4280_v38  ;;  %4603 = vrot.lane.b32.xlu1 %v6117_v36, %s6424_s4  ;;  %v5194_v29 = vmul.f32 -1.442695, %v4280_v38 }
0x14d4   :  { %4605 = vrot.lane.b32.xlu0 %v6115_v26, %s6424_s4  ;;  %6122 = vpow2.f32 %v5196_v39 }
0x14d5   :  { %6124 = vpow2.f32 %v5197_v41 }
0x14d6   :  { %6126 = vpow2.f32 %v5198_v6 }
0x14d7   :  { %4607 = vrot.lane.b32.xlu1 %v6119_v12, %s6424_s4  ;;  %6128 = vpow2.f32 %v5200_v52 }
0x14d8   :  { %6130 = vpow2.f32 %v5199_v30 }
0x14d9   :  { %6132 = vpow2.f32 %v5202_v43 }
0x14da   :  { %6134 = vpow2.f32 %v5201_v25 }
0x14e0   :  { %v6121_v5 = vpop.eup %6120 }
0x14e1   :  { %4290 = vrot.lane.b32.xlu0 %v6121_v5, %s6424_s4  ;;  %v6123_v44 = vpop.eup %6122 }
0x14e2   :  { %v4545_v31 = vadd.f32 1.0, %v6123_v44  ;;  %v6125_v57 = vpop.eup %6124 }
0x14e3   :  { %v6127_v37 = vpop.eup %6126  ;;  %v4546_v46 = vadd.f32 1.0, %v6125_v57 }
0x14e4   :  { %6136 = vrcp.f32 %v4545_v31  ;;  %v6129_v18 = vpop.eup %6128  ;;  %v4547_v24 = vadd.f32 1.0, %v6127_v37 }
0x14e5   :  { %6138 = vpow2.f32 %v5203_v13  ;;  %v6131_v61 = vpop.eup %6130  ;;  %v4549_v32 = vadd.f32 1.0, %v6129_v18 }
0x14e6   :  { %6140 = vpow2.f32 %v5194_v29  ;;  %v6133_v63 = vpop.eup %6132  ;;  %v4548_v33 = vadd.f32 1.0, %v6131_v61 }
0x14e7   :  { %6142 = vrcp.f32 %v4546_v46  ;;  %v6135_v51 = vpop.eup %6134  ;;  %v4551_v2 = vadd.f32 1.0, %v6133_v63 }
0x14e8   :  { %6144 = vrcp.f32 %v4547_v24  ;;  %v4550_v0 = vadd.f32 1.0, %v6135_v51 }
0x14e9   :  { %6146 = vrcp.f32 %v4549_v32 }
0x14ea   :  { %6148 = vrcp.f32 %v4548_v33 }
0x14eb   :  { %6150 = vrcp.f32 %v4551_v2 }
0x14ec   :  { %6152 = vrcp.f32 %v4550_v0 }
0x14f1   :  { %v7728_v59 = vpop.eup %6136 }
0x14f2   :  { %v6139_v60 = vpop.eup %6138  ;;  %v4577_v43 = vmul.f32 %v7728_v59, %v7622_v15 }
0x14f3   :  { %v6141_v10 = vpop.eup %6140  ;;  %v4552_v40 = vadd.f32 1.0, %v6139_v60 }
0x14f4   :  { %v4284_v22 = vadd.f32 1.0, %v6141_v10  ;;  %v7732_v55 = vpop.eup %6142 }
0x14f5   :  { %6154 = vrcp.f32 %v4552_v40  ;;  %v7734_v21 = vpop.eup %6144  ;;  %v4578_v13 = vmul.f32 %v7732_v55, %v7629_v11 }
0x14f6   :  { %6156 = vrcp.f32 %v4284_v22  ;;  %v7739_v49 = vpop.eup %6146  ;;  %v4579_v29 = vmul.f32 %v7734_v21, %v7631_v47 }
0x14f7   :  { %v7742_v17 = vpop.eup %6148  ;;  %v4581_v61 = vmul.f32 %v7739_v49, %v7639_v23 }
0x14f8   :  { %v7747_v8 = vpop.eup %6150  ;;  %v4580_v32 = vmul.f32 %v7742_v17, %v7641_v58 }
0x14f9   :  { %v7750_v26 = vpop.eup %6152 }
0x14fa   :  { %v4582_v60 = vmul.f32 %v7750_v26, %v7652_v3 }
0x1502   :  { %v7756_v39 = vpop.eup %6154 }
0x1503   :  { %v7759_v52 = vpop.eup %6156 }
0x153a   :  { %v4594_v45 = vpop.permute.xlu0 %4593 }
0x153b   :  { %v4617_v48 = vmul.f32 %v7728_v59, %v4594_v45 }
0x153d   :  { %4633 = vrot.lane.b32.xlu1 %v4617_v48, %s6425_s5  ;;  %v4598_v54 = vpop.permute.xlu1 %4597  ;;  %v4583_v48 = vmul.f32 %v7747_v8, %v7650_v14  ;;  %v4584_v14 = vmul.f32 %v7756_v39, %v7658_v16 }
0x153e   :  { %v4596_v34 = vpop.permute.xlu0 %4595  ;;  %v4619_v1 = vmul.f32 %v7734_v21, %v4598_v54 }
0x153f   :  { %v4618_v27 = vmul.f32 %v7732_v55, %v4596_v34 }
0x1540   :  { %4637 = vrot.lane.b32.xlu0 %v4619_v1, %s6425_s5 }
0x1541   :  { %4635 = vrot.lane.b32.xlu1 %v4618_v27, %s6425_s5  ;;  %v4600_v38 = vpop.permute.xlu1 %4599 }
0x1542   :  { %v4602_v9 = vpop.permute.xlu0 %4601  ;;  %v4620_v7 = vmul.f32 %v7742_v17, %v4600_v38 }
0x1543   :  { %v4621_v42 = vmul.f32 %v7739_v49, %v4602_v9 }
0x1544   :  { %4639 = vrot.lane.b32.xlu0 %v4620_v7, %s6425_s5 }
0x1545   :  { %4641 = vrot.lane.b32.xlu1 %v4621_v42, %s6425_s5  ;;  %v4604_v36 = vpop.permute.xlu1 %4603  ;;  %v4288_v42 = vmul.f32 %v7759_v52, %v7670_v35 }
0x1546   :  { %v4606_v62 = vpop.permute.xlu0 %4605  ;;  %v4622_v5 = vmul.f32 %v7750_v26, %v4604_v36 }
0x1547   :  { %v4623_v12 = vmul.f32 %v7747_v8, %v4606_v62 }
0x1548   :  { %4643 = vrot.lane.b32.xlu0 %v4622_v5, %s6425_s5 }
0x1549   :  { %4645 = vrot.lane.b32.xlu1 %v4623_v12, %s6425_s5  ;;  %v4608_v41 = vpop.permute.xlu1 %4607 }
0x154a   :  { %v4624_v6 = vmul.f32 %v7756_v39, %v4608_v41 }
0x154c   :  { %4647 = vrot.lane.b32.xlu0 %v4624_v6, %s6425_s5 }
0x1553   :  { %v4291_v30 = vpop.permute.xlu0 %4290 }
0x1554   :  { %v4293_v44 = vmul.f32 %v7759_v52, %v4291_v30 }
0x1556   :  { %4295 = vrot.lane.b32.xlu1 %v4293_v44, %s6425_s5 }
0x15af   :  { %v4634_v25 = vpop.permute.xlu1 %4633 }
0x15b0   :  { %v4657_v31 = vadd.f32 %v4634_v25, %v4577_v43 }
0x15b2   :  { %6158 = vtanh.f32 %v4657_v31  ;;  %v4638_v37 = vpop.permute.xlu0 %4637 }
0x15b3   :  { %v4636_v57 = vpop.permute.xlu1 %4635  ;;  %v4659_v18 = vadd.f32 %v4638_v37, %v4579_v29 }
0x15b4   :  { %v4658_v46 = vadd.f32 %v4636_v57, %v4578_v13 }
0x15b5   :  { %v5034_v15 = vrot.slane %v4659_v18, 6 }
0x15b6   :  { %6160 = vtanh.f32 %v4658_v46  ;;  %v5032_v24 = vrot.slane %v4658_v46, 7  ;;  %v4640_v33 = vpop.permute.xlu0 %4639 }
0x15b7   :  { %6162 = vtanh.f32 %v4659_v18  ;;  %v4642_v63 = vpop.permute.xlu1 %4641  ;;  %v4660_v2 = vadd.f32 %v4640_v33, %v4580_v32 }
0x15b8   :  { %v5033_v11 = vsel %vm490_vm2, %v5032_v24, %v4657_v31  ;;  %v4661_v51 = vadd.f32 %v4642_v63, %v4581_v61 }
0x15b9   :  { %v5035_v47 = vsel %vm493_vm3, %v5034_v15, %v5033_v11  ;;  %v5036_v23 = vrot.slane %v4660_v2, 5 }
0x15ba   :  { %6164 = vtanh.f32 %v4661_v51  ;;  %v5038_v0 = vrot.slane %v4661_v51, 4  ;;  %v4644_v10 = vpop.permute.xlu0 %4643 }
0x15bb   :  { %6166 = vtanh.f32 %v4660_v2  ;;  %v4646_v58 = vpop.permute.xlu1 %4645  ;;  %v5037_v22 = vsel %vm496_vm4, %v5036_v23, %v5035_v47  ;;  %v4662_v34 = vadd.f32 %v4644_v10, %v4582_v60 }
0x15bc   :  { %v4663_v40 = vadd.f32 %v4646_v58, %v4583_v48  ;;  %v5039_v54 = vsel %vm499_vm5, %v5038_v0, %v5037_v22 }
0x15bd   :  { %v5040_v1 = vrot.slane %v4662_v34, 3 }
0x15be   :  { %6168 = vtanh.f32 %v4663_v40  ;;  %v5042_v27 = vrot.slane %v4663_v40, 2  ;;  %v4648_v9 = vpop.permute.xlu0 %4647 }
0x15bf   :  { %v6159_v45 = vpop.eup %6158  ;;  %6170 = vtanh.f32 %v4662_v34  ;;  %v5041_v3 = vsel %vm502_vm6, %v5040_v1, %v5039_v54  ;;  %v4664_v38 = vadd.f32 %v4648_v9, %v4584_v14  ;;  %v691_v1 = vlaneseq }
0x15c0   :  { %4681 = vrot.lane.b32.xlu0 %v6159_v45, %s6424_s4  ;;  %v5043_v7 = vsel %vm505_vm7, %v5042_v27, %v5041_v3  ;;  %v6426_v27 = vmov 1966171168  }
0x15c1   :  { %6172 = vtanh.f32 %v4664_v38  ;;  %v5044_v36 = vrot.slane %v4664_v38, 1 }
0x15c3   :  { %v6161_v62 = vpop.eup %6160  ;;  %v7794_v16 = vsel %vm508_vm8, %v5044_v36, %v5043_v7  ;;  %v692_v7 = vshrl.u32 %v691_v1, 7 }
0x15c4   :  { %v6163_v5 = vpop.eup %6162  ;;  %4683 = vrot.lane.b32.xlu0 %v6161_v62, %s6424_s4 }
0x15c5   :  { %4685 = vrot.lane.b32.xlu1 %v6163_v5, %s6424_s4 }
0x15c7   :  { %v6165_v6 = vpop.eup %6164 }
0x15c8   :  { %v4296_v12 = vpop.permute.xlu1 %4295  ;;  %v6167_v35 = vpop.eup %6166  ;;  %4689 = vrot.lane.b32.xlu0 %v6165_v6, %s6424_s4 }
0x15c9   :  { %v7790_v41 = vadd.f32 %v4296_v12, %v4288_v42  ;;  %4687 = vrot.lane.b32.xlu1 %v6167_v35, %s6424_s4  ;;  %v687_v12 = vcombine.high %v6879_v20, %v6879_v20  ;;  %v7838_v35 = vsub.s32 0, %v692_v7 }
0x15cb   :  { %6174 = vtanh.f32 %v7790_v41  ;;  %v6169_v30 = vpop.eup %6168 }
0x15cc   :  { %v6171_v44 = vpop.eup %6170  ;;  %4693 = vrot.lane.b32.xlu0 %v6169_v30, %s6424_s4 }
0x15cd   :  { %4691 = vrot.lane.b32.xlu1 %v6171_v44, %s6424_s4 }
0x15ce   :  { %v6173_v43 = vpop.eup %6172 }
0x15d1   :  { %4695 = vrot.lane.b32.xlu1 %v6173_v43, %s6424_s4 }
0x15d8   :  { %v6175_v25 = vpop.eup %6174 }
0x15d9   :  { %4301 = vrot.lane.b32.xlu0 %v6175_v25, %s6424_s4 }
0x1632   :  { %v4682_v31 = vpop.permute.xlu0 %4681 }
0x1633   :  { %v4705_v46 = vmul.f32 %v7728_v59, %v4682_v31 }
0x1636   :  { %v4684_v13 = vpop.permute.xlu0 %4683 }
0x1637   :  { %v4686_v29 = vpop.permute.xlu1 %4685  ;;  %v4706_v57 = vmul.f32 %v7732_v55, %v4684_v13 }
0x1638   :  { %v4707_v37 = vmul.f32 %v7734_v21, %v4686_v29 }
0x1639   :  { %v4721_v18 = vrot.slane %v4706_v57, 7 }
0x163a   :  { %v4690_v24 = vpop.permute.xlu0 %4689  ;;  %v4723_v61 = vrot.slane %v4707_v37, 6 }
0x163b   :  { %v4722_v15 = vsel %vm490_vm2, %v4721_v18, %v4705_v46  ;;  %v4688_v32 = vpop.permute.xlu1 %4687  ;;  %v4709_v63 = vmul.f32 %v7739_v49, %v4690_v24  ;;  %v1291_v46 = vcombine.high %v7028_v4, %v7028_v4 }
0x163c   :  { %v4708_v11 = vmul.f32 %v7742_v17, %v4688_v32  ;;  %v4724_v33 = vsel %vm493_vm3, %v4723_v61, %v4722_v15 }
0x163d   :  { %v4727_v51 = vrot.slane %v4709_v63, 4 }
0x163e   :  { %v4725_v47 = vrot.slane %v4708_v11, 5  ;;  %v4694_v2 = vpop.permute.xlu0 %4693 }
0x163f   :  { %v4692_v55 = vpop.permute.xlu1 %4691  ;;  %v4711_v21 = vmul.f32 %v7747_v8, %v4694_v2 }
0x1640   :  { %v4726_v59 = vsel %vm496_vm4, %v4725_v47, %v4724_v33  ;;  %v4710_v45 = vmul.f32 %v7750_v26, %v4692_v55  ;;  %v1894_v55 = vcombine.high %v7184_v28, %v7184_v28 }
0x1641   :  { %v4728_v0 = vsel %vm499_vm5, %v4727_v51, %v4726_v59  ;;  %v4731_v48 = vrot.slane %v4711_v21, 2 }
0x1642   :  { %v4729_v23 = vrot.slane %v4710_v45, 3 }
0x1643   :  { %v4696_v60 = vpop.permute.xlu1 %4695 }
0x1644   :  { %v4730_v49 = vsel %vm502_vm6, %v4729_v23, %v4728_v0  ;;  %v4712_v17 = vmul.f32 %v7756_v39, %v4696_v60 }
0x1645   :  { %v4732_v58 = vsel %vm505_vm7, %v4731_v48, %v4730_v49 }
0x1646   :  { %v4733_v10 = vrot.slane %v4712_v17, 1 }
0x1648   :  { %v4734_v8 = vsel %vm508_vm8, %v4733_v10, %v4732_v58 }
0x1649   :  { %4735 = vrot.lane.b32.xlu1 %v4734_v8, %s6425_s5 }
0x164b   :  { %v4302_v40 = vpop.permute.xlu0 %4301 }
0x164c   :  { %v7818_v22 = vmul.f32 %v7759_v52, %v4302_v40  ;;  %v689_v52 = vunpack.c.l.s4 %v6426_v27  ;;  %v2497_v40 = vcombine.high %v7350_v53, %v7350_v53 }
0x164e   :  { %4809 = vrot.lane.b32.xlu0 %v7818_v22, %s6425_s5  ;;  %v690_v42 = vunpack.c.0.s8 %v689_v52 }
0x1650   :  { %v7831_v62 = vsub.s32 %v690_v42, %v692_v7  ;;  %v3100_v42 = vcombine.high %v7524_v50, %v7524_v50 }
0x1652   :  { %v694_v36 = vrot.slane %v6879_v20, %v7831_v62  ;;  %v7857_v29 = vrot.slane %v7028_v4, %v7831_v62  ;;  %v7869_v15 = vrot.slane %v1291_v46, %v7831_v62  ;;  %v7880_v51 = vrot.slane %v7184_v28, %v7831_v62 }
0x1653   :  { %v7892_v0 = vrot.slane %v1894_v55, %v7831_v62  ;;  %v7903_v17 = vrot.slane %v7350_v53, %v7831_v62 }
0x1654   :  { %v702_v5 = vcombine.high %v694_v36, %v694_v36  ;;  %v710_v6 = vrot.slane %v694_v36, %v7831_v62  ;;  %v1306_v18 = vcombine.high %v7857_v29, %v7857_v29  ;;  %v1307_v4 = vcombine.high %v7869_v15, %v7869_v15 }
0x1655   :  { %v1909_v21 = vcombine.high %v7880_v51, %v7880_v51  ;;  %v1910_v28 = vcombine.high %v7892_v0, %v7892_v0  ;;  %v2512_v8 = vcombine.high %v7903_v17, %v7903_v17 }
0x1656   :  { %v7845_v44 = vrot.slane %v702_v5, %v7831_v62  ;;  %v739_v43 = vrot.slane %v710_v6, %v7838_v35  ;;  %v732_v25 = vcombine.high %v710_v6, %v710_v6  ;;  %v1328_v63 = vrot.slane %v1306_v18, %v7831_v62 }
0x1657   :  { %v1335_v2 = vrot.slane %v1307_v4, %v7831_v62  ;;  %v1931_v23 = vrot.slane %v1909_v21, %v7831_v62  ;;  %v1938_v10 = vrot.slane %v1910_v28, %v7831_v62  ;;  %v2534_v27 = vrot.slane %v2512_v8, %v7831_v62 }
0x1658   :  { %v747_v31 = vrot.slane %v732_v25, %v7838_v35  ;;  %v734_v13 = vcombine.high %v7845_v44, %v7845_v44  ;;  %v1347_v11 = vrot.slane %v1328_v63, %v7838_v35  ;;  %v1338_v33 = vcombine.high %v1328_v63, %v1328_v63 }
0x1659   :  { %v1363_v59 = vrot.slane %v1335_v2, %v7838_v35  ;;  %v1339_v45 = vcombine.high %v1335_v2, %v1335_v2  ;;  %v1950_v60 = vrot.slane %v1931_v23, %v7838_v35  ;;  %v1941_v49 = vcombine.high %v1931_v23, %v1931_v23 }
0x165a   :  { %v751_v57 = vrot.slane %v734_v13, %v7838_v35  ;;  %v1355_v47 = vrot.slane %v1338_v33, %v7838_v35  ;;  %v2553_v52 = vrot.slane %v2534_v27, %v7838_v35  ;;  %v2544_v1 = vcombine.high %v2534_v27, %v2534_v27 }
0x165b   :  { %v1371_v48 = vrot.slane %v1339_v45, %v7838_v35  ;;  %v1958_v58 = vrot.slane %v1941_v49, %v7838_v35  ;;  %v7938_v5 = vrot.slane %v3100_v42, %v7831_v62  ;;  %v7975_v63 = vrot.slane %v7818_v22, %v7831_v62 }
0x165d   :  { %v4329_v2 = vrot.slane %v7975_v63, %v7831_v62 }
0x165f   :  { %v4351_v45 = vcombine.high %v4329_v2, %v4329_v2 }
0x1661   :  { %v4366_v23 = vrot.slane %v4351_v45, %v7838_v35 }
0x16bb   :  { %v4736_v26 = vpop.permute.xlu1 %4735 }
0x16bc   :  { %5023 = vst.msk [vmem:[#allocation14] sm:$0xff] %vm119_vm1, %v4736_v26  ;;  %5578 = vmatmul.mubr.msk.f32.vlgmr.msra.gmra.mxu0 %vm119_vm1, %v4736_v26  ;;  %v1966_v26 = vrot.slane %v1938_v10, %v7838_v35 }
0x16c0   :  { %v4810_v34 = vpop.permute.xlu0 %4809 }
0x16c1   :  { %5589 = vmatmul.mubr.msk.f32.vlgmr.msra.gmra.mxu1 %vm119_vm1, %v4810_v34  ;;  %v1942_v34 = vcombine.high %v1938_v10, %v1938_v10 }
0x177c   :  { %v4805_v39 = vpop.f32.mrf.mxu0 }
0x177e   :  { %v5579_v9 = vpop.f32.mrf.mxu0 }
0x177f   :  { %v2561_v9 = vrot.slane %v2544_v1, %v7838_v35  ;;  %v1314_v1 = vrot.slane %v7857_v29, %v7831_v62  ;;  %v1321_v29 = vrot.slane %v7869_v15, %v7831_v62 }
0x1781   :  { %v4879_v54 = vpop.f32.mrf.mxu1 }
0x1782   :  { %v4880_v14 = vadd.f32 %v4879_v54, %v4805_v39  ;;  %v7915_v39 = vrot.slane %v2497_v40, %v7831_v62  ;;  %v1974_v54 = vrot.slane %v1942_v34, %v7838_v35 }
0x1783   :  { %v5590_v3 = vpop.f32.mrf.mxu1 }
0x1784   :  { %v7828_v38 = vadd.f32 %v7580_v19, %v4880_v14  ;;  %v7842_v19 = vrot.slane %v687_v12, %v7831_v62  ;;  %v2513_v53 = vcombine.high %v7915_v39, %v7915_v39  ;;  %v7926_v14 = vrot.slane %v7524_v50, %v7831_v62 }
0x1785   :  { %v7945_v50 = vrot.slane %v7938_v5, %v7831_v62 }
0x1786   :  { %6176 = vtanh.f32 %v7828_v38  ;;  %v703_v20 = vcombine.high %v7842_v19, %v7842_v19  ;;  %v2541_v3 = vrot.slane %v2513_v53, %v7831_v62  ;;  %v3115_v7 = vcombine.high %v7926_v14, %v7926_v14 }
0x1787   :  { %v3146_v13 = vcombine.high %v7945_v50, %v7945_v50  ;;  %v717_v34 = vrot.slane %v7842_v19, %v7831_v62 }
0x1788   :  { %v731_v37 = vrot.slane %v703_v20, %v7831_v62  ;;  %v2569_v36 = vrot.slane %v2541_v3, %v7838_v35  ;;  %v2545_v12 = vcombine.high %v2541_v3, %v2541_v3  ;;  %v7951_v20 = vrot.slane %v7691_v56, %v7831_v62 }
0x1789   :  { %v3176_v18 = vrot.slane %v3146_v13, %v7838_v35  ;;  %v755_v27 = vrot.slane %v717_v34, %v7838_v35  ;;  %v733_v53 = vcombine.high %v717_v34, %v717_v34  ;;  %v1336_v3 = vcombine.high %v1314_v1, %v1314_v1 }
0x178a   :  { %v759_v24 = vrot.slane %v731_v37, %v7838_v35  ;;  %v735_v61 = vcombine.high %v731_v37, %v731_v37  ;;  %v2577_v6 = vrot.slane %v2545_v12, %v7838_v35  ;;  %v3703_v37 = vcombine.high %v7691_v56, %v7691_v56 }
0x178b   :  { %v3726_v46 = vrot.slane %v7951_v20, %v7831_v62  ;;  %v1359_v12 = vrot.slane %v1321_v29, %v7838_v35 }
0x178c   :  { %v767_v32 = vrot.slane %v735_v61, %v7838_v35 }
0x178d   :  { %v3755_v61 = vrot.slane %v3726_v46, %v7838_v35 }
0x1793   :  { %v6177_v30 = vpop.eup %6176 }
0x1794   :  { %4893 = vrot.lane.b32.xlu1 %v6177_v30, %s6424_s4  ;;  %v3137_v30 = vrot.slane %v3115_v7, %v7831_v62  ;;  %v1351_v7 = vrot.slane %v1336_v3, %v7838_v35  ;;  %v3123_v3 = vrot.slane %v7926_v14, %v7831_v62 }
0x1796   :  { %v3147_v25 = vcombine.high %v3137_v30, %v3137_v30 }
0x1798   :  { %768 = vrot.lane.b32.xlu1 %v739_v43, %s6425_s5  ;;  %v3156_v43 = vrot.slane %v3137_v30, %v7838_v35 }
0x179c   :  { %772 = vrot.lane.b32.xlu1 %v747_v31, %s6425_s5  ;;  %v3164_v31 = vrot.slane %v3147_v25, %v7838_v35 }
0x17a0   :  { %774 = vrot.lane.b32.xlu1 %v751_v57, %s6425_s5  ;;  %v5206_v57 = vmul.f32 -1.442695, %v7828_v38 }
0x17a2   :  { %6178 = vpow2.f32 %v5206_v57 }
0x17a4   :  { %778 = vrot.lane.b32.xlu1 %v759_v24, %s6425_s5  ;;  %v7965_v24 = vrot.slane %v3703_v37, %v7831_v62 }
0x17a6   :  { %v3733_v56 = vrot.slane %v7965_v24, %v7831_v62 }
0x17a8   :  { %782 = vrot.lane.b32.xlu1 %v767_v32, %s6425_s5  ;;  %v3748_v32 = vcombine.high %v3726_v46, %v3726_v46  ;;  %v3771_v4 = vrot.slane %v3733_v56, %v7838_v35 }
0x17aa   :  { %v3763_v38 = vrot.slane %v3748_v32, %v7838_v35 }
0x17ac   :  { %1374 = vrot.lane.b32.xlu1 %v1347_v11, %s6425_s5  ;;  %v3749_v11 = vcombine.high %v3733_v56, %v3733_v56 }
0x17ae   :  { %v3779_v55 = vrot.slane %v3749_v11, %v7838_v35 }
0x17af   :  { %v6179_v33 = vpop.eup %6178 }
0x17b0   :  { %1378 = vrot.lane.b32.xlu1 %v1355_v47, %s6425_s5  ;;  %v4306_v47 = vcombine.high %v7818_v22, %v7818_v22  ;;  %v4887_v21 = vadd.f32 1.0, %v6179_v33 }
0x17b2   :  { %6180 = vrcp.f32 %v4887_v21 }
0x17b4   :  { %1382 = vrot.lane.b32.xlu1 %v1363_v59, %s6425_s5  ;;  %v7986_v59 = vrot.slane %v4306_v47, %v7831_v62 }
0x17b6   :  { %v4336_v22 = vrot.slane %v7986_v59, %v7831_v62 }
0x17b8   :  { %1386 = vrot.lane.b32.xlu1 %v1371_v48, %s6425_s5  ;;  %v4358_v48 = vrot.slane %v4329_v2, %v7838_v35  ;;  %v4374_v28 = vrot.slane %v4336_v22, %v7838_v35 }
0x17bc   :  { %1977 = vrot.lane.b32.xlu1 %v1950_v60, %s6425_s5  ;;  %v4352_v60 = vcombine.high %v4336_v22, %v4336_v22 }
0x17be   :  { %v4382_v49 = vrot.slane %v4352_v60, %v7838_v35 }
0x17c0   :  { %1981 = vrot.lane.b32.xlu1 %v1958_v58, %s6425_s5  ;;  %v7998_v58 = vpop.eup %6180 }
0x17c4   :  { %1985 = vrot.lane.b32.xlu1 %v1966_v26, %s6425_s5  ;;  %v743_v26 = vrot.slane %v7845_v44, %v7838_v35  ;;  %v763_v44 = vrot.slane %v733_v53, %v7838_v35  ;;  %v4891_v53 = vmul.f32 %v7998_v58, %v7790_v41  ;;  %v3152_v41 = vrot.slane %v3123_v3, %v7838_v35 }
0x17c8   :  { %1989 = vrot.lane.b32.xlu1 %v1974_v54, %s6425_s5 }
0x17cc   :  { %2580 = vrot.lane.b32.xlu1 %v2553_v52, %s6425_s5 }
0x17d0   :  { %2584 = vrot.lane.b32.xlu1 %v2561_v9, %s6425_s5  ;;  %v1343_v9 = vrot.slane %v1314_v1, %v7838_v35 }
0x17d4   :  { %2588 = vrot.lane.b32.xlu1 %v2569_v36, %s6425_s5 }
0x17d8   :  { %2592 = vrot.lane.b32.xlu1 %v2577_v6, %s6425_s5  ;;  %v1337_v6 = vcombine.high %v1321_v29, %v1321_v29  ;;  %v3145_v29 = vcombine.high %v3123_v3, %v3123_v3 }
0x17da   :  { %v1367_v25 = vrot.slane %v1337_v6, %v7838_v35  ;;  %v3160_v6 = vrot.slane %v3145_v29, %v7838_v35 }
0x17dc   :  { %3183 = vrot.lane.b32.xlu1 %v3156_v43, %s6425_s5  ;;  %v1917_v43 = vrot.slane %v7880_v51, %v7831_v62  ;;  %v1924_v51 = vrot.slane %v7892_v0, %v7831_v62 }
0x17de   :  { %v1939_v13 = vcombine.high %v1917_v43, %v1917_v43 }
0x17e0   :  { %3187 = vrot.lane.b32.xlu1 %v3164_v31, %s6425_s5  ;;  %v1946_v31 = vrot.slane %v1917_v43, %v7838_v35  ;;  %v1954_v37 = vrot.slane %v1939_v13, %v7838_v35 }
0x17e4   :  { %3193 = vrot.lane.b32.xlu1 %v3176_v18, %s6425_s5  ;;  %v1962_v18 = vrot.slane %v1924_v51, %v7838_v35 }
0x17e8   :  { %3784 = vrot.lane.b32.xlu1 %v3755_v61, %s6425_s5  ;;  %v1940_v61 = vcombine.high %v1924_v51, %v1924_v51 }
0x17ea   :  { %v1970_v56 = vrot.slane %v1940_v61, %v7838_v35 }
0x17ec   :  { %3788 = vrot.lane.b32.xlu1 %v3763_v38, %s6425_s5  ;;  %v2520_v38 = vrot.slane %v7903_v17, %v7831_v62  ;;  %v2527_v17 = vrot.slane %v7915_v39, %v7831_v62 }
0x17ee   :  { %v2542_v11 = vcombine.high %v2520_v38, %v2520_v38  ;;  %v2543_v21 = vcombine.high %v2527_v17, %v2527_v17 }
0x17f0   :  { %3792 = vrot.lane.b32.xlu1 %v3771_v4, %s6425_s5  ;;  %v2549_v4 = vrot.slane %v2520_v38, %v7838_v35  ;;  %v2557_v47 = vrot.slane %v2542_v11, %v7838_v35 }
0x17f4   :  { %3796 = vrot.lane.b32.xlu1 %v3779_v55, %s6425_s5  ;;  %v2565_v55 = vrot.slane %v2527_v17, %v7838_v35 }
0x17f8   :  { %4387 = vrot.lane.b32.xlu1 %v4358_v48, %s6425_s5  ;;  %v2573_v48 = vrot.slane %v2543_v21, %v7838_v35 }
0x17fc   :  { %4391 = vrot.lane.b32.xlu1 %v4366_v23, %s6425_s5 }
0x1800   :  { %4395 = vrot.lane.b32.xlu1 %v4374_v28, %s6425_s5 }
0x1804   :  { %4399 = vrot.lane.b32.xlu1 %v4382_v49, %s6425_s5 }
0x1806   :  { %v4894_v10 = vpop.permute.xlu1 %4893 }
0x1807   :  { %v4896_v40 = vmul.f32 %v7998_v58, %v4894_v10 }
0x1809   :  { %4898 = vrot.lane.b32.xlu0 %v4896_v40, %s6425_s5 }
0x180a   :  { %v769_v8 = vpop.permute.xlu1 %768 }
0x180b   :  { %793 = vst.msk [vmem:[#allocation13] sm:$0x1] %vm792_vm9, %v769_v8 }
0x180d   :  { %770 = vrot.lane.b32.xlu0 %v743_v26, %s6425_s5 }
0x180e   :  { %v773_v54 = vpop.permute.xlu1 %772 }
0x180f   :  { %795 = vst.msk [vmem:[#allocation13 + $0x10] sm:$0x1] %vm792_vm9, %v773_v54 }
0x1811   :  { %776 = vrot.lane.b32.xlu0 %v755_v27, %s6425_s5 }
0x1812   :  { %v775_v52 = vpop.permute.xlu1 %774 }
0x1813   :  { %796 = vst.msk [vmem:[#allocation13 + $0x18] sm:$0x1] %vm792_vm9, %v775_v52 }
0x1815   :  { %780 = vrot.lane.b32.xlu0 %v763_v44, %s6425_s5 }
0x1816   :  { %v779_v19 = vpop.permute.xlu1 %778 }
0x1817   :  { %798 = vst.msk [vmem:[#allocation13 + $0x28] sm:$0x1] %vm792_vm9, %v779_v19 }
0x1819   :  { %1372 = vrot.lane.b32.xlu0 %v1343_v9, %s6425_s5 }
0x181a   :  { %v783_v42 = vpop.permute.xlu1 %782 }
0x181b   :  { %800 = vst.msk [vmem:[#allocation13 + $0x38] sm:$0x1] %vm792_vm9, %v783_v42 }
0x181d   :  { %1376 = vrot.lane.b32.xlu0 %v1351_v7, %s6425_s5 }
0x181e   :  { %v1375_v36 = vpop.permute.xlu1 %1374 }
0x181f   :  { %1397 = vst.msk [vmem:[#allocation13 + $0x9] sm:$0x1] %vm792_vm9, %v1375_v36 }
0x1821   :  { %1380 = vrot.lane.b32.xlu0 %v1359_v12, %s6425_s5  ;;  %v3116_v12 = vcombine.high %v7938_v5, %v7938_v5  ;;  %v3718_v5 = vcombine.high %v7951_v20, %v7951_v20  ;;  %v3719_v20 = vcombine.high %v7965_v24, %v7965_v24  ;;  %v4321_v24 = vcombine.high %v7975_v63, %v7975_v63 }
0x1822   :  { %v1379_v30 = vpop.permute.xlu1 %1378  ;;  %v4322_v63 = vcombine.high %v7986_v59, %v7986_v59 }
0x1823   :  { %1399 = vst.msk [vmem:[#allocation13 + $0x19] sm:$0x1] %vm792_vm9, %v1379_v30  ;;  %v3168_v30 = vrot.slane %v7945_v50, %v7838_v35  ;;  %v3144_v43 = vrot.slane %v3116_v12, %v7831_v62  ;;  %v4343_v11 = vrot.slane %v4321_v24, %v7831_v62 }
0x1825   :  { %1384 = vrot.lane.b32.xlu0 %v1367_v25, %s6425_s5  ;;  %v4362_v17 = vrot.slane %v4343_v11, %v7838_v35 }
0x1826   :  { %v1383_v15 = vpop.permute.xlu1 %1382 }
0x1827   :  { %1401 = vst.msk [vmem:[#allocation13 + $0x29] sm:$0x1] %vm792_vm9, %v1383_v15  ;;  %v3172_v15 = vrot.slane %v3144_v43, %v7838_v35 }
0x1829   :  { %1975 = vrot.lane.b32.xlu0 %v1946_v31, %s6425_s5  ;;  %v3148_v31 = vcombine.high %v3144_v43, %v3144_v43 }
0x182a   :  { %v1387_v57 = vpop.permute.xlu1 %1386 }
0x182b   :  { %1403 = vst.msk [vmem:[#allocation13 + $0x39] sm:$0x1] %vm792_vm9, %v1387_v57  ;;  %v3180_v50 = vrot.slane %v3148_v31, %v7838_v35  ;;  %v3740_v57 = vrot.slane %v3718_v5, %v7831_v62 }
0x182d   :  { %1979 = vrot.lane.b32.xlu0 %v1954_v37, %s6425_s5  ;;  %v3759_v51 = vrot.slane %v3740_v57, %v7838_v35 }
0x182e   :  { %v1978_v46 = vpop.permute.xlu1 %1977 }
0x182f   :  { %2000 = vst.msk [vmem:[#allocation13 + $0xa] sm:$0x1] %vm792_vm9, %v1978_v46  ;;  %v3750_v46 = vcombine.high %v3740_v57, %v3740_v57 }
0x1831   :  { %1983 = vrot.lane.b32.xlu0 %v1962_v18, %s6425_s5  ;;  %v3767_v61 = vrot.slane %v3750_v46, %v7838_v35 }
0x1832   :  { %v1982_v32 = vpop.permute.xlu1 %1981 }
0x1833   :  { %2002 = vst.msk [vmem:[#allocation13 + $0x1a] sm:$0x1] %vm792_vm9, %v1982_v32  ;;  %v3747_v32 = vrot.slane %v3719_v20, %v7831_v62 }
0x1835   :  { %1987 = vrot.lane.b32.xlu0 %v1970_v56, %s6425_s5  ;;  %v3775_v56 = vrot.slane %v3747_v32, %v7838_v35 }
0x1836   :  { %v1986_v0 = vpop.permute.xlu1 %1985 }
0x1837   :  { %2004 = vst.msk [vmem:[#allocation13 + $0x2a] sm:$0x1] %vm792_vm9, %v1986_v0  ;;  %v3751_v0 = vcombine.high %v3747_v32, %v3747_v32 }
0x1839   :  { %2578 = vrot.lane.b32.xlu0 %v2549_v4, %s6425_s5 }
0x183a   :  { %v1990_v33 = vpop.permute.xlu1 %1989 }
0x183b   :  { %2006 = vst.msk [vmem:[#allocation13 + $0x3a] sm:$0x1] %vm792_vm9, %v1990_v33  ;;  %v3783_v33 = vrot.slane %v3751_v0, %v7838_v35 }
0x183d   :  { %2582 = vrot.lane.b32.xlu0 %v2557_v47, %s6425_s5 }
0x183e   :  { %v2581_v2 = vpop.permute.xlu1 %2580 }
0x183f   :  { %2603 = vst.msk [vmem:[#allocation13 + $0xb] sm:$0x1] %vm792_vm9, %v2581_v2  ;;  %v4353_v2 = vcombine.high %v4343_v11, %v4343_v11 }
0x1841   :  { %2586 = vrot.lane.b32.xlu0 %v2565_v55, %s6425_s5  ;;  %v4370_v21 = vrot.slane %v4353_v2, %v7838_v35 }
0x1842   :  { %v2585_v45 = vpop.permute.xlu1 %2584 }
0x1843   :  { %2605 = vst.msk [vmem:[#allocation13 + $0x1b] sm:$0x1] %vm792_vm9, %v2585_v45  ;;  %v4350_v45 = vrot.slane %v4322_v63, %v7831_v62 }
0x1845   :  { %2590 = vrot.lane.b32.xlu0 %v2573_v48, %s6425_s5  ;;  %v4354_v59 = vcombine.high %v4350_v45, %v4350_v45 }
0x1846   :  { %v2589_v22 = vpop.permute.xlu1 %2588 }
0x1847   :  { %2607 = vst.msk [vmem:[#allocation13 + $0x2b] sm:$0x1] %vm792_vm9, %v2589_v22  ;;  %v4378_v22 = vrot.slane %v4350_v45, %v7838_v35 }
0x184a   :  { %v2593_v39 = vpop.permute.xlu1 %2592 }
0x184b   :  { %2609 = vst.msk [vmem:[#allocation13 + $0x3b] sm:$0x1] %vm792_vm9, %v2593_v39  ;;  %v4386_v39 = vrot.slane %v4354_v59, %v7838_v35 }
0x184e   :  { %v3184_v23 = vpop.permute.xlu1 %3183 }
0x184f   :  { %3206 = vst.msk [vmem:[#allocation13 + $0xc] sm:$0x1] %vm792_vm9, %v3184_v23 }
0x1852   :  { %v3188_v28 = vpop.permute.xlu1 %3187 }
0x1853   :  { %3208 = vst.msk [vmem:[#allocation13 + $0x1c] sm:$0x1] %vm792_vm9, %v3188_v28 }
0x1856   :  { %v3194_v60 = vpop.permute.xlu1 %3193 }
0x1857   :  { %3211 = vst.msk [vmem:[#allocation13 + $0x34] sm:$0x1] %vm792_vm9, %v3194_v60 }
0x185a   :  { %v3785_v49 = vpop.permute.xlu1 %3784 }
0x185b   :  { %3808 = vst.msk [vmem:[#allocation13 + $0x5] sm:$0x1] %vm792_vm9, %v3785_v49 }
0x185e   :  { %v3789_v10 = vpop.permute.xlu1 %3788 }
0x185f   :  { %3810 = vst.msk [vmem:[#allocation13 + $0x15] sm:$0x1] %vm792_vm9, %v3789_v10 }
0x1862   :  { %v3793_v40 = vpop.permute.xlu1 %3792 }
0x1863   :  { %3812 = vst.msk [vmem:[#allocation13 + $0x25] sm:$0x1] %vm792_vm9, %v3793_v40 }
0x1866   :  { %v3797_v8 = vpop.permute.xlu1 %3796 }
0x1867   :  { %3814 = vst.msk [vmem:[#allocation13 + $0x35] sm:$0x1] %vm792_vm9, %v3797_v8 }
0x186a   :  { %v4388_v26 = vpop.permute.xlu1 %4387 }
0x186b   :  { %4411 = vst.msk [vmem:[#allocation13 + $0x6] sm:$0x1] %vm792_vm9, %v4388_v26 }
0x186e   :  { %v4392_v34 = vpop.permute.xlu1 %4391 }
0x186f   :  { %4413 = vst.msk [vmem:[#allocation13 + $0x16] sm:$0x1] %vm792_vm9, %v4392_v34 }
0x1872   :  { %v4396_v54 = vpop.permute.xlu1 %4395 }
0x1873   :  { %4415 = vst.msk [vmem:[#allocation13 + $0x26] sm:$0x1] %vm792_vm9, %v4396_v54 }
0x1876   :  { %v4400_v27 = vpop.permute.xlu1 %4399 }
0x1877   :  { %4417 = vst.msk [vmem:[#allocation13 + $0x36] sm:$0x1] %vm792_vm9, %v4400_v27 }
0x187b   :  { %v4899_v52 = vpop.permute.xlu0 %4898 }
0x187c   :  { %v8077_v1 = vadd.f32 %v4899_v52, %v4891_v53 }
0x187e   :  { %6182 = vtanh.f32 %v8077_v1 }
0x187f   :  { %v771_v44 = vpop.permute.xlu0 %770 }
0x1880   :  { %794 = vst.msk [vmem:[#allocation13 + $0x8] sm:$0x1] %vm792_vm9, %v771_v44 }
0x1883   :  { %v777_v19 = vpop.permute.xlu0 %776 }
0x1884   :  { %797 = vst.msk [vmem:[#allocation13 + $0x20] sm:$0x1] %vm792_vm9, %v777_v19 }
0x1887   :  { %v781_v9 = vpop.permute.xlu0 %780 }
0x1888   :  { %799 = vst.msk [vmem:[#allocation13 + $0x30] sm:$0x1] %vm792_vm9, %v781_v9 }
0x188b   :  { %v6183_v42 = vpop.eup %6182  ;;  %v1373_v7 = vpop.permute.xlu0 %1372 }
0x188c   :  { %1396 = vst.msk [vmem:[#allocation13 + $0x1] sm:$0x1] %vm792_vm9, %v1373_v7  ;;  %4904 = vrot.lane.b32.xlu0 %v6183_v42, %s6424_s4 }
0x188f   :  { %v1377_v36 = vpop.permute.xlu0 %1376 }
0x1890   :  { %1398 = vst.msk [vmem:[#allocation13 + $0x11] sm:$0x1] %vm792_vm9, %v1377_v36  ;;  %3181 = vrot.lane.b32.xlu0 %v3152_v41, %s6425_s5 }
0x1893   :  { %v1381_v14 = vpop.permute.xlu0 %1380 }
0x1894   :  { %1400 = vst.msk [vmem:[#allocation13 + $0x21] sm:$0x1] %vm792_vm9, %v1381_v14  ;;  %3185 = vrot.lane.b32.xlu0 %v3160_v6, %s6425_s5 }
0x1897   :  { %v1385_v25 = vpop.permute.xlu0 %1384 }
0x1898   :  { %1402 = vst.msk [vmem:[#allocation13 + $0x31] sm:$0x1] %vm792_vm9, %v1385_v25  ;;  %3189 = vrot.lane.b32.xlu0 %v3168_v30, %s6425_s5 }
0x189b   :  { %v1976_v13 = vpop.permute.xlu0 %1975 }
0x189c   :  { %1999 = vst.msk [vmem:[#allocation13 + $0x2] sm:$0x1] %vm792_vm9, %v1976_v13  ;;  %3191 = vrot.lane.b32.xlu0 %v3172_v15, %s6425_s5 }
0x189f   :  { %v1980_v37 = vpop.permute.xlu0 %1979 }
0x18a0   :  { %2001 = vst.msk [vmem:[#allocation13 + $0x12] sm:$0x1] %vm792_vm9, %v1980_v37  ;;  %3195 = vrot.lane.b32.xlu0 %v3180_v50, %s6425_s5 }
0x18a3   :  { %v1984_v18 = vpop.permute.xlu0 %1983 }
0x18a4   :  { %2003 = vst.msk [vmem:[#allocation13 + $0x22] sm:$0x1] %vm792_vm9, %v1984_v18  ;;  %3786 = vrot.lane.b32.xlu0 %v3759_v51, %s6425_s5 }
0x18a7   :  { %v1988_v38 = vpop.permute.xlu0 %1987 }
0x18a8   :  { %2005 = vst.msk [vmem:[#allocation13 + $0x32] sm:$0x1] %vm792_vm9, %v1988_v38  ;;  %3790 = vrot.lane.b32.xlu0 %v3767_v61, %s6425_s5 }
0x18ab   :  { %v2579_v4 = vpop.permute.xlu0 %2578 }
0x18ac   :  { %2602 = vst.msk [vmem:[#allocation13 + $0x3] sm:$0x1] %vm792_vm9, %v2579_v4  ;;  %3794 = vrot.lane.b32.xlu0 %v3775_v56, %s6425_s5 }
0x18af   :  { %v2583_v47 = vpop.permute.xlu0 %2582 }
0x18b0   :  { %2604 = vst.msk [vmem:[#allocation13 + $0x13] sm:$0x1] %vm792_vm9, %v2583_v47  ;;  %3798 = vrot.lane.b32.xlu0 %v3783_v33, %s6425_s5 }
0x18b3   :  { %v2587_v55 = vpop.permute.xlu0 %2586 }
0x18b4   :  { %2606 = vst.msk [vmem:[#allocation13 + $0x23] sm:$0x1] %vm792_vm9, %v2587_v55  ;;  %4389 = vrot.lane.b32.xlu0 %v4362_v17, %s6425_s5 }
0x18b7   :  { %v2591_v48 = vpop.permute.xlu0 %2590 }
0x18b8   :  { %2608 = vst.msk [vmem:[#allocation13 + $0x33] sm:$0x1] %vm792_vm9, %v2591_v48  ;;  %4393 = vrot.lane.b32.xlu0 %v4370_v21, %s6425_s5 }
0x18bc   :  { %4397 = vrot.lane.b32.xlu0 %v4378_v22, %s6425_s5 }
0x18c0   :  { %4401 = vrot.lane.b32.xlu0 %v4386_v39, %s6425_s5 }
0x18fe   :  { %v4905_v23 = vpop.permute.xlu0 %4904 }
0x18ff   :  { %v4907_v28 = vmul.f32 %v7998_v58, %v4905_v23 }
0x1901   :  { %v4909_v60 = vcombine.high %v4907_v28, %v4907_v28  ;;  %v4916_v49 = vrot.slane %v4907_v28, %v7831_v62  ;;  %5050 = vrot.lane.b32.xlu1 %v4907_v28, %s6425_s5 }
0x1902   :  { %v3182_v10 = vpop.permute.xlu0 %3181 }
0x1903   :  { %v4923_v40 = vrot.slane %v4909_v60, %v7831_v62  ;;  %v4924_v8 = vcombine.high %v4916_v49, %v4916_v49  ;;  %v4932_v26 = vrot.slane %v4916_v49, %v7831_v62  ;;  %3205 = vst.msk [vmem:[#allocation13 + $0x4] sm:$0x1] %vm792_vm9, %v3182_v10 }
0x1905   :  { %v4946_v34 = vrot.slane %v4924_v8, %v7831_v62  ;;  %v4954_v54 = vcombine.high %v4932_v26, %v4932_v26  ;;  %v4961_v53 = vrot.slane %v4932_v26, %v7838_v35  ;;  %v4925_v58 = vcombine.high %v4923_v40, %v4923_v40 }
0x1906   :  { %v3186_v27 = vpop.permute.xlu0 %3185  ;;  %v4939_v19 = vrot.slane %v4923_v40, %v7831_v62 }
0x1907   :  { %3207 = vst.msk [vmem:[#allocation13 + $0x14] sm:$0x1] %vm792_vm9, %v3186_v27  ;;  %v4965_v52 = vrot.slane %v4946_v34, %v7838_v35  ;;  %v4956_v44 = vcombine.high %v4946_v34, %v4946_v34  ;;  %4990 = vrot.lane.b32.xlu1 %v4961_v53, %s6425_s5  ;;  %v4969_v3 = vrot.slane %v4954_v54, %v7838_v35 }
0x1908   :  { %v4953_v7 = vrot.slane %v4925_v58, %v7831_v62  ;;  %v4977_v29 = vrot.slane %v4939_v19, %v7838_v35  ;;  %v4955_v36 = vcombine.high %v4939_v19, %v4939_v19 }
0x1909   :  { %4992 = vrot.lane.b32.xlu0 %v4965_v52, %s6425_s5  ;;  %v4973_v42 = vrot.slane %v4956_v44, %v7838_v35 }
0x190a   :  { %v3190_v9 = vpop.permute.xlu0 %3189  ;;  %v4981_v12 = vrot.slane %v4953_v7, %v7838_v35  ;;  %v4957_v6 = vcombine.high %v4953_v7, %v4953_v7  ;;  %v4985_v62 = vrot.slane %v4955_v36, %v7838_v35 }
0x190b   :  { %3209 = vst.msk [vmem:[#allocation13 + $0x24] sm:$0x1] %vm792_vm9, %v3190_v9  ;;  %4994 = vrot.lane.b32.xlu1 %v4969_v3, %s6425_s5 }
0x190c   :  { %v4989_v30 = vrot.slane %v4957_v6, %v7838_v35 }
0x190d   :  { %4996 = vrot.lane.b32.xlu0 %v4973_v42, %s6425_s5 }
0x190e   :  { %v3192_v41 = vpop.permute.xlu0 %3191 }
0x190f   :  { %3210 = vst.msk [vmem:[#allocation13 + $0x2c] sm:$0x1] %vm792_vm9, %v3192_v41  ;;  %4998 = vrot.lane.b32.xlu1 %v4977_v29, %s6425_s5 }
0x1911   :  { %5000 = vrot.lane.b32.xlu0 %v4981_v12, %s6425_s5 }
0x1912   :  { %v3196_v14 = vpop.permute.xlu0 %3195 }
0x1913   :  { %3212 = vst.msk [vmem:[#allocation13 + $0x3c] sm:$0x1] %vm792_vm9, %v3196_v14  ;;  %5002 = vrot.lane.b32.xlu1 %v4985_v62, %s6425_s5 }
0x1915   :  { %5004 = vrot.lane.b32.xlu0 %v4989_v30, %s6425_s5 }
0x1916   :  { %v3787_v43 = vpop.permute.xlu0 %3786 }
0x1917   :  { %3809 = vst.msk [vmem:[#allocation13 + $0xd] sm:$0x1] %vm792_vm9, %v3787_v43  ;;  %5046 = vrot.lane.b32.xlu1 %v7794_v16, %s6427_s6 }
0x1919   :  { %5055 = vrot.lane.b32.xlu0 %v8077_v1, %s6427_s6 }
0x191a   :  { %v3791_v25 = vpop.permute.xlu0 %3790 }
0x191b   :  { %3811 = vst.msk [vmem:[#allocation13 + $0x1d] sm:$0x1] %vm792_vm9, %v3791_v25 }
0x191e   :  { %v3795_v5 = vpop.permute.xlu0 %3794 }
0x191f   :  { %3813 = vst.msk [vmem:[#allocation13 + $0x2d] sm:$0x1] %vm792_vm9, %v3795_v5 }
0x1922   :  { %v3799_v15 = vpop.permute.xlu0 %3798 }
0x1923   :  { %3815 = vst.msk [vmem:[#allocation13 + $0x3d] sm:$0x1] %vm792_vm9, %v3799_v15 }
0x1926   :  { %v4390_v35 = vpop.permute.xlu0 %4389 }
0x1927   :  { %4412 = vst.msk [vmem:[#allocation13 + $0xe] sm:$0x1] %vm792_vm9, %v4390_v35 }
0x192a   :  { %v4394_v31 = vpop.permute.xlu0 %4393 }
0x192b   :  { %4414 = vst.msk [vmem:[#allocation13 + $0x1e] sm:$0x1] %vm792_vm9, %v4394_v31 }
0x192e   :  { %v4398_v13 = vpop.permute.xlu0 %4397 }
0x192f   :  { %4416 = vst.msk [vmem:[#allocation13 + $0x2e] sm:$0x1] %vm792_vm9, %v4398_v13 }
0x1932   :  { %v4402_v16 = vpop.permute.xlu0 %4401 }
0x1933   :  { %4418 = vst.msk [vmem:[#allocation13 + $0x3e] sm:$0x1] %vm792_vm9, %v4402_v16 }
0x1973   :  { %v5051_v1 = vpop.permute.xlu1 %5050 }
0x1974   :  { %5053 = vst.msk [vmem:[#allocation14 + $0x8] sm:$0xff] %vm119_vm1, %v5051_v1 }
0x1975   :  { %6353 = shalt.err (!%p6350_p6)
}
0x1976   :  { %5082 = dma.vmem_to_hbm [thread:$0]  %s5077_s1, 256, %s8216_s8, [#allocation15], %s6416_s14, %s6416_s14, %s6417_s15  }
0x1977   :  { %s6429_s27 = smov [#allocation13]   ;;  %s6430_s8 = smov [#allocation16]  }
0x1978   :  { %s5064_s28 = sshll.u32 %s6429_s27, 4  ;;  %s5088_s29 = sshll.u32 %s6430_s8, 4  ;;  %s5065_s28 = int_to_ptr.vmem [resolvable:$true] %s5064_s28  ;;  %s5089_s29 = int_to_ptr.vmem [resolvable:$true] %s5088_s29 }
0x1979   :  { %v4991_v50 = vpop.permute.xlu1 %4990  ;;  %s6362_s30 = scalar_lea.vmem %s5065_s28, 1024  ;;  %p6367_p8 = scmp.lt.s32.totalorder %s5065_s28, %s5065_s28 }
0x197a   :  { %5014 = vst.msk [vmem:[#allocation13 + $0x7] sm:$0x1] %vm792_vm9, %v4991_v50  ;;  %p6363_p7 = scmp.ne.s32.totalorder %s5065_s28, %s6362_s30  ;;  %p6368_p9 = scmp.lt.s32.totalorder %s6362_s30, %s6362_s30 }
0x197b   :  { %v4993_v57 = vpop.permute.xlu0 %4992 }
0x197c   :  { %5015 = vst.msk [vmem:[#allocation13 + $0xf] sm:$0x1] %vm792_vm9, %v4993_v57  ;;  %p6369_p10 = por %p6368_p9, %p6367_p8 }
0x197d   :  { %v4995_v37 = vpop.permute.xlu1 %4994 }
0x197e   :  { %5016 = vst.msk [vmem:[#allocation13 + $0x17] sm:$0x1] %vm792_vm9, %v4995_v37  ;;  %p6370_p11 = pnand %p6369_p10, %p6363_p7 }
0x197f   :  { %v4997_v20 = vpop.permute.xlu0 %4996 }
0x1980   :  { %5017 = vst.msk [vmem:[#allocation13 + $0x1f] sm:$0x1] %vm792_vm9, %v4997_v20 }
0x1981   :  { %v4999_v51 = vpop.permute.xlu1 %4998 }
0x1982   :  { %5018 = vst.msk [vmem:[#allocation13 + $0x27] sm:$0x1] %vm792_vm9, %v4999_v51 }
0x1983   :  { %v5001_v46 = vpop.permute.xlu0 %5000 }
0x1984   :  { %5019 = vst.msk [vmem:[#allocation13 + $0x2f] sm:$0x1] %vm792_vm9, %v5001_v46 }
0x1985   :  { %v5003_v18 = vpop.permute.xlu1 %5002 }
0x1986   :  { %5020 = vst.msk [vmem:[#allocation13 + $0x37] sm:$0x1] %vm792_vm9, %v5003_v18 }
0x1987   :  { %v5005_v61 = vpop.permute.xlu0 %5004 }
0x1988   :  { %5021 = vst.msk [vmem:[#allocation13 + $0x3f] sm:$0x1] %vm792_vm9, %v5005_v61 }
0x1989   :  { %6373 = shalt.err (!%p6370_p11)
}
0x198a   :  { %5070 = dma.vmem_to_hbm [thread:$0]  %s5065_s28, 1024, %s8215_s7, [#allocation4], %s6416_s14, %s6416_s14, %s6417_s15   ;;  %v5047_v32 = vpop.permute.xlu1 %5046 }
0x198b   :  { %5049 = vst.msk [vmem:[#allocation16] sm:$0xff] %vm119_vm1, %v5047_v32  ;;  %v5056_v38 = vpop.permute.xlu0 %5055  ;;  %s6382_s0 = scalar_lea.vmem %s5089_s29, 256  ;;  %p6387_p13 = scmp.lt.s32.totalorder %s5089_s29, %s5089_s29 }
0x198c   :  { %5058 = vst.msk [vmem:[#allocation16 + $0x8] sm:$0xff] %vm119_vm1, %v5056_v38  ;;  %p6383_p12 = scmp.ne.s32.totalorder %s5089_s29, %s6382_s0  ;;  %p6388_p0 = scmp.lt.s32.totalorder %s6382_s0, %s6382_s0 }
0x198e   :  { %p6389_p1 = por %p6388_p0, %p6387_p13 }
0x1990   :  { %p6390_p2 = pnand %p6389_p1, %p6383_p12 }
0x1992   :  { %6393 = shalt.err (!%p6390_p2)
}
0x1993   :  { %5094 = dma.vmem_to_hbm [thread:$0]  %s5089_s29, 256, %s8217_s9, [#allocation15], %s6416_s14, %s6416_s14, %s6417_s15  }
0x1994   :  { %6410 = dma.done.wait [#allocation4], 1024  }
0x1995   :  { %6411 = vsyncadd [#allocation4], 4294966272 }
0x1996   :  { %6412 = dma.done.wait [#allocation15], 512  }
0x1997   :  { %6413 = vsyncadd [#allocation15], 4294966784 }
0x1998   :  { %5104 = vsyncpa [#allocation3], 1 }
0x1999   :  { %5105 = vsyncpa [#allocation6], 1 }
0x199a   :  { %5106 = vsyncpa [#allocation9], 1 }
0x199b   :  { %5107 = vsyncpa [#allocation12], 1 }
0x199c   :  { %5108 = vsyncpa [#allocation4], 1 }
0x199d   :  { %5109 = vsyncpa [#allocation15], 1 }

</bundles_post_ra>
